<compile_context>
chip_gen: v5e
topology: v5e:2x2
jax: 0.10.0
libtpu: 0.0.40
codegen_flags: <defaults>
</compile_context>

<pallas_src>
import numpy as np
import jax
import jax.numpy as jnp
from jax.experimental import pallas as pl
from jax.experimental.pallas import tpu as pltpu

_LANE_PAD = 128  # pooled-column blocks and the class dim are padded to one vreg width


def _dot(a, b):
    # Default precision: single-pass bf16 on the MXU, f32 accumulation.
    return jnp.dot(a, b, preferred_element_type=jnp.float32)


# ---------------------------------------------------------------------------
# Fused forward kernel: one grid step == B_TILE images stacked on sublanes.
# Activations are carried as 2-D (rows, lanes) tiles with channels minor on the
# lane dim, so every op is a plain 2-D matmul or an elementwise max.
# ---------------------------------------------------------------------------
def _fused_cnn_kernel(x_ref,
                      w1b, b1, sw1, rs1,
                      w2b, b2, sw2, rs2,
                      wfc1, bfc1, wfc2, bfc2,
                      o_ref):
    k = w1b.shape[0]                                 # 5
    x = x_ref[...]                                   # (B*28, 28*Cin) f32

    # ---- conv1: banded matmuls (im2col folded into w1b at init) ------------
    m1 = x.shape[0] - k + 1                          # B*28 - 4
    a = _dot(x[0:m1, :], w1b[0])
    for ki in range(1, k):
        a = a + _dot(x[ki:ki + m1, :], w1b[ki])
    a = a + b1[...]                                  # (m1, 24*10); rows that straddle an
                                                     # image boundary are garbage -> rs1 drops them

    # ---- 2x2 max-pool + ReLU ------------------------------------------------
    # columns: single select matmul -> [even | odd] halves padded to 128 lanes
    t = _dot(a, sw1[...])                            # (m1, 256)
    mc = jnp.maximum(t[:, :_LANE_PAD], t[:, _LANE_PAD:])          # (m1, 128)
    # rows: single select matmul -> [even ; odd] halves (also boundary filter)
    t = _dot(rs1[...], mc)                           # (2*B*12, 128)
    half = rs1.shape[0] // 2
    p1 = jnp.maximum(jnp.maximum(t[:half], t[half:]), 0.0)        # (B*12, 128)

    # ---- conv2 (Dropout2d == identity in eval mode) --------------------------
    m2 = p1.shape[0] - k + 1                         # B*12 - 4
    a = _dot(p1[0:m2, :], w2b[0])
    for ki in range(1, k):
        a = a + _dot(p1[ki:ki + m2, :], w2b[ki])
    a = a + b2[...]                                  # (m2, 8*20)

    # ---- 2x2 max-pool + ReLU; row select also reorders rows to (h, image) ----
    t = _dot(a, sw2[...])                            # (m2, 256)
    mc = jnp.maximum(t[:, :_LANE_PAD], t[:, _LANE_PAD:])          # (m2, 128)
    t = _dot(rs2[...], mc)                           # (2*4B, 128)
    half = rs2.shape[0] // 2
    p2 = jnp.maximum(jnp.maximum(t[:half], t[half:]), 0.0)        # (4B, 128)

    # ---- fc1 + ReLU (F.dropout == identity in eval mode) ---------------------
    # p2 rows are ordered (spatial_row, image): each spatial row is a contiguous
    # sublane-aligned (B, 128) slab, so no gather/transpose is needed.
    b = o_ref.shape[0]
    z = bfc1[...]                                    # (1, 50)
    for h in range(wfc1.shape[0]):                   # 4 spatial rows
        z = z + _dot(p2[h * b:(h + 1) * b, :], wfc1[h])           # (B, 50)
    z = jnp.maximum(z, 0.0)

    # ---- fc2 + log_softmax over 128 padded lanes (pad bias = -1e30) ----------
    logits = _dot(z, wfc2[...]) + bfc2[...]          # (B, 128)
    m = jnp.max(logits, axis=-1, keepdims=True)
    s = logits - m
    lse = jnp.log(jnp.sum(jnp.exp(s), axis=-1, keepdims=True))
    o_ref[...] = s - lse


# ---------------------------------------------------------------------------
# Host-side (outside jit) weight re-packing into the kernel's layouts.
# ---------------------------------------------------------------------------
def _band_conv_matrices(w_oihw, w_in, rows_pad=None):
    """Fold im2col into the conv weights: for activations laid out (rows, W*Cin)
    with Cin minor, conv == sum_ki act[ki:ki+M, :] @ band[ki]."""
    w = np.asarray(w_oihw, np.float32)
    co, ci, kh, kw = w.shape
    w_out = w_in - kw + 1
    rows = w_in * ci if rows_pad is None else rows_pad
    m = np.zeros((kh, rows, w_out * co), np.float32)
    for ki in range(kh):
        for wo in range(w_out):
            for kj in range(kw):
                wi = wo + kj
                m[ki, wi * ci:(wi + 1) * ci, wo * co:(wo + 1) * co] = w[:, :, ki, kj].T
    return m


def _pool_col_cat(w_conv, c, lane_pad=_LANE_PAD):
    """(W*C, 2*128) 0/1 matrix: lanes [0:128) pick even column pairs, lanes
    [128:256) pick odd column pairs; each half padded to 128 lanes."""
    wp = w_conv // 2
    assert wp * c <= lane_pad
    m = np.zeros((w_conv * c, 2 * lane_pad), np.float32)
    eye = np.eye(c, dtype=np.float32)
    for i in range(wp):
        m[(2 * i) * c:(2 * i + 1) * c, i * c:(i + 1) * c] = eye
        m[(2 * i + 1) * c:(2 * i + 2) * c, lane_pad + i * c:lane_pad + (i + 1) * c] = eye
    return m


def _pool1_row_cat(b, h_in, h_conv, k):
    """[even ; odd] row-select for pool1 over the batch-stacked conv1 output
    (drops image-boundary garbage rows). Output rows ordered (image, h)."""
    hp = h_conv // 2
    half = b * hp
    rows_in = b * h_in - (k - 1)
    m = np.zeros((2 * half, rows_in), np.float32)
    for bi in range(b):
        for h in range(hp):
            m[bi * hp + h, bi * h_in + 2 * h] = 1.0
            m[half + bi * hp + h, bi * h_in + 2 * h + 1] = 1.0
    return m


def _pool2_row_cat(b, h_in, h_conv, k):
    """[even ; odd] row-select for pool2; output rows ordered (h, image) so the
    fc1 per-row slabs are contiguous sublane-aligned (B, 128) slices."""
    hp = h_conv // 2
    half = b * hp
    rows_in = b * h_in - (k - 1)
    m = np.zeros((2 * half, rows_in), np.float32)
    for bi in range(b):
        for h in range(hp):
            m[h * b + bi, bi * h_in + 2 * h] = 1.0
            m[half + h * b + bi, bi * h_in + 2 * h + 1] = 1.0
    return m


def _fc1_row_weights(fc1_w, c, h, w, lane_pad=_LANE_PAD):
    """Permute fc1's input columns from PyTorch's (C,H,W) flatten order into the
    kernel's padded (w*C) lane layout; one (128, out) matrix per spatial row."""
    fw = np.asarray(fc1_w, np.float32)               # (out, C*H*W)
    m = np.zeros((h, lane_pad, fw.shape[0]), np.float32)
    for hi in range(h):
        for wi in range(w):
            for ci in range(c):
                m[hi, wi * c + ci, :] = fw[:, ci * h * w + hi * w + wi]
    return m


def pack_params(params, b_tile=32, height=28, width=28):
    """b_tile = images per grid step; must be a multiple of 8.  Default 32 keeps
    the (B^2-sized) row-select matrices + double buffering well under the 32 MiB
    scoped VMEM requested below (fits v5e/v6e/v7x)."""
    assert b_tile > 0 and b_tile % 8 == 0
    kh = params["conv1_w"].shape[-1]                 # 5
    c1 = params["conv1_w"].shape[0]                  # 10
    c2 = params["conv2_w"].shape[0]                  # 20
    h1, w1 = height - kh + 1, width - kh + 1         # 24, 24
    hp1, wp1 = h1 // 2, w1 // 2                      # 12, 12
    h2, w2 = hp1 - kh + 1, wp1 - kh + 1              # 8, 8
    hp2, wp2 = h2 // 2, w2 // 2                      # 4, 4
    num_classes = params["fc2_w"].shape[0]

    wfc2p = np.zeros((params["fc2_w"].shape[1], _LANE_PAD), np.float32)
    wfc2p[:, :num_classes] = np.asarray(params["fc2_w"], np.float32).T
    bfc2p = np.full((1, _LANE_PAD), -1e30, np.float32)   # pad lanes ignored by log_softmax
    bfc2p[0, :num_classes] = np.asarray(params["fc2_b"], np.float32)

    packed = {
        "w1b": _band_conv_matrices(params["conv1_w"], width),
        "b1": np.tile(np.asarray(params["conv1_b"], np.float32), w1)[None, :],
        "sw1": _pool_col_cat(w1, c1),
        "rs1": _pool1_row_cat(b_tile, height, h1, kh),
        "w2b": _band_conv_matrices(params["conv2_w"], wp1, rows_pad=_LANE_PAD),
        "b2": np.tile(np.asarray(params["conv2_b"], np.float32), w2)[None, :],
        "sw2": _pool_col_cat(w2, c2),
        "rs2": _pool2_row_cat(b_tile, hp1, h2, kh),
        "wfc1": _fc1_row_weights(params["fc1_w"], c2, hp2, wp2),
        "bfc1": np.asarray(params["fc1_b"], np.float32)[None, :],
        "wfc2": wfc2p,
        "bfc2": bfc2p,
    }
    return {name: jnp.asarray(v) for name, v in packed.items()}


_ORDER = ("w1b", "b1", "sw1", "rs1", "w2b", "b2", "sw2", "rs2",
          "wfc1", "bfc1", "wfc2", "bfc2")


# ---------------------------------------------------------------------------
# Forward pass: one pallas_call, grid over batch tiles (parallel).
# ---------------------------------------------------------------------------
def cnn_mnist_forward(x_nchw, packed, num_classes=10):
    n, c, h, w = x_nchw.shape
    b_tile = packed["rs2"].shape[0] // 8             # rs2 has 2 * 4 * b_tile rows
    n_pad = ((n + b_tile - 1) // b_tile) * b_tile
    classes_pad = packed["wfc2"].shape[1]             # 128

    # Layout plumbing only: pad the batch to a multiple of the tile, lay each
    # image out as (H, W*C) with channels minor, and stack images on rows.
    xp = jnp.pad(x_nchw.astype(jnp.float32),
                 ((0, n_pad - n), (0, 0), (0, 0), (0, 0)))
    xl = jnp.transpose(xp, (0, 2, 3, 1)).reshape(n_pad * h, w * c)

    weights = [packed[name] for name in _ORDER]

    def _const_spec(arr):
        nd = arr.ndim
        return pl.BlockSpec(arr.shape, lambda i, _nd=nd: (0,) * _nd)

    out = pl.pallas_call(
        _fused_cnn_kernel,
        grid=(n_pad // b_tile,),
        in_specs=[pl.BlockSpec((b_tile * h, w * c), lambda i: (i, 0))]
                 + [_const_spec(a) for a in weights],
        out_specs=pl.BlockSpec((b_tile, classes_pad), lambda i: (i, 0)),
        out_shape=jax.ShapeDtypeStruct((n_pad, classes_pad), jnp.float32),
        compiler_params=pltpu.CompilerParams(
            dimension_semantics=("parallel",),
            vmem_limit_bytes=32 * 1024 * 1024),
    )(xl, *weights)
    return out[:n, :num_classes]


# ---------------------------------------------------------------------------
# PyTorch-layout parameter init + pure-JAX reference for the correctness check.
# ---------------------------------------------------------------------------
def init_params(key, num_channels=1, num_classes=10):
    ks = jax.random.split(key, 8)
    s = 0.1
    return {
        "conv1_w": s * jax.random.normal(ks[0], (10, num_channels, 5, 5), jnp.float32),
        "conv1_b": s * jax.random.normal(ks[1], (10,), jnp.float32),
        "conv2_w": s * jax.random.normal(ks[2], (20, 10, 5, 5), jnp.float32),
        "conv2_b": s * jax.random.normal(ks[3], (20,), jnp.float32),
        "fc1_w": s * jax.random.normal(ks[4], (50, 320), jnp.float32),   # PyTorch (out, in)
        "fc1_b": s * jax.random.normal(ks[5], (50,), jnp.float32),
        "fc2_w": s * jax.random.normal(ks[6], (num_classes, 50), jnp.float32),
        "fc2_b": s * jax.random.normal(ks[7], (num_classes,), jnp.float32),
    }


def cnn_mnist_reference(x, p):
    dn = ("NCHW", "OIHW", "NCHW")
    hp = jax.lax.Precision.HIGHEST
    y = jax.lax.conv_general_dilated(x, p["conv1_w"], (1, 1), "VALID",
                                     dimension_numbers=dn, precision=hp)
    y = y + p["conv1_b"][None, :, None, None]
    y = jax.lax.reduce_window(y, -jnp.inf, jax.lax.max, (1, 1, 2, 2), (1, 1, 2, 2), "VALID")
    y = jnp.maximum(y, 0.0)
    y = jax.lax.conv_general_dilated(y, p["conv2_w"], (1, 1), "VALID",
                                     dimension_numbers=dn, precision=hp)
    y = y + p["conv2_b"][None, :, None, None]
    y = jax.lax.reduce_window(y, -jnp.inf, jax.lax.max, (1, 1, 2, 2), (1, 1, 2, 2), "VALID")
    y = jnp.maximum(y, 0.0)
    y = y.reshape(y.shape[0], -1)                                    # (C,H,W) flatten
    y = jnp.maximum(jnp.dot(y, p["fc1_w"].T, precision=hp) + p["fc1_b"], 0.0)
    y = jnp.dot(y, p["fc2_w"].T, precision=hp) + p["fc2_b"]
    return jax.nn.log_softmax(y, axis=1)


if __name__ == "__main__":
    key = jax.random.PRNGKey(0)
    k_x, k_p = jax.random.split(key)

    # MNIST-shaped input (28x28 is required for the 320-dim flatten to hold).
    batch, num_channels, num_classes = 10, 1, 10
    x = jax.random.normal(k_x, (batch, num_channels, 28, 28), jnp.float32)

    params = init_params(k_p, num_channels=num_channels, num_classes=num_classes)
    # Small tile for the demo (exercises padding + a 2-step grid); use 32+ in production.
    packed = pack_params(params, b_tile=8)

    fwd = jax.jit(cnn_mnist_forward, static_argnames=("num_classes",))
    out = jax.block_until_ready(fwd(x, packed, num_classes=num_classes))

    assert out.shape == (batch, num_classes)
    # log_softmax rows should sum to ~1 after exp
    assert jnp.allclose(jnp.exp(out).sum(axis=1), 1.0, atol=1e-3)

    # Check against a pure-JAX/XLA (f32, HIGHEST) reference of the PyTorch forward.
    # Kernel matmuls run at default precision (single-pass bf16 MXU), so allow a
    # correspondingly looser tolerance; structural bugs would show up as O(1) errors.
    ref = cnn_mnist_reference(x, params)
    max_err = float(jnp.max(jnp.abs(out - ref)))
    assert max_err < 1e-1, f"mismatch vs reference: {max_err}"

    print("KERNEL_OK")
</pallas_src>

<mosaic_0001>
module attributes {stable_mosaic.version = 11 : i64} {
  func.func @_fused_cnn_kernel(%arg0: i32, %arg1: memref<224x28xf32, #tpu.memory_space<vmem>>, %arg2: memref<5x28x240xf32, #tpu.memory_space<vmem>>, %arg3: memref<1x240xf32, #tpu.memory_space<vmem>>, %arg4: memref<240x256xf32, #tpu.memory_space<vmem>>, %arg5: memref<192x220xf32, #tpu.memory_space<vmem>>, %arg6: memref<5x128x160xf32, #tpu.memory_space<vmem>>, %arg7: memref<1x160xf32, #tpu.memory_space<vmem>>, %arg8: memref<160x256xf32, #tpu.memory_space<vmem>>, %arg9: memref<64x92xf32, #tpu.memory_space<vmem>>, %arg10: memref<4x128x50xf32, #tpu.memory_space<vmem>>, %arg11: memref<1x50xf32, #tpu.memory_space<vmem>>, %arg12: memref<50x128xf32, #tpu.memory_space<vmem>>, %arg13: memref<1x128xf32, #tpu.memory_space<vmem>>, %arg14: memref<8x128xf32, #tpu.memory_space<vmem>>) attributes {dimension_semantics = [#tpu.dimension_semantics<parallel>], iteration_bounds = array<i64: 2>, scalar_prefetch = 0 : i64, scratch_operands = 0 : i64, tpu.core_type = #tpu.core_type<tc>, window_params = [{transform_indices = @transform_0, window_bounds = array<i64: 224, 28>}, {pipeline_mode = #tpu.pipeline_mode<synchronous>, transform_indices = @transform_1, window_bounds = array<i64: 5, 28, 240>}, {pipeline_mode = #tpu.pipeline_mode<synchronous>, transform_indices = @transform_2, window_bounds = array<i64: 1, 240>}, {pipeline_mode = #tpu.pipeline_mode<synchronous>, transform_indices = @transform_3, window_bounds = array<i64: 240, 256>}, {pipeline_mode = #tpu.pipeline_mode<synchronous>, transform_indices = @transform_4, window_bounds = array<i64: 192, 220>}, {pipeline_mode = #tpu.pipeline_mode<synchronous>, transform_indices = @transform_5, window_bounds = array<i64: 5, 128, 160>}, {pipeline_mode = #tpu.pipeline_mode<synchronous>, transform_indices = @transform_6, window_bounds = array<i64: 1, 160>}, {pipeline_mode = #tpu.pipeline_mode<synchronous>, transform_indices = @transform_7, window_bounds = array<i64: 160, 256>}, {pipeline_mode = #tpu.pipeline_mode<synchronous>, transform_indices = @transform_8, window_bounds = array<i64: 64, 92>}, {pipeline_mode = #tpu.pipeline_mode<synchronous>, transform_indices = @transform_9, window_bounds = array<i64: 4, 128, 50>}, {pipeline_mode = #tpu.pipeline_mode<synchronous>, transform_indices = @transform_10, window_bounds = array<i64: 1, 50>}, {pipeline_mode = #tpu.pipeline_mode<synchronous>, transform_indices = @transform_11, window_bounds = array<i64: 50, 128>}, {pipeline_mode = #tpu.pipeline_mode<synchronous>, transform_indices = @transform_12, window_bounds = array<i64: 1, 128>}, {transform_indices = @transform_13, window_bounds = array<i64: 8, 128>}]} {
    %c0 = arith.constant 0 : index
    %c0_0 = arith.constant 0 : index
    %0 = vector.load %arg1[%c0, %c0_0] : memref<224x28xf32, #tpu.memory_space<vmem>>, vector<224x28xf32>
    %1 = vector.extract_strided_slice %0 {offsets = [0, 0], sizes = [220, 28], strides = [1, 1]} : vector<224x28xf32> to vector<220x28xf32>
    %c0_1 = arith.constant 0 : index
    %c0_2 = arith.constant 0 : index
    %c0_3 = arith.constant 0 : index
    %2 = vector.load %arg2[%c0_1, %c0_2, %c0_3] : memref<5x28x240xf32, #tpu.memory_space<vmem>>, vector<1x28x240xf32>
    %3 = vector.shape_cast %2 : vector<1x28x240xf32> to vector<28x240xf32>
    %cst = arith.constant dense<0.000000e+00> : vector<220x240xf32>
    %4 = tpu.matmul %1, %3, %cst {dimension_numbers = #tpu.dot_dimension_numbers<[1], [0], [0], [1], [0, 0, 1, 1], [], []>} : vector<220x28xf32>, vector<28x240xf32>, vector<220x240xf32> -> vector<220x240xf32>
    %5 = vector.extract_strided_slice %0 {offsets = [1, 0], sizes = [220, 28], strides = [1, 1]} : vector<224x28xf32> to vector<220x28xf32>
    %c1 = arith.constant 1 : index
    %c0_4 = arith.constant 0 : index
    %c0_5 = arith.constant 0 : index
    %6 = vector.load %arg2[%c1, %c0_4, %c0_5] : memref<5x28x240xf32, #tpu.memory_space<vmem>>, vector<1x28x240xf32>
    %7 = vector.shape_cast %6 : vector<1x28x240xf32> to vector<28x240xf32>
    %cst_6 = arith.constant dense<0.000000e+00> : vector<220x240xf32>
    %8 = tpu.matmul %5, %7, %cst_6 {dimension_numbers = #tpu.dot_dimension_numbers<[1], [0], [0], [1], [0, 0, 1, 1], [], []>} : vector<220x28xf32>, vector<28x240xf32>, vector<220x240xf32> -> vector<220x240xf32>
    %9 = arith.addf %4, %8 : vector<220x240xf32>
    %10 = vector.extract_strided_slice %0 {offsets = [2, 0], sizes = [220, 28], strides = [1, 1]} : vector<224x28xf32> to vector<220x28xf32>
    %c2 = arith.constant 2 : index
    %c0_7 = arith.constant 0 : index
    %c0_8 = arith.constant 0 : index
    %11 = vector.load %arg2[%c2, %c0_7, %c0_8] : memref<5x28x240xf32, #tpu.memory_space<vmem>>, vector<1x28x240xf32>
    %12 = vector.shape_cast %11 : vector<1x28x240xf32> to vector<28x240xf32>
    %cst_9 = arith.constant dense<0.000000e+00> : vector<220x240xf32>
    %13 = tpu.matmul %10, %12, %cst_9 {dimension_numbers = #tpu.dot_dimension_numbers<[1], [0], [0], [1], [0, 0, 1, 1], [], []>} : vector<220x28xf32>, vector<28x240xf32>, vector<220x240xf32> -> vector<220x240xf32>
    %14 = arith.addf %9, %13 : vector<220x240xf32>
    %15 = vector.extract_strided_slice %0 {offsets = [3, 0], sizes = [220, 28], strides = [1, 1]} : vector<224x28xf32> to vector<220x28xf32>
    %c3 = arith.constant 3 : index
    %c0_10 = arith.constant 0 : index
    %c0_11 = arith.constant 0 : index
    %16 = vector.load %arg2[%c3, %c0_10, %c0_11] : memref<5x28x240xf32, #tpu.memory_space<vmem>>, vector<1x28x240xf32>
    %17 = vector.shape_cast %16 : vector<1x28x240xf32> to vector<28x240xf32>
    %cst_12 = arith.constant dense<0.000000e+00> : vector<220x240xf32>
    %18 = tpu.matmul %15, %17, %cst_12 {dimension_numbers = #tpu.dot_dimension_numbers<[1], [0], [0], [1], [0, 0, 1, 1], [], []>} : vector<220x28xf32>, vector<28x240xf32>, vector<220x240xf32> -> vector<220x240xf32>
    %19 = arith.addf %14, %18 : vector<220x240xf32>
    %20 = vector.extract_strided_slice %0 {offsets = [4, 0], sizes = [220, 28], strides = [1, 1]} : vector<224x28xf32> to vector<220x28xf32>
    %c4 = arith.constant 4 : index
    %c0_13 = arith.constant 0 : index
    %c0_14 = arith.constant 0 : index
    %21 = vector.load %arg2[%c4, %c0_13, %c0_14] : memref<5x28x240xf32, #tpu.memory_space<vmem>>, vector<1x28x240xf32>
    %22 = vector.shape_cast %21 : vector<1x28x240xf32> to vector<28x240xf32>
    %cst_15 = arith.constant dense<0.000000e+00> : vector<220x240xf32>
    %23 = tpu.matmul %20, %22, %cst_15 {dimension_numbers = #tpu.dot_dimension_numbers<[1], [0], [0], [1], [0, 0, 1, 1], [], []>} : vector<220x28xf32>, vector<28x240xf32>, vector<220x240xf32> -> vector<220x240xf32>
    %24 = arith.addf %19, %23 : vector<220x240xf32>
    %c0_16 = arith.constant 0 : index
    %c0_17 = arith.constant 0 : index
    %25 = vector.load %arg3[%c0_16, %c0_17] : memref<1x240xf32, #tpu.memory_space<vmem>>, vector<1x240xf32>
    %26 = vector.broadcast %25 : vector<1x240xf32> to vector<220x240xf32>
    %27 = arith.addf %24, %26 : vector<220x240xf32>
    %c0_18 = arith.constant 0 : index
    %c0_19 = arith.constant 0 : index
    %28 = vector.load %arg4[%c0_18, %c0_19] : memref<240x256xf32, #tpu.memory_space<vmem>>, vector<240x256xf32>
    %cst_20 = arith.constant dense<0.000000e+00> : vector<220x256xf32>
    %29 = tpu.matmul %27, %28, %cst_20 {dimension_numbers = #tpu.dot_dimension_numbers<[1], [0], [0], [1], [0, 0, 1, 1], [], []>} : vector<220x240xf32>, vector<240x256xf32>, vector<220x256xf32> -> vector<220x256xf32>
    %30 = vector.extract_strided_slice %29 {offsets = [0, 0], sizes = [220, 128], strides = [1, 1]} : vector<220x256xf32> to vector<220x128xf32>
    %31 = vector.extract_strided_slice %29 {offsets = [0, 128], sizes = [220, 128], strides = [1, 1]} : vector<220x256xf32> to vector<220x128xf32>
    %32 = arith.maximumf %30, %31 : vector<220x128xf32>
    %c0_21 = arith.constant 0 : index
    %c0_22 = arith.constant 0 : index
    %33 = vector.load %arg5[%c0_21, %c0_22] : memref<192x220xf32, #tpu.memory_space<vmem>>, vector<192x220xf32>
    %cst_23 = arith.constant dense<0.000000e+00> : vector<192x128xf32>
    %34 = tpu.matmul %33, %32, %cst_23 {dimension_numbers = #tpu.dot_dimension_numbers<[1], [0], [0], [1], [0, 0, 1, 1], [], []>} : vector<192x220xf32>, vector<220x128xf32>, vector<192x128xf32> -> vector<192x128xf32>
    %35 = vector.extract_strided_slice %34 {offsets = [0, 0], sizes = [96, 128], strides = [1, 1]} : vector<192x128xf32> to vector<96x128xf32>
    %36 = vector.extract_strided_slice %34 {offsets = [96, 0], sizes = [96, 128], strides = [1, 1]} : vector<192x128xf32> to vector<96x128xf32>
    %37 = arith.maximumf %35, %36 : vector<96x128xf32>
    %cst_24 = arith.constant 0.000000e+00 : f32
    %38 = vector.broadcast %cst_24 : f32 to vector<96x128xf32>
    %39 = arith.maximumf %37, %38 : vector<96x128xf32>
    %40 = vector.extract_strided_slice %39 {offsets = [0, 0], sizes = [92, 128], strides = [1, 1]} : vector<96x128xf32> to vector<92x128xf32>
    %c0_25 = arith.constant 0 : index
    %c0_26 = arith.constant 0 : index
    %c0_27 = arith.constant 0 : index
    %41 = vector.load %arg6[%c0_25, %c0_26, %c0_27] : memref<5x128x160xf32, #tpu.memory_space<vmem>>, vector<1x128x160xf32>
    %42 = vector.shape_cast %41 : vector<1x128x160xf32> to vector<128x160xf32>
    %cst_28 = arith.constant dense<0.000000e+00> : vector<92x160xf32>
    %43 = tpu.matmul %40, %42, %cst_28 {dimension_numbers = #tpu.dot_dimension_numbers<[1], [0], [0], [1], [0, 0, 1, 1], [], []>} : vector<92x128xf32>, vector<128x160xf32>, vector<92x160xf32> -> vector<92x160xf32>
    %44 = vector.extract_strided_slice %39 {offsets = [1, 0], sizes = [92, 128], strides = [1, 1]} : vector<96x128xf32> to vector<92x128xf32>
    %c1_29 = arith.constant 1 : index
    %c0_30 = arith.constant 0 : index
    %c0_31 = arith.constant 0 : index
    %45 = vector.load %arg6[%c1_29, %c0_30, %c0_31] : memref<5x128x160xf32, #tpu.memory_space<vmem>>, vector<1x128x160xf32>
    %46 = vector.shape_cast %45 : vector<1x128x160xf32> to vector<128x160xf32>
    %cst_32 = arith.constant dense<0.000000e+00> : vector<92x160xf32>
    %47 = tpu.matmul %44, %46, %cst_32 {dimension_numbers = #tpu.dot_dimension_numbers<[1], [0], [0], [1], [0, 0, 1, 1], [], []>} : vector<92x128xf32>, vector<128x160xf32>, vector<92x160xf32> -> vector<92x160xf32>
    %48 = arith.addf %43, %47 : vector<92x160xf32>
    %49 = vector.extract_strided_slice %39 {offsets = [2, 0], sizes = [92, 128], strides = [1, 1]} : vector<96x128xf32> to vector<92x128xf32>
    %c2_33 = arith.constant 2 : index
    %c0_34 = arith.constant 0 : index
    %c0_35 = arith.constant 0 : index
    %50 = vector.load %arg6[%c2_33, %c0_34, %c0_35] : memref<5x128x160xf32, #tpu.memory_space<vmem>>, vector<1x128x160xf32>
    %51 = vector.shape_cast %50 : vector<1x128x160xf32> to vector<128x160xf32>
    %cst_36 = arith.constant dense<0.000000e+00> : vector<92x160xf32>
    %52 = tpu.matmul %49, %51, %cst_36 {dimension_numbers = #tpu.dot_dimension_numbers<[1], [0], [0], [1], [0, 0, 1, 1], [], []>} : vector<92x128xf32>, vector<128x160xf32>, vector<92x160xf32> -> vector<92x160xf32>
    %53 = arith.addf %48, %52 : vector<92x160xf32>
    %54 = vector.extract_strided_slice %39 {offsets = [3, 0], sizes = [92, 128], strides = [1, 1]} : vector<96x128xf32> to vector<92x128xf32>
    %c3_37 = arith.constant 3 : index
    %c0_38 = arith.constant 0 : index
    %c0_39 = arith.constant 0 : index
    %55 = vector.load %arg6[%c3_37, %c0_38, %c0_39] : memref<5x128x160xf32, #tpu.memory_space<vmem>>, vector<1x128x160xf32>
    %56 = vector.shape_cast %55 : vector<1x128x160xf32> to vector<128x160xf32>
    %cst_40 = arith.constant dense<0.000000e+00> : vector<92x160xf32>
    %57 = tpu.matmul %54, %56, %cst_40 {dimension_numbers = #tpu.dot_dimension_numbers<[1], [0], [0], [1], [0, 0, 1, 1], [], []>} : vector<92x128xf32>, vector<128x160xf32>, vector<92x160xf32> -> vector<92x160xf32>
    %58 = arith.addf %53, %57 : vector<92x160xf32>
    %59 = vector.extract_strided_slice %39 {offsets = [4, 0], sizes = [92, 128], strides = [1, 1]} : vector<96x128xf32> to vector<92x128xf32>
    %c4_41 = arith.constant 4 : index
    %c0_42 = arith.constant 0 : index
    %c0_43 = arith.constant 0 : index
    %60 = vector.load %arg6[%c4_41, %c0_42, %c0_43] : memref<5x128x160xf32, #tpu.memory_space<vmem>>, vector<1x128x160xf32>
    %61 = vector.shape_cast %60 : vector<1x128x160xf32> to vector<128x160xf32>
    %cst_44 = arith.constant dense<0.000000e+00> : vector<92x160xf32>
    %62 = tpu.matmul %59, %61, %cst_44 {dimension_numbers = #tpu.dot_dimension_numbers<[1], [0], [0], [1], [0, 0, 1, 1], [], []>} : vector<92x128xf32>, vector<128x160xf32>, vector<92x160xf32> -> vector<92x160xf32>
    %63 = arith.addf %58, %62 : vector<92x160xf32>
    %c0_45 = arith.constant 0 : index
    %c0_46 = arith.constant 0 : index
    %64 = vector.load %arg7[%c0_45, %c0_46] : memref<1x160xf32, #tpu.memory_space<vmem>>, vector<1x160xf32>
    %65 = vector.broadcast %64 : vector<1x160xf32> to vector<92x160xf32>
    %66 = arith.addf %63, %65 : vector<92x160xf32>
    %c0_47 = arith.constant 0 : index
    %c0_48 = arith.constant 0 : index
    %67 = vector.load %arg8[%c0_47, %c0_48] : memref<160x256xf32, #tpu.memory_space<vmem>>, vector<160x256xf32>
    %cst_49 = arith.constant dense<0.000000e+00> : vector<92x256xf32>
    %68 = tpu.matmul %66, %67, %cst_49 {dimension_numbers = #tpu.dot_dimension_numbers<[1], [0], [0], [1], [0, 0, 1, 1], [], []>} : vector<92x160xf32>, vector<160x256xf32>, vector<92x256xf32> -> vector<92x256xf32>
    %69 = vector.extract_strided_slice %68 {offsets = [0, 0], sizes = [92, 128], strides = [1, 1]} : vector<92x256xf32> to vector<92x128xf32>
    %70 = vector.extract_strided_slice %68 {offsets = [0, 128], sizes = [92, 128], strides = [1, 1]} : vector<92x256xf32> to vector<92x128xf32>
    %71 = arith.maximumf %69, %70 : vector<92x128xf32>
    %c0_50 = arith.constant 0 : index
    %c0_51 = arith.constant 0 : index
    %72 = vector.load %arg9[%c0_50, %c0_51] : memref<64x92xf32, #tpu.memory_space<vmem>>, vector<64x92xf32>
    %cst_52 = arith.constant dense<0.000000e+00> : vector<64x128xf32>
    %73 = tpu.matmul %72, %71, %cst_52 {dimension_numbers = #tpu.dot_dimension_numbers<[1], [0], [0], [1], [0, 0, 1, 1], [], []>} : vector<64x92xf32>, vector<92x128xf32>, vector<64x128xf32> -> vector<64x128xf32>
    %74 = vector.extract_strided_slice %73 {offsets = [0, 0], sizes = [32, 128], strides = [1, 1]} : vector<64x128xf32> to vector<32x128xf32>
    %75 = vector.extract_strided_slice %73 {offsets = [32, 0], sizes = [32, 128], strides = [1, 1]} : vector<64x128xf32> to vector<32x128xf32>
    %76 = arith.maximumf %74, %75 : vector<32x128xf32>
    %cst_53 = arith.constant 0.000000e+00 : f32
    %77 = vector.broadcast %cst_53 : f32 to vector<32x128xf32>
    %78 = arith.maximumf %76, %77 : vector<32x128xf32>
    %c0_54 = arith.constant 0 : index
    %c0_55 = arith.constant 0 : index
    %79 = vector.load %arg11[%c0_54, %c0_55] : memref<1x50xf32, #tpu.memory_space<vmem>>, vector<1x50xf32>
    %80 = vector.extract_strided_slice %78 {offsets = [0, 0], sizes = [8, 128], strides = [1, 1]} : vector<32x128xf32> to vector<8x128xf32>
    %c0_56 = arith.constant 0 : index
    %c0_57 = arith.constant 0 : index
    %c0_58 = arith.constant 0 : index
    %81 = vector.load %arg10[%c0_56, %c0_57, %c0_58] : memref<4x128x50xf32, #tpu.memory_space<vmem>>, vector<1x128x50xf32>
    %82 = vector.shape_cast %81 : vector<1x128x50xf32> to vector<128x50xf32>
    %cst_59 = arith.constant dense<0.000000e+00> : vector<8x50xf32>
    %83 = tpu.matmul %80, %82, %cst_59 {dimension_numbers = #tpu.dot_dimension_numbers<[1], [0], [0], [1], [0, 0, 1, 1], [], []>} : vector<8x128xf32>, vector<128x50xf32>, vector<8x50xf32> -> vector<8x50xf32>
    %84 = vector.broadcast %79 : vector<1x50xf32> to vector<8x50xf32>
    %85 = arith.addf %84, %83 : vector<8x50xf32>
    %86 = vector.extract_strided_slice %78 {offsets = [8, 0], sizes = [8, 128], strides = [1, 1]} : vector<32x128xf32> to vector<8x128xf32>
    %c1_60 = arith.constant 1 : index
    %c0_61 = arith.constant 0 : index
    %c0_62 = arith.constant 0 : index
    %87 = vector.load %arg10[%c1_60, %c0_61, %c0_62] : memref<4x128x50xf32, #tpu.memory_space<vmem>>, vector<1x128x50xf32>
    %88 = vector.shape_cast %87 : vector<1x128x50xf32> to vector<128x50xf32>
    %cst_63 = arith.constant dense<0.000000e+00> : vector<8x50xf32>
    %89 = tpu.matmul %86, %88, %cst_63 {dimension_numbers = #tpu.dot_dimension_numbers<[1], [0], [0], [1], [0, 0, 1, 1], [], []>} : vector<8x128xf32>, vector<128x50xf32>, vector<8x50xf32> -> vector<8x50xf32>
    %90 = arith.addf %85, %89 : vector<8x50xf32>
    %91 = vector.extract_strided_slice %78 {offsets = [16, 0], sizes = [8, 128], strides = [1, 1]} : vector<32x128xf32> to vector<8x128xf32>
    %c2_64 = arith.constant 2 : index
    %c0_65 = arith.constant 0 : index
    %c0_66 = arith.constant 0 : index
    %92 = vector.load %arg10[%c2_64, %c0_65, %c0_66] : memref<4x128x50xf32, #tpu.memory_space<vmem>>, vector<1x128x50xf32>
    %93 = vector.shape_cast %92 : vector<1x128x50xf32> to vector<128x50xf32>
    %cst_67 = arith.constant dense<0.000000e+00> : vector<8x50xf32>
    %94 = tpu.matmul %91, %93, %cst_67 {dimension_numbers = #tpu.dot_dimension_numbers<[1], [0], [0], [1], [0, 0, 1, 1], [], []>} : vector<8x128xf32>, vector<128x50xf32>, vector<8x50xf32> -> vector<8x50xf32>
    %95 = arith.addf %90, %94 : vector<8x50xf32>
    %96 = vector.extract_strided_slice %78 {offsets = [24, 0], sizes = [8, 128], strides = [1, 1]} : vector<32x128xf32> to vector<8x128xf32>
    %c3_68 = arith.constant 3 : index
    %c0_69 = arith.constant 0 : index
    %c0_70 = arith.constant 0 : index
    %97 = vector.load %arg10[%c3_68, %c0_69, %c0_70] : memref<4x128x50xf32, #tpu.memory_space<vmem>>, vector<1x128x50xf32>
    %98 = vector.shape_cast %97 : vector<1x128x50xf32> to vector<128x50xf32>
    %cst_71 = arith.constant dense<0.000000e+00> : vector<8x50xf32>
    %99 = tpu.matmul %96, %98, %cst_71 {dimension_numbers = #tpu.dot_dimension_numbers<[1], [0], [0], [1], [0, 0, 1, 1], [], []>} : vector<8x128xf32>, vector<128x50xf32>, vector<8x50xf32> -> vector<8x50xf32>
    %100 = arith.addf %95, %99 : vector<8x50xf32>
    %cst_72 = arith.constant 0.000000e+00 : f32
    %101 = vector.broadcast %cst_72 : f32 to vector<8x50xf32>
    %102 = arith.maximumf %100, %101 : vector<8x50xf32>
    %c0_73 = arith.constant 0 : index
    %c0_74 = arith.constant 0 : index
    %103 = vector.load %arg12[%c0_73, %c0_74] : memref<50x128xf32, #tpu.memory_space<vmem>>, vector<50x128xf32>
    %cst_75 = arith.constant dense<0.000000e+00> : vector<8x128xf32>
    %104 = tpu.matmul %102, %103, %cst_75 {dimension_numbers = #tpu.dot_dimension_numbers<[1], [0], [0], [1], [0, 0, 1, 1], [], []>} : vector<8x50xf32>, vector<50x128xf32>, vector<8x128xf32> -> vector<8x128xf32>
    %c0_76 = arith.constant 0 : index
    %c0_77 = arith.constant 0 : index
    %105 = vector.load %arg13[%c0_76, %c0_77] : memref<1x128xf32, #tpu.memory_space<vmem>>, vector<1x128xf32>
    %106 = vector.broadcast %105 : vector<1x128xf32> to vector<8x128xf32>
    %107 = arith.addf %104, %106 : vector<8x128xf32>
    %cst_78 = arith.constant dense<0xFF800000> : vector<8xf32>
    %108 = vector.multi_reduction <maximumf>, %107, %cst_78 [1] : vector<8x128xf32> to vector<8xf32>
    %109 = vector.shape_cast %108 : vector<8xf32> to vector<8x1xf32>
    %110 = vector.broadcast %109 : vector<8x1xf32> to vector<8x128xf32>
    %111 = arith.subf %107, %110 : vector<8x128xf32>
    %112 = math.exp %111 : vector<8x128xf32>
    %cst_79 = arith.constant dense<0.000000e+00> : vector<8xf32>
    %113 = vector.multi_reduction <add>, %112, %cst_79 [1] : vector<8x128xf32> to vector<8xf32>
    %114 = vector.shape_cast %113 : vector<8xf32> to vector<8x1xf32>
    %115 = math.log %114 : vector<8x1xf32>
    %116 = vector.broadcast %115 : vector<8x1xf32> to vector<8x128xf32>
    %117 = arith.subf %111, %116 : vector<8x128xf32>
    %c0_80 = arith.constant 0 : index
    %c0_81 = arith.constant 0 : index
    %118 = vector.load %arg14[%c0_80, %c0_81] : memref<8x128xf32, #tpu.memory_space<vmem>>, vector<8x128xf32>
    tpu.vector_store %arg14[%c0_80, %c0_81], %117 {strides = array<i32>} : memref<8x128xf32, #tpu.memory_space<vmem>>, vector<8x128xf32>,
    return
  }
  func.func @transform_0(%arg0: i32) -> (i32, i32) {
    %c0_i32 = arith.constant 0 : i32
    %c0_i32_0 = arith.constant 0 : i32
    return %arg0, %c0_i32 : i32, i32
  }
  func.func @transform_1(%arg0: i32) -> (i32, i32, i32) {
    %c0_i32 = arith.constant 0 : i32
    %c0_i32_0 = arith.constant 0 : i32
    %c0_i32_1 = arith.constant 0 : i32
    %c0_i32_2 = arith.constant 0 : i32
    return %c0_i32, %c0_i32_0, %c0_i32_1 : i32, i32, i32
  }
  func.func @transform_2(%arg0: i32) -> (i32, i32) {
    %c0_i32 = arith.constant 0 : i32
    %c0_i32_0 = arith.constant 0 : i32
    %c0_i32_1 = arith.constant 0 : i32
    return %c0_i32, %c0_i32_0 : i32, i32
  }
  func.func @transform_3(%arg0: i32) -> (i32, i32) {
    %c0_i32 = arith.constant 0 : i32
    %c0_i32_0 = arith.constant 0 : i32
    %c0_i32_1 = arith.constant 0 : i32
    return %c0_i32, %c0_i32_0 : i32, i32
  }
  func.func @transform_4(%arg0: i32) -> (i32, i32) {
    %c0_i32 = arith.constant 0 : i32
    %c0_i32_0 = arith.constant 0 : i32
    %c0_i32_1 = arith.constant 0 : i32
    return %c0_i32, %c0_i32_0 : i32, i32
  }
  func.func @transform_5(%arg0: i32) -> (i32, i32, i32) {
    %c0_i32 = arith.constant 0 : i32
    %c0_i32_0 = arith.constant 0 : i32
    %c0_i32_1 = arith.constant 0 : i32
    %c0_i32_2 = arith.constant 0 : i32
    return %c0_i32, %c0_i32_0, %c0_i32_1 : i32, i32, i32
  }
  func.func @transform_6(%arg0: i32) -> (i32, i32) {
    %c0_i32 = arith.constant 0 : i32
    %c0_i32_0 = arith.constant 0 : i32
    %c0_i32_1 = arith.constant 0 : i32
    return %c0_i32, %c0_i32_0 : i32, i32
  }
  func.func @transform_7(%arg0: i32) -> (i32, i32) {
    %c0_i32 = arith.constant 0 : i32
    %c0_i32_0 = arith.constant 0 : i32
    %c0_i32_1 = arith.constant 0 : i32
    return %c0_i32, %c0_i32_0 : i32, i32
  }
  func.func @transform_8(%arg0: i32) -> (i32, i32) {
    %c0_i32 = arith.constant 0 : i32
    %c0_i32_0 = arith.constant 0 : i32
    %c0_i32_1 = arith.constant 0 : i32
    return %c0_i32, %c0_i32_0 : i32, i32
  }
  func.func @transform_9(%arg0: i32) -> (i32, i32, i32) {
    %c0_i32 = arith.constant 0 : i32
    %c0_i32_0 = arith.constant 0 : i32
    %c0_i32_1 = arith.constant 0 : i32
    %c0_i32_2 = arith.constant 0 : i32
    return %c0_i32, %c0_i32_0, %c0_i32_1 : i32, i32, i32
  }
  func.func @transform_10(%arg0: i32) -> (i32, i32) {
    %c0_i32 = arith.constant 0 : i32
    %c0_i32_0 = arith.constant 0 : i32
    %c0_i32_1 = arith.constant 0 : i32
    return %c0_i32, %c0_i32_0 : i32, i32
  }
  func.func @transform_11(%arg0: i32) -> (i32, i32) {
    %c0_i32 = arith.constant 0 : i32
    %c0_i32_0 = arith.constant 0 : i32
    %c0_i32_1 = arith.constant 0 : i32
    return %c0_i32, %c0_i32_0 : i32, i32
  }
  func.func @transform_12(%arg0: i32) -> (i32, i32) {
    %c0_i32 = arith.constant 0 : i32
    %c0_i32_0 = arith.constant 0 : i32
    %c0_i32_1 = arith.constant 0 : i32
    return %c0_i32, %c0_i32_0 : i32, i32
  }
  func.func @transform_13(%arg0: i32) -> (i32, i32) {
    %c0_i32 = arith.constant 0 : i32
    %c0_i32_0 = arith.constant 0 : i32
    return %arg0, %c0_i32 : i32, i32
  }
}

</mosaic_0001>

<bundles_post_ra>
// kernel: cnn_mnist_forward.1
= control target key start
LH: loop header
LB: loop body
LE: loop exit
PB: predicated region body
PF: predicated region fallthrough
CT: control target
= control target key end

     0   :  { %s9310_s0 = inlined_call_operand.vmem [shape: f32[448,28], index: 0, kind: input, shape index: {}]   ;;  %s9311_s1 = inlined_call_operand.vmem [shape: f32[5,28,240], index: 1, kind: input, shape index: {}]   ;;  %s9312_s2 = inlined_call_operand.vmem [shape: f32[1,240], index: 2, kind: input, shape index: {}]   ;;  %s9313_s3 = inlined_call_operand.vmem [shape: f32[240,256], index: 3, kind: input, shape index: {}]   ;;  %s9314_s4 = inlined_call_operand.vmem [shape: f32[192,220], index: 4, kind: input, shape index: {}]   ;;  %s9315_s5 = inlined_call_operand.vmem [shape: f32[5,128,160], index: 5, kind: input, shape index: {}]   ;;  %s9316_s6 = inlined_call_operand.vmem [shape: f32[1,160], index: 6, kind: input, shape index: {}]   ;;  %s9317_s7 = inlined_call_operand.vmem [shape: f32[160,256], index: 7, kind: input, shape index: {}]   ;;  %s9318_s8 = inlined_call_operand.vmem [shape: f32[64,92], index: 8, kind: input, shape index: {}]   ;;  %s9319_s9 = inlined_call_operand.vmem [shape: f32[4,128,50], index: 9, kind: input, shape index: {}]   ;;  %s9320_s10 = inlined_call_operand.vmem [shape: f32[1,50], index: 10, kind: input, shape index: {}]   ;;  %s9321_s11 = inlined_call_operand.vmem [shape: f32[50,128], index: 11, kind: input, shape index: {}]   ;;  %s9322_s12 = inlined_call_operand.vmem [shape: f32[1,128], index: 12, kind: input, shape index: {}]   ;;  %s9323_s13 = inlined_call_operand.hbm [shape: f32[16,128], index: 13, kind: output, shape index: {}]  }
   0x1   :  { %9329 = sst [smem:[#allocation89_spill]] %s9310_s0 }
   0x2   :  { %18 = vsyncpa [#allocation3], 0 }
   0x3   :  { %20 = vsyncpa [#allocation3 + $0x1], 0  ;;  %s5664_s25 = smov 0   ;;  %s5666_s26 = smov 0  }
   0x4   :  { %s5668_s27 = smov 0   ;;  %s5670_s28 = smov 0  }
   0x5 LB: > { %9330 = sst [smem:[#allocation5_spill]] %s5588_s27  ;;  %s5685_s29 = sadd.s32 4294967295, %s5592_s28   ;;  %s5592_s28 = sphi %s5670_s28, %s9578_s28   ;;  %s5588_s27 = sphi %s5668_s27, %s9580_s27   ;;  %s5584_s26 = sphi %s5666_s26, %s9582_s26   ;;  %s5580_s25 = sphi %s5664_s25, %s9581_s25  }
   0x6   : > { %s4833_s30 = sadd.s32 4294967294, %s5592_s28   ;;  %s5689_s14 = sadd.s32 1, %s5592_s28  }
   0x7   : > { %9331 = sst [smem:[#allocation6_spill]] %s5689_s14  ;;  %s311_s15 = sadd.s32 1, %s5588_s27 }
   0x8   : > { %s308_s16 = ssub.s32 %s5592_s28, %s5689_s14  ;;  %p321_p0 = scmp.ne.s32.totalorder %s5588_s27, %s5584_s26 }
   0x9   : > { %p309_p1 = scmp.eq.s32.totalorder %s308_s16, 0  ;;  %p322_p2 = scmp.eq.s32.totalorder %s5685_s29, 1 }
   0xa   : > { %p327_p3 = scmp.ne.s32.totalorder %s5584_s26, %s5580_s25  ;;  %p328_p4 = scmp.eq.s32.totalorder %s4833_s30, 1 }
   0xb   : > { %s5700_s17 = scalar_select %p309_p1, %s5588_s27, %s311_s15  }
   0xc   : > { %p5702_p5 = por %p322_p2, %p321_p0  ;;  %p5706_p6 = por %p328_p4, %p327_p3 }
   0xd   : > { %9332 = sst [smem:[#allocation7_spill]] %s5700_s17  ;;  %p4836_p7 = scmp.ge.s32.totalorder %s5592_s28, 1 }
   0xe   : > { %p391_p8 = scmp.lt.s32.totalorder %s5592_s28, 3 }
  0x10   : > { %p392_p9 = pnand %p4836_p7, %p391_p8 }
  0x12   : > { %395 = sbr.rel (%p392_p9) target bundleno = 2613 (0xa35), region = 72 }
  0x17   : > { %v475_v0 = vld [vmem:[%s9311_s1 + $0x30] sm:$0xf]  ;;  %vm627_vm0 = vcmask 1043456   ;;  %v476_v1 = vld [vmem:[%s9311_s1 + $0x38] sm:$0xf]  ;;  %v473_v2 = vld [vmem:[%s9311_s1 + $0x20] sm:$0xff] }
  0x18   : > { %4905 = vmatpush.msk.msra.mxu2 %vm627_vm0, %v475_v0  ;;  %4934 = vmatpush.msk.msra.mxu3 %vm627_vm0, %v476_v1  ;;  %v474_v3 = vld [vmem:[%s9311_s1 + $0x28] sm:$0xff]  ;;  %v4845_v4 = vld [vmem:[%s9311_s1 + $0x70] sm:$0xf]  ;;  %v4846_v5 = vld [vmem:[%s9311_s1 + $0x78] sm:$0xf]  ;;  %s435_s22 = smul.u32 28, %s5685_s29 }
  0x19   : > { %4847 = vmatpush.msk.msra.mxu0 %vm627_vm0, %v4845_v4  ;;  %4876 = vmatpush.msk.msra.mxu1 %vm627_vm0, %v4846_v5  ;;  %v471_v6 = vld [vmem:[%s9311_s1 + $0x10] sm:$0xff]  ;;  %v472_v7 = vld [vmem:[%s9311_s1 + $0x18] sm:$0xff]  ;;  %v4843_v8 = vld [vmem:[%s9311_s1 + $0x60] sm:$0xff]  ;;  %vm570_vm1 = vcmask 228352   ;;  %s9335_s0 = sld [smem:[#allocation89_spill]]  ;;  %vm514_vm2 = vcmask 1046528  }
  0x1a   : > { %911 = vmatpush.msra.mxu2 %v473_v2  ;;  %1012 = vmatpush.msra.mxu3 %v474_v3  ;;  %v4844_v9 = vld [vmem:[%s9311_s1 + $0x68] sm:$0xff]  ;;  %v469_v10 = vld [vmem:[%s9311_s1] sm:$0xff]  ;;  %p436_p10 = scmp.lt.s32.totalorder %s435_s22, 55  ;;  %v4841_v12 = vld [vmem:[%s9311_s1 + $0x50] sm:$0xff]  ;;  %vm1494_vm3 = vcmask 1044480   ;;  %vm1109_vm4 = vcmask 1045504  }
  0x1b   : > { %v470_v11 = vld [vmem:[%s9311_s1 + $0x8] sm:$0xff]  ;;  %647 = vmatpush.msra.mxu0 %v4843_v8  ;;  %748 = vmatpush.msra.mxu1 %v4844_v9  ;;  %v4842_v13 = vld [vmem:[%s9311_s1 + $0x58] sm:$0xff]  ;;  %v4839_v14 = vld [vmem:[%s9311_s1 + $0x40] sm:$0xff]  ;;  %vm2376_vm5 = vcmask 916480   ;;  %vm2941_vm6 = vcmask 752640   ;;  %vm4207_vm7 = vcmask 261120  }
  0x1c   : > { %912 = vmatpush.msra.mxu2 %v471_v6  ;;  %1013 = vmatpush.msra.mxu3 %v472_v7  ;;  %s9584_s22 = smov (!%p436_p10, %s435_s22), 55  ;;  %v4840_v15 = vld [vmem:[%s9311_s1 + $0x48] sm:$0xff]  ;;  %vm4723_vm8 = vcmask 1041408   ;;  %vm4719_vm9 = vcmask 408576   ;;  %s5454_s16 = sshll.u32 %s5685_s29, 3 }
  0x1d   : > { %648 = vmatpush.msra.mxu0 %v4841_v12  ;;  %749 = vmatpush.msra.mxu1 %v4842_v13  ;;  %s4838_s23 = sshll.u32 %s9584_s22, 3  ;;  %s4769_s17 = scalar_lea.hbm %s9323_s13, %s5454_s16 }
  0x1e   : > { %913 = vmatpush.msra.mxu2 %v469_v10  ;;  %1014 = vmatpush.msra.mxu3 %v470_v11  ;;  %s5550_s16 = scalar_lea.hbm %s9323_s13, 16 }
  0x1f   : > { %s5768_s15 = scalar_lea.vmem %s9335_s0, %s4838_s23  ;;  %649 = vmatpush.msra.mxu0 %v4839_v14  ;;  %750 = vmatpush.msra.mxu1 %v4840_v15  ;;  %s4773_s23 = sshll.u32 %s4769_s17, 4  ;;  %s4774_s23 = int_to_ptr.hbm [resolvable:$true] %s4773_s23 }
  0x20   : > { %v5771_v16 = vld [vmem:[%s5768_s15] sm:$0xff]  ;;  %v5774_v17 = vld [vmem:[%s5768_s15 + $0x8] sm:$0xff]  ;;  %v5783_v20 = vld [vmem:[%s5768_s15 + $0x10] sm:$0xff]  ;;  %s5544_s30 = sshra.s32 %s4774_s23, 4  ;;  %s5545_s30 = int_to_ptr.hbm [resolvable:$true] %s5544_s30 }
  0x21   : > { %4906 = vmatmul.msk.f32.vlgmr.msra.gmra.mxu2 %vm570_vm1, %v5771_v16  ;;  %4935 = vmatmul.msk.f32.vlgmr.msra.gmra.mxu3 %vm570_vm1, %v5771_v16  ;;  %v515_v18 = vrot.slane %v5771_v16, 1  ;;  %v516_v19 = vrot.slane %v5774_v17, 1  ;;  %v518_v22 = vrot.slane %v5783_v20, 1  ;;  %v5795_v24 = vld [vmem:[%s5768_s15 + $0x18] sm:$0xff]  ;;  %v5806_v27 = vld [vmem:[%s5768_s15 + $0x20] sm:$0xff]  ;;  %v5817_v30 = vld [vmem:[%s5768_s15 + $0x28] sm:$0xff]  ;;  %p5551_p0 = scmp.lt.s32.totalorder %s5545_s30, %s9323_s13 }
  0x22   : > { %v520_v25 = vrot.slane %v5795_v24, 1  ;;  %v522_v28 = vrot.slane %v5806_v27, 1  ;;  %v524_v31 = vrot.slane %v5817_v30, 1  ;;  %v5828_v33 = vld [vmem:[%s5768_s15 + $0x30] sm:$0xff]  ;;  %v5839_v36 = vld [vmem:[%s5768_s15 + $0x38] sm:$0xff]  ;;  %v5850_v39 = vld [vmem:[%s5768_s15 + $0x40] sm:$0xff] }
  0x23   : > { %v517_v21 = vsel %vm514_vm2, %v515_v18, %v516_v19  ;;  %v519_v23 = vsel %vm514_vm2, %v516_v19, %v518_v22  ;;  %v526_v34 = vrot.slane %v5828_v33, 1  ;;  %v528_v37 = vrot.slane %v5839_v36, 1  ;;  %v5861_v42 = vld [vmem:[%s5768_s15 + $0x48] sm:$0xff]  ;;  %v5872_v45 = vld [vmem:[%s5768_s15 + $0x50] sm:$0xff]  ;;  %v5883_v48 = vld [vmem:[%s5768_s15 + $0x58] sm:$0xff]  ;;  %s5546_s0 = scalar_lea.hbm %s5545_s30, 8 }
  0x24   : > { %4848 = vmatmul.msk.f32.vlgmr.msra.gmra.mxu0 %vm570_vm1, %v517_v21  ;;  %4877 = vmatmul.msk.f32.vlgmr.msra.gmra.mxu1 %vm570_vm1, %v517_v21  ;;  %v521_v26 = vsel %vm514_vm2, %v518_v22, %v520_v25  ;;  %v523_v29 = vsel %vm514_vm2, %v520_v25, %v522_v28  ;;  %v525_v32 = vsel %vm514_vm2, %v522_v28, %v524_v31  ;;  %v530_v40 = vrot.slane %v5850_v39, 1  ;;  %v5894_v51 = vld [vmem:[%s5768_s15 + $0x60] sm:$0xff]  ;;  %v5905_v54 = vld [vmem:[%s5768_s15 + $0x68] sm:$0xff]  ;;  %v5916_v57 = vld [vmem:[%s5768_s15 + $0x70] sm:$0xff]  ;;  %p5547_p11 = scmp.ne.s32.totalorder %s5545_s30, %s5546_s0  ;;  %p5552_p1 = scmp.lt.s32.totalorder %s5550_s16, %s5546_s0 }
  0x25   : > { %v527_v35 = vsel %vm514_vm2, %v524_v31, %v526_v34  ;;  %v529_v38 = vsel %vm514_vm2, %v526_v34, %v528_v37  ;;  %v532_v43 = vrot.slane %v5861_v42, 1  ;;  %v534_v46 = vrot.slane %v5872_v45, 1  ;;  %v5927_v60 = vld [vmem:[%s5768_s15 + $0x78] sm:$0xff]  ;;  %v5938_v63 = vld [vmem:[%s5768_s15 + $0x80] sm:$0xff]  ;;  %v5949_v2 = vld [vmem:[%s5768_s15 + $0x88] sm:$0xff] }
  0x26   : > { %v531_v41 = vsel %vm514_vm2, %v528_v37, %v530_v40  ;;  %v536_v49 = vrot.slane %v5883_v48, 1  ;;  %v538_v52 = vrot.slane %v5894_v51, 1  ;;  %v540_v55 = vrot.slane %v5905_v54, 1  ;;  %v5960_v7 = vld [vmem:[%s5768_s15 + $0x90] sm:$0xff]  ;;  %v5975_v18 = vld [vmem:[%s5768_s15 + $0x98] sm:$0xff]  ;;  %v5990_v31 = vld [vmem:[%s5768_s15 + $0xa0] sm:$0xff]  ;;  %p5548_p12 = pnand %p5547_p11, %p5702_p5  ;;  %p5553_p2 = por %p5552_p1, %p5551_p0 }
  0x27   : > { %v533_v44 = vsel %vm514_vm2, %v530_v40, %v532_v43  ;;  %v535_v47 = vsel %vm514_vm2, %v532_v43, %v534_v46  ;;  %v542_v58 = vrot.slane %v5916_v57, 1  ;;  %v544_v61 = vrot.slane %v5927_v60, 1 }
  0x28   : > { %v537_v50 = vsel %vm514_vm2, %v534_v46, %v536_v49  ;;  %v539_v53 = vsel %vm514_vm2, %v536_v49, %v538_v52  ;;  %v541_v56 = vsel %vm514_vm2, %v538_v52, %v540_v55  ;;  %v546_v0 = vrot.slane %v5938_v63, 1  ;;  %p5549_p13 = pneg %p5548_p12 }
  0x29   : > { %4907 = vmatmul.msk.f32.gmra.mxu2 %vm570_vm1, %v5774_v17  ;;  %4936 = vmatmul.msk.f32.gmra.mxu3 %vm570_vm1, %v5774_v17  ;;  %v543_v59 = vsel %vm514_vm2, %v540_v55, %v542_v58  ;;  %v545_v62 = vsel %vm514_vm2, %v542_v58, %v544_v61  ;;  %v548_v3 = vrot.slane %v5949_v2, 1  ;;  %v550_v12 = vrot.slane %v5960_v7, 1  ;;  %v6020_v58 = vld [vmem:[%s5768_s15 + $0xb0] sm:$0xff] }
  0x2a   : > { %v547_v1 = vsel %vm514_vm2, %v544_v61, %v546_v0  ;;  %v552_v25 = vrot.slane %v5975_v18, 1  ;;  %p5554_p3 = pnand %p5553_p2, %p5549_p13 }
  0x2b   : > { %v549_v6 = vsel %vm514_vm2, %v546_v0, %v548_v3  ;;  %v551_v15 = vsel %vm514_vm2, %v548_v3, %v550_v12 }
  0x2c   : > { %4849 = vmatmul.msk.f32.gmra.mxu0 %vm570_vm1, %v519_v23  ;;  %4878 = vmatmul.msk.f32.gmra.mxu1 %vm570_vm1, %v519_v23 }
  0x31   : > { %4908 = vmatmul.msk.f32.gmra.mxu2 %vm570_vm1, %v5783_v20  ;;  %4937 = vmatmul.msk.f32.gmra.mxu3 %vm570_vm1, %v5783_v20 }
  0x34   : > { %4850 = vmatmul.msk.f32.gmra.mxu0 %vm570_vm1, %v521_v26  ;;  %4879 = vmatmul.msk.f32.gmra.mxu1 %vm570_vm1, %v521_v26 }
  0x39   : > { %4909 = vmatmul.msk.f32.gmra.mxu2 %vm570_vm1, %v5795_v24  ;;  %4938 = vmatmul.msk.f32.gmra.mxu3 %vm570_vm1, %v5795_v24 }
  0x3c   : > { %4851 = vmatmul.msk.f32.gmra.mxu0 %vm570_vm1, %v523_v29  ;;  %4880 = vmatmul.msk.f32.gmra.mxu1 %vm570_vm1, %v523_v29  ;;  %v553_v29 = vsel %vm514_vm2, %v550_v12, %v552_v25 }
  0x41   : > { %4910 = vmatmul.msk.f32.gmra.mxu2 %vm570_vm1, %v5806_v27  ;;  %4939 = vmatmul.msk.f32.gmra.mxu3 %vm570_vm1, %v5806_v27 }
  0x44   : > { %4852 = vmatmul.msk.f32.gmra.mxu0 %vm570_vm1, %v525_v32  ;;  %4881 = vmatmul.msk.f32.gmra.mxu1 %vm570_vm1, %v525_v32 }
  0x49   : > { %4911 = vmatmul.msk.f32.gmra.mxu2 %vm570_vm1, %v5817_v30  ;;  %4940 = vmatmul.msk.f32.gmra.mxu3 %vm570_vm1, %v5817_v30 }
  0x4c   : > { %4853 = vmatmul.msk.f32.gmra.mxu0 %vm570_vm1, %v527_v35  ;;  %4882 = vmatmul.msk.f32.gmra.mxu1 %vm570_vm1, %v527_v35 }
  0x51   : > { %4912 = vmatmul.msk.f32.gmra.mxu2 %vm570_vm1, %v5828_v33  ;;  %4941 = vmatmul.msk.f32.gmra.mxu3 %vm570_vm1, %v5828_v33 }
  0x54   : > { %4854 = vmatmul.msk.f32.gmra.mxu0 %vm570_vm1, %v529_v38  ;;  %4883 = vmatmul.msk.f32.gmra.mxu1 %vm570_vm1, %v529_v38  ;;  %v554_v38 = vrot.slane %v5990_v31, 1 }
  0x56   : > { %v555_v43 = vsel %vm514_vm2, %v552_v25, %v554_v38 }
  0x59   : > { %4913 = vmatmul.msk.f32.gmra.mxu2 %vm570_vm1, %v5839_v36  ;;  %4942 = vmatmul.msk.f32.gmra.mxu3 %vm570_vm1, %v5839_v36 }
  0x5c   : > { %4855 = vmatmul.msk.f32.gmra.mxu0 %vm570_vm1, %v531_v41  ;;  %4884 = vmatmul.msk.f32.gmra.mxu1 %vm570_vm1, %v531_v41 }
  0x61   : > { %4914 = vmatmul.msk.f32.gmra.mxu2 %vm570_vm1, %v5850_v39  ;;  %4943 = vmatmul.msk.f32.gmra.mxu3 %vm570_vm1, %v5850_v39 }
  0x64   : > { %4856 = vmatmul.msk.f32.gmra.mxu0 %vm570_vm1, %v533_v44  ;;  %4885 = vmatmul.msk.f32.gmra.mxu1 %vm570_vm1, %v533_v44  ;;  %v6005_v44 = vld [vmem:[%s5768_s15 + $0xa8] sm:$0xff] }
  0x65   : > { %v556_v52 = vrot.slane %v6005_v44, 1 }
  0x69   : > { %4915 = vmatmul.msk.f32.gmra.mxu2 %vm570_vm1, %v5861_v42  ;;  %4944 = vmatmul.msk.f32.gmra.mxu3 %vm570_vm1, %v5861_v42 }
  0x6c   : > { %4857 = vmatmul.msk.f32.gmra.mxu0 %vm570_vm1, %v535_v47  ;;  %4886 = vmatmul.msk.f32.gmra.mxu1 %vm570_vm1, %v535_v47 }
  0x71   : > { %4916 = vmatmul.msk.f32.gmra.mxu2 %vm570_vm1, %v5872_v45  ;;  %4945 = vmatmul.msk.f32.gmra.mxu3 %vm570_vm1, %v5872_v45 }
  0x74   : > { %4858 = vmatmul.msk.f32.gmra.mxu0 %vm570_vm1, %v537_v50  ;;  %4887 = vmatmul.msk.f32.gmra.mxu1 %vm570_vm1, %v537_v50 }
  0x79   : > { %4917 = vmatmul.msk.f32.gmra.mxu2 %vm570_vm1, %v5883_v48  ;;  %4946 = vmatmul.msk.f32.gmra.mxu3 %vm570_vm1, %v5883_v48 }
  0x7c   : > { %4859 = vmatmul.msk.f32.gmra.mxu0 %vm570_vm1, %v539_v53  ;;  %4888 = vmatmul.msk.f32.gmra.mxu1 %vm570_vm1, %v539_v53 }
  0x81   : > { %4918 = vmatmul.msk.f32.gmra.mxu2 %vm570_vm1, %v5894_v51  ;;  %4947 = vmatmul.msk.f32.gmra.mxu3 %vm570_vm1, %v5894_v51 }
  0x84   : > { %4860 = vmatmul.msk.f32.gmra.mxu0 %vm570_vm1, %v541_v56  ;;  %4889 = vmatmul.msk.f32.gmra.mxu1 %vm570_vm1, %v541_v56  ;;  %v557_v56 = vsel %vm514_vm2, %v554_v38, %v556_v52 }
  0x89   : > { %4919 = vmatmul.msk.f32.gmra.mxu2 %vm570_vm1, %v5905_v54  ;;  %4948 = vmatmul.msk.f32.gmra.mxu3 %vm570_vm1, %v5905_v54 }
  0x8c   : > { %4861 = vmatmul.msk.f32.gmra.mxu0 %vm570_vm1, %v543_v59  ;;  %4890 = vmatmul.msk.f32.gmra.mxu1 %vm570_vm1, %v543_v59 }
  0x91   : > { %4920 = vmatmul.msk.f32.gmra.mxu2 %vm570_vm1, %v5916_v57  ;;  %4949 = vmatmul.msk.f32.gmra.mxu3 %vm570_vm1, %v5916_v57 }
  0x94   : > { %4862 = vmatmul.msk.f32.gmra.mxu0 %vm570_vm1, %v545_v62  ;;  %4891 = vmatmul.msk.f32.gmra.mxu1 %vm570_vm1, %v545_v62 }
  0x99   : > { %4921 = vmatmul.msk.f32.gmra.mxu2 %vm570_vm1, %v5927_v60  ;;  %4950 = vmatmul.msk.f32.gmra.mxu3 %vm570_vm1, %v5927_v60 }
  0x9c   : > { %4863 = vmatmul.msk.f32.gmra.mxu0 %vm570_vm1, %v547_v1  ;;  %4892 = vmatmul.msk.f32.gmra.mxu1 %vm570_vm1, %v547_v1  ;;  %v558_v1 = vrot.slane %v6020_v58, 1 }
  0xa1   : > { %v651_v4 = vpop.f32.mrf.mxu0  ;;  %v752_v5 = vpop.f32.mrf.mxu1  ;;  %4922 = vmatmul.msk.f32.gmra.mxu2 %vm570_vm1, %v5938_v63  ;;  %4951 = vmatmul.msk.f32.gmra.mxu3 %vm570_vm1, %v5938_v63 }
  0xa4   : > { %4864 = vmatmul.msk.f32.gmra.mxu0 %vm570_vm1, %v549_v6  ;;  %4893 = vmatmul.msk.f32.gmra.mxu1 %vm570_vm1, %v549_v6  ;;  %v915_v8 = vpop.f32.mrf.mxu2  ;;  %v1016_v9 = vpop.f32.mrf.mxu3  ;;  %v6035_v6 = vld [vmem:[%s5768_s15 + $0xb8] sm:$0xff] }
  0xa5   : > { %v5964_v10 = vadd.f32 %v915_v8, %v651_v4  ;;  %v5966_v11 = vadd.f32 %v1016_v9, %v752_v5  ;;  %v559_v5 = vsel %vm514_vm2, %v556_v52, %v558_v1  ;;  %v5036_v52 = vld [vmem:[%s9311_s1 + $0xf8] sm:$0xf] }
  0xa6   : > { %5066 = vmatpush.msk.msrb.mxu3 %vm627_vm0, %v5036_v52 }
  0xa9   : > { %v654_v13 = vpop.f32.mrf.mxu0  ;;  %v755_v14 = vpop.f32.mrf.mxu1  ;;  %4923 = vmatmul.msk.f32.gmra.mxu2 %vm570_vm1, %v5949_v2  ;;  %4952 = vmatmul.msk.f32.gmra.mxu3 %vm570_vm1, %v5949_v2 }
  0xac   : > { %4865 = vmatmul.msk.f32.gmra.mxu0 %vm570_vm1, %v551_v15  ;;  %4894 = vmatmul.msk.f32.gmra.mxu1 %vm570_vm1, %v551_v15  ;;  %v918_v19 = vpop.f32.mrf.mxu2  ;;  %v1019_v21 = vpop.f32.mrf.mxu3  ;;  %v4969_v15 = vld [vmem:[%s9311_s1 + $0xb0] sm:$0xf] }
  0xad   : > { %v5979_v22 = vadd.f32 %v918_v19, %v654_v13  ;;  %v5981_v23 = vadd.f32 %v1019_v21, %v755_v14  ;;  %v560_v14 = vrot.slane %v6035_v6, 1  ;;  %v4970_v19 = vld [vmem:[%s9311_s1 + $0xb8] sm:$0xf]  ;;  %4971 = vmatpush.msk.msrb.mxu0 %vm627_vm0, %v4969_v15  ;;  %v5029_v15 = vld [vmem:[%s9311_s1 + $0xc0] sm:$0xff] }
  0xae   : > { %5000 = vmatpush.msk.msrb.mxu1 %vm627_vm0, %v4970_v19  ;;  %v5030_v19 = vld [vmem:[%s9311_s1 + $0xc8] sm:$0xff] }
  0xb1   : > { %v657_v26 = vpop.f32.mrf.mxu0  ;;  %v758_v28 = vpop.f32.mrf.mxu1  ;;  %4924 = vmatmul.msk.f32.gmra.mxu2 %vm570_vm1, %v5960_v7  ;;  %4953 = vmatmul.msk.f32.gmra.mxu3 %vm570_vm1, %v5960_v7 }
  0xb4   : > { %4866 = vmatmul.msk.f32.gmra.mxu0 %vm570_vm1, %v553_v29  ;;  %4895 = vmatmul.msk.f32.gmra.mxu1 %vm570_vm1, %v553_v29  ;;  %v921_v32 = vpop.f32.mrf.mxu2  ;;  %v1022_v34 = vpop.f32.mrf.mxu3 }
  0xb5   : > { %v5994_v35 = vadd.f32 %v921_v32, %v657_v26  ;;  %v5996_v37 = vadd.f32 %v1022_v34, %v758_v28  ;;  %v561_v26 = vsel %vm514_vm2, %v558_v1, %v560_v14  ;;  %v6058_v28 = vld [vmem:[%s5768_s15 + $0xc0] sm:$0xff] }
  0xb9   : > { %v660_v40 = vpop.f32.mrf.mxu0  ;;  %v761_v41 = vpop.f32.mrf.mxu1  ;;  %4925 = vmatmul.msk.f32.gmra.mxu2 %vm570_vm1, %v5975_v18  ;;  %4954 = vmatmul.msk.f32.gmra.mxu3 %vm570_vm1, %v5975_v18 }
  0xbc   : > { %4867 = vmatmul.msk.f32.gmra.mxu0 %vm570_vm1, %v555_v43  ;;  %4896 = vmatmul.msk.f32.gmra.mxu1 %vm570_vm1, %v555_v43  ;;  %v924_v46 = vpop.f32.mrf.mxu2  ;;  %v1025_v47 = vpop.f32.mrf.mxu3 }
  0xbd   : > { %v6009_v49 = vadd.f32 %v924_v46, %v660_v40  ;;  %v6011_v50 = vadd.f32 %v1025_v47, %v761_v41  ;;  %v562_v40 = vrot.slane %v6058_v28, 1  ;;  %v5035_v47 = vld [vmem:[%s9311_s1 + $0xf0] sm:$0xf] }
  0xbe   : > { %5037 = vmatpush.msk.msrb.mxu2 %vm627_vm0, %v5035_v47 }
  0xbf   : > { %v563_v46 = vsel %vm514_vm2, %v560_v14, %v562_v40  ;;  %v4968_v14 = vld [vmem:[%s9311_s1 + $0xa8] sm:$0xff] }
  0xc0   : > { %1341 = vmatpush.msrb.mxu1 %v4968_v14 }
  0xc1   : > { %v663_v53 = vpop.f32.mrf.mxu0  ;;  %v764_v55 = vpop.f32.mrf.mxu1  ;;  %4926 = vmatmul.msk.f32.gmra.mxu2 %vm570_vm1, %v5990_v31  ;;  %4955 = vmatmul.msk.f32.gmra.mxu3 %vm570_vm1, %v5990_v31 }
  0xc4   : > { %4868 = vmatmul.msk.f32.gmra.mxu0 %vm570_vm1, %v557_v56  ;;  %4897 = vmatmul.msk.f32.gmra.mxu1 %vm570_vm1, %v557_v56  ;;  %v927_v59 = vpop.f32.mrf.mxu2  ;;  %v1028_v61 = vpop.f32.mrf.mxu3  ;;  %v5034_v56 = vld [vmem:[%s9311_s1 + $0xe8] sm:$0xff] }
  0xc5   : > { %v6024_v62 = vadd.f32 %v927_v59, %v663_v53  ;;  %v6026_v0 = vadd.f32 %v1028_v61, %v764_v55  ;;  %v6079_v53 = vld [vmem:[%s5768_s15 + $0xc8] sm:$0xff]  ;;  %v5033_v55 = vld [vmem:[%s9311_s1 + $0xe0] sm:$0xff]  ;;  %1726 = vmatpush.msrb.mxu3 %v5034_v56 }
  0xc6   : > { %1625 = vmatpush.msrb.mxu2 %v5033_v55 }
  0xc9   : > { %v666_v3 = vpop.f32.mrf.mxu0  ;;  %v767_v4 = vpop.f32.mrf.mxu1  ;;  %4927 = vmatmul.msk.f32.gmra.mxu2 %vm570_vm1, %v6005_v44  ;;  %4956 = vmatmul.msk.f32.gmra.mxu3 %vm570_vm1, %v6005_v44 }
  0xcc   : > { %4869 = vmatmul.msk.f32.gmra.mxu0 %vm570_vm1, %v559_v5  ;;  %4898 = vmatmul.msk.f32.gmra.mxu1 %vm570_vm1, %v559_v5  ;;  %v930_v8 = vpop.f32.mrf.mxu2  ;;  %v1031_v9 = vpop.f32.mrf.mxu3  ;;  %v5031_v5 = vld [vmem:[%s9311_s1 + $0xd0] sm:$0xff] }
  0xcd   : > { %v6039_v12 = vadd.f32 %v930_v8, %v666_v3  ;;  %v6041_v13 = vadd.f32 %v1031_v9, %v767_v4  ;;  %v564_v4 = vrot.slane %v6079_v53, 1  ;;  %v5032_v8 = vld [vmem:[%s9311_s1 + $0xd8] sm:$0xff]  ;;  %v4967_v9 = vld [vmem:[%s9311_s1 + $0xa0] sm:$0xff]  ;;  %1626 = vmatpush.msrb.mxu2 %v5031_v5 }
  0xce   : > { %1240 = vmatpush.msrb.mxu0 %v4967_v9  ;;  %1727 = vmatpush.msrb.mxu3 %v5032_v8  ;;  %v6147_v8 = vld [vmem:[%s5768_s15 + $0xd8] sm:$0xff] }
  0xcf   : > { %1627 = vmatpush.msrb.mxu2 %v5029_v15 }
  0xd0   : > { %1728 = vmatpush.msrb.mxu3 %v5030_v19 }
  0xd1   : > { %v669_v21 = vpop.f32.mrf.mxu0  ;;  %v770_v25 = vpop.f32.mrf.mxu1  ;;  %4928 = vmatmul.msk.f32.gmra.mxu2 %vm570_vm1, %v6020_v58  ;;  %4957 = vmatmul.msk.f32.gmra.mxu3 %vm570_vm1, %v6020_v58 }
  0xd4   : > { %4870 = vmatmul.msk.f32.gmra.mxu0 %vm570_vm1, %v561_v26  ;;  %4899 = vmatmul.msk.f32.gmra.mxu1 %vm570_vm1, %v561_v26  ;;  %v933_v29 = vpop.f32.mrf.mxu2  ;;  %v1034_v32 = vpop.f32.mrf.mxu3 }
  0xd5   : > { %v6062_v34 = vadd.f32 %v933_v29, %v669_v21  ;;  %v6064_v38 = vadd.f32 %v1034_v32, %v770_v25  ;;  %v4965_v21 = vld [vmem:[%s9311_s1 + $0x90] sm:$0xff]  ;;  %v4966_v25 = vld [vmem:[%s9311_s1 + $0x98] sm:$0xff]  ;;  %v565_v32 = vsel %vm514_vm2, %v562_v40, %v564_v4 }
  0xd6   : > { %1241 = vmatpush.msrb.mxu0 %v4965_v21  ;;  %1342 = vmatpush.msrb.mxu1 %v4966_v25  ;;  %v568_v21 = vrot.slane %v6147_v8, 1 }
  0xd9   : > { %v672_v41 = vpop.f32.mrf.mxu0  ;;  %v773_v43 = vpop.f32.mrf.mxu1  ;;  %4929 = vmatmul.msk.f32.gmra.mxu2 %vm570_vm1, %v6035_v6  ;;  %4958 = vmatmul.msk.f32.gmra.mxu3 %vm570_vm1, %v6035_v6 }
  0xdc   : > { %4871 = vmatmul.msk.f32.gmra.mxu0 %vm570_vm1, %v563_v46  ;;  %4900 = vmatmul.msk.f32.gmra.mxu1 %vm570_vm1, %v563_v46  ;;  %v936_v59 = vpop.f32.mrf.mxu2  ;;  %v1037_v61 = vpop.f32.mrf.mxu3  ;;  %v4964_v46 = vld [vmem:[%s9311_s1 + $0x88] sm:$0xff] }
  0xdd   : > { %v6091_v1 = vadd.f32 %v936_v59, %v672_v41  ;;  %v6093_v3 = vadd.f32 %v1037_v61, %v773_v43  ;;  %v6126_v41 = vld [vmem:[%s5768_s15 + $0xd0] sm:$0xff]  ;;  %v4963_v43 = vld [vmem:[%s9311_s1 + $0x80] sm:$0xff]  ;;  %1343 = vmatpush.msrb.mxu1 %v4964_v46 }
  0xde   : > { %v566_v56 = vrot.slane %v6126_v41, 1  ;;  %1242 = vmatpush.msrb.mxu0 %v4963_v43 }
  0xe0   : > { %v567_v5 = vsel %vm514_vm2, %v564_v4, %v566_v56  ;;  %v569_v4 = vsel %vm514_vm2, %v566_v56, %v568_v21  ;;  %v1495_v56 = vrot.slane %v5771_v16, 3 }
  0xe1   : > { %v675_v26 = vpop.f32.mrf.mxu0  ;;  %v776_v29 = vpop.f32.mrf.mxu1  ;;  %4930 = vmatmul.msk.f32.gmra.mxu2 %vm570_vm1, %v6058_v28  ;;  %4959 = vmatmul.msk.f32.gmra.mxu3 %vm570_vm1, %v6058_v28 }
  0xe4   : > { %4872 = vmatmul.msk.f32.gmra.mxu0 %vm570_vm1, %v565_v32  ;;  %4901 = vmatmul.msk.f32.gmra.mxu1 %vm570_vm1, %v565_v32  ;;  %v939_v40 = vpop.f32.mrf.mxu2  ;;  %v1040_v47 = vpop.f32.mrf.mxu3 }
  0xe5   : > { %v6136_v52 = vadd.f32 %v939_v40, %v675_v26  ;;  %v6138_v55 = vadd.f32 %v1040_v47, %v776_v29 }
  0xe9   : > { %v678_v59 = vpop.f32.mrf.mxu0  ;;  %v779_v61 = vpop.f32.mrf.mxu1  ;;  %4931 = vmatmul.msk.f32.gmra.mxu2 %vm570_vm1, %v6079_v53  ;;  %4960 = vmatmul.msk.f32.gmra.mxu3 %vm570_vm1, %v6079_v53 }
  0xec   : > { %4873 = vmatmul.msk.f32.gmra.mxu0 %vm570_vm1, %v567_v5  ;;  %4902 = vmatmul.msk.f32.gmra.mxu1 %vm570_vm1, %v567_v5  ;;  %v942_v9 = vpop.f32.mrf.mxu2  ;;  %v1043_v14 = vpop.f32.mrf.mxu3 }
  0xed   : > { %v6151_v15 = vadd.f32 %v942_v9, %v678_v59  ;;  %v6153_v19 = vadd.f32 %v1043_v14, %v779_v61  ;;  %v1496_v59 = vrot.slane %v5774_v17, 3 }
  0xf1   : > { %v681_v25 = vpop.f32.mrf.mxu0  ;;  %v782_v26 = vpop.f32.mrf.mxu1  ;;  %4932 = vmatmul.msk.f32.gmra.mxu2 %vm570_vm1, %v6126_v41  ;;  %4961 = vmatmul.msk.f32.gmra.mxu3 %vm570_vm1, %v6126_v41 }
  0xf4   : > { %4874 = vmatmul.msk.f32.gmra.mxu0 %vm570_vm1, %v569_v4  ;;  %4903 = vmatmul.msk.f32.gmra.mxu1 %vm570_vm1, %v569_v4  ;;  %v945_v29 = vpop.f32.mrf.mxu2  ;;  %v1046_v32 = vpop.f32.mrf.mxu3  ;;  %v1497_v4 = vsel %vm1494_vm3, %v1495_v56, %v1496_v59  ;;  %v1113_v56 = vrot.slane %v5783_v20, 2 }
  0xf5   : > { %v6163_v43 = vadd.f32 %v945_v29, %v681_v25  ;;  %v6165_v46 = vadd.f32 %v1046_v32, %v782_v26  ;;  %v1110_v25 = vrot.slane %v5771_v16, 2  ;;  %v1111_v26 = vrot.slane %v5774_v17, 2 }
  0xf7   : > { %9336 = vst [vmem:[#allocation8_spill] sm:$0xff] %v6165_v46 }
  0xf9   : > { %v684_v40 = vpop.f32.mrf.mxu0  ;;  %v785_v47 = vpop.f32.mrf.mxu1  ;;  %4933 = vmatmul.msk.f32.gmra.mxu2 %vm570_vm1, %v6147_v8  ;;  %4962 = vmatmul.msk.f32.gmra.mxu3 %vm570_vm1, %v6147_v8 }
  0xfc   : > { %4875 = vmatmul.msk.f32.gmra.mxu0 %vm570_vm1, %v568_v21  ;;  %4904 = vmatmul.msk.f32.gmra.mxu1 %vm570_vm1, %v568_v21  ;;  %v948_v61 = vpop.f32.mrf.mxu2  ;;  %v1049_v5 = vpop.f32.mrf.mxu3  ;;  %v1112_v21 = vsel %vm1109_vm4, %v1110_v25, %v1111_v26  ;;  %v1114_v25 = vsel %vm1109_vm4, %v1111_v26, %v1113_v56 }
  0xfd   : > { %v6175_v9 = vadd.f32 %v948_v61, %v684_v40  ;;  %v6177_v14 = vadd.f32 %v1049_v5, %v785_v47  ;;  %v1498_v40 = vrot.slane %v5783_v20, 3 }
  0xff   : > { %9337 = vst [vmem:[#allocation9_spill] sm:$0xff] %v6175_v9  ;;  %v1499_v5 = vsel %vm1494_vm3, %v1496_v59, %v1498_v40  ;;  %v1500_v9 = vrot.slane %v5795_v24, 3  ;;  %v1115_v59 = vrot.slane %v5795_v24, 2 }
 0x100   : > { %9338 = vst [vmem:[#allocation10_spill] sm:$0xff] %v6177_v14 }
 0x101   : > { %v687_v29 = vpop.f32.mrf.mxu0  ;;  %v788_v32 = vpop.f32.mrf.mxu1  ;;  %5038 = vmatmul.msk.f32.vlgmr.msrb.gmra.mxu2 %vm570_vm1, %v1497_v4  ;;  %5067 = vmatmul.msk.f32.vlgmr.msrb.gmra.mxu3 %vm570_vm1, %v1497_v4  ;;  %v1116_v26 = vsel %vm1109_vm4, %v1113_v56, %v1115_v59 }
 0x104   : > { %v951_v61 = vpop.f32.mrf.mxu2  ;;  %v1052_v47 = vpop.f32.mrf.mxu3  ;;  %4972 = vmatmul.msk.f32.vlgmr.msrb.gmra.mxu0 %vm570_vm1, %v1112_v21  ;;  %5001 = vmatmul.msk.f32.vlgmr.msrb.gmra.mxu1 %vm570_vm1, %v1112_v21 }
 0x105   : > { %v6188_v16 = vadd.f32 %v951_v61, %v687_v29  ;;  %v6190_v17 = vadd.f32 %v1052_v47, %v788_v32  ;;  %v1501_v32 = vsel %vm1494_vm3, %v1498_v40, %v1500_v9 }
 0x107   : > { %9339 = vst [vmem:[#allocation11_spill] sm:$0xff] %v6188_v16  ;;  %v5517_v16 = vld [vmem:[%s5768_s15 + $0x78] sm:$0xff] }
 0x108   : > { %9340 = vst [vmem:[#allocation12_spill] sm:$0xff] %v6190_v17 }
 0x109   : > { %v690_v14 = vpop.f32.mrf.mxu0  ;;  %v791_v4 = vpop.f32.mrf.mxu1  ;;  %5039 = vmatmul.msk.f32.gmra.mxu2 %vm570_vm1, %v1499_v5  ;;  %5068 = vmatmul.msk.f32.gmra.mxu3 %vm570_vm1, %v1499_v5  ;;  %v1502_v5 = vrot.slane %v5806_v27, 3 }
 0x10b   : > { %v1503_v40 = vsel %vm1494_vm3, %v1500_v9, %v1502_v5  ;;  %v1119_v9 = vrot.slane %v5817_v30, 2 }
 0x10c   : > { %v954_v46 = vpop.f32.mrf.mxu2  ;;  %v1055_v21 = vpop.f32.mrf.mxu3  ;;  %4973 = vmatmul.msk.f32.gmra.mxu0 %vm570_vm1, %v1114_v25  ;;  %5002 = vmatmul.msk.f32.gmra.mxu1 %vm570_vm1, %v1114_v25 }
 0x10d   : > { %v6200_v29 = vadd.f32 %v954_v46, %v690_v14  ;;  %v6202_v20 = vadd.f32 %v1055_v21, %v791_v4  ;;  %v1117_v14 = vrot.slane %v5806_v27, 2 }
 0x10f   : > { %9341 = vst [vmem:[#allocation13_spill] sm:$0xff] %v6200_v29  ;;  %v1118_v56 = vsel %vm1109_vm4, %v1115_v59, %v1117_v14  ;;  %v1120_v59 = vsel %vm1109_vm4, %v1117_v14, %v1119_v9 }
 0x110   : > { %9342 = vst [vmem:[#allocation14_spill] sm:$0xff] %v6202_v20 }
 0x111   : > { %v693_v61 = vpop.f32.mrf.mxu0  ;;  %v794_v47 = vpop.f32.mrf.mxu1  ;;  %5040 = vmatmul.msk.f32.gmra.mxu2 %vm570_vm1, %v1501_v32  ;;  %5069 = vmatmul.msk.f32.gmra.mxu3 %vm570_vm1, %v1501_v32  ;;  %v1504_v32 = vrot.slane %v5817_v30, 3 }
 0x114   : > { %v957_v17 = vpop.f32.mrf.mxu2  ;;  %v1058_v25 = vpop.f32.mrf.mxu3  ;;  %4974 = vmatmul.msk.f32.gmra.mxu0 %vm570_vm1, %v1116_v26  ;;  %5003 = vmatmul.msk.f32.gmra.mxu1 %vm570_vm1, %v1116_v26 }
 0x115   : > { %v6212_v46 = vadd.f32 %v957_v17, %v693_v61  ;;  %v6214_v24 = vadd.f32 %v1058_v25, %v794_v47  ;;  %v1505_v61 = vsel %vm1494_vm3, %v1502_v5, %v1504_v32  ;;  %v1121_v5 = vrot.slane %v5828_v33, 2 }
 0x117   : > { %9343 = vst [vmem:[#allocation15_spill] sm:$0xff] %v6212_v46  ;;  %v1122_v14 = vsel %vm1109_vm4, %v1119_v9, %v1121_v5 }
 0x118   : > { %9344 = vst [vmem:[#allocation16_spill] sm:$0xff] %v6214_v24 }
 0x119   : > { %v696_v4 = vpop.f32.mrf.mxu0  ;;  %v797_v21 = vpop.f32.mrf.mxu1  ;;  %5041 = vmatmul.msk.f32.gmra.mxu2 %vm570_vm1, %v1503_v40  ;;  %5070 = vmatmul.msk.f32.gmra.mxu3 %vm570_vm1, %v1503_v40  ;;  %v1506_v40 = vrot.slane %v5828_v33, 3 }
 0x11c   : > { %v960_v20 = vpop.f32.mrf.mxu2  ;;  %v1061_v26 = vpop.f32.mrf.mxu3  ;;  %4975 = vmatmul.msk.f32.gmra.mxu0 %vm570_vm1, %v1118_v56  ;;  %5004 = vmatmul.msk.f32.gmra.mxu1 %vm570_vm1, %v1118_v56 }
 0x11d   : > { %v6224_v17 = vadd.f32 %v960_v20, %v696_v4  ;;  %v6226_v27 = vadd.f32 %v1061_v26, %v797_v21  ;;  %v1507_v4 = vsel %vm1494_vm3, %v1504_v32, %v1506_v40  ;;  %v1123_v32 = vrot.slane %v5839_v36, 2 }
 0x11f   : > { %9345 = vst [vmem:[#allocation17_spill] sm:$0xff] %v6224_v17  ;;  %v1124_v9 = vsel %vm1109_vm4, %v1121_v5, %v1123_v32 }
 0x120   : > { %9346 = vst [vmem:[#allocation18_spill] sm:$0xff] %v6226_v27 }
 0x121   : > { %v699_v47 = vpop.f32.mrf.mxu0  ;;  %v800_v25 = vpop.f32.mrf.mxu1  ;;  %5042 = vmatmul.msk.f32.gmra.mxu2 %vm570_vm1, %v1505_v61  ;;  %5071 = vmatmul.msk.f32.gmra.mxu3 %vm570_vm1, %v1505_v61  ;;  %v1508_v61 = vrot.slane %v5839_v36, 3 }
 0x124   : > { %v963_v24 = vpop.f32.mrf.mxu2  ;;  %v1064_v56 = vpop.f32.mrf.mxu3  ;;  %4976 = vmatmul.msk.f32.gmra.mxu0 %vm570_vm1, %v1120_v59  ;;  %5005 = vmatmul.msk.f32.gmra.mxu1 %vm570_vm1, %v1120_v59 }
 0x125   : > { %v6236_v20 = vadd.f32 %v963_v24, %v699_v47  ;;  %v6238_v30 = vadd.f32 %v1064_v56, %v800_v25  ;;  %v1509_v47 = vsel %vm1494_vm3, %v1506_v40, %v1508_v61  ;;  %v1125_v40 = vrot.slane %v5850_v39, 2 }
 0x127   : > { %9347 = vst [vmem:[#allocation19_spill] sm:$0xff] %v6236_v20  ;;  %v1126_v5 = vsel %vm1109_vm4, %v1123_v32, %v1125_v40 }
 0x128   : > { %9348 = vst [vmem:[#allocation20_spill] sm:$0xff] %v6238_v30 }
 0x129   : > { %v702_v21 = vpop.f32.mrf.mxu0  ;;  %v803_v26 = vpop.f32.mrf.mxu1  ;;  %5043 = vmatmul.msk.f32.gmra.mxu2 %vm570_vm1, %v1507_v4  ;;  %5072 = vmatmul.msk.f32.gmra.mxu3 %vm570_vm1, %v1507_v4  ;;  %v1510_v4 = vrot.slane %v5850_v39, 3 }
 0x12c   : > { %v966_v27 = vpop.f32.mrf.mxu2  ;;  %v1067_v59 = vpop.f32.mrf.mxu3  ;;  %4977 = vmatmul.msk.f32.gmra.mxu0 %vm570_vm1, %v1122_v14  ;;  %5006 = vmatmul.msk.f32.gmra.mxu1 %vm570_vm1, %v1122_v14 }
 0x12d   : > { %v6248_v24 = vadd.f32 %v966_v27, %v702_v21  ;;  %v6250_v33 = vadd.f32 %v1067_v59, %v803_v26  ;;  %v1511_v21 = vsel %vm1494_vm3, %v1508_v61, %v1510_v4  ;;  %v1127_v61 = vrot.slane %v5861_v42, 2 }
 0x12f   : > { %9349 = vst [vmem:[#allocation21_spill] sm:$0xff] %v6248_v24  ;;  %v1128_v32 = vsel %vm1109_vm4, %v1125_v40, %v1127_v61 }
 0x130   : > { %9350 = vst [vmem:[#allocation22_spill] sm:$0xff] %v6250_v33 }
 0x131   : > { %v705_v25 = vpop.f32.mrf.mxu0  ;;  %v806_v56 = vpop.f32.mrf.mxu1  ;;  %5044 = vmatmul.msk.f32.gmra.mxu2 %vm570_vm1, %v1509_v47  ;;  %5073 = vmatmul.msk.f32.gmra.mxu3 %vm570_vm1, %v1509_v47  ;;  %v1512_v47 = vrot.slane %v5861_v42, 3 }
 0x134   : > { %v969_v30 = vpop.f32.mrf.mxu2  ;;  %v1070_v14 = vpop.f32.mrf.mxu3  ;;  %4978 = vmatmul.msk.f32.gmra.mxu0 %vm570_vm1, %v1124_v9  ;;  %5007 = vmatmul.msk.f32.gmra.mxu1 %vm570_vm1, %v1124_v9 }
 0x135   : > { %v6260_v27 = vadd.f32 %v969_v30, %v705_v25  ;;  %v6262_v36 = vadd.f32 %v1070_v14, %v806_v56  ;;  %v1513_v25 = vsel %vm1494_vm3, %v1510_v4, %v1512_v47  ;;  %v1129_v4 = vrot.slane %v5872_v45, 2 }
 0x137   : > { %9351 = vst [vmem:[#allocation23_spill] sm:$0xff] %v6260_v27  ;;  %v1130_v40 = vsel %vm1109_vm4, %v1127_v61, %v1129_v4 }
 0x138   : > { %9352 = vst [vmem:[#allocation24_spill] sm:$0xff] %v6262_v36 }
 0x139   : > { %v708_v26 = vpop.f32.mrf.mxu0  ;;  %v809_v59 = vpop.f32.mrf.mxu1  ;;  %5045 = vmatmul.msk.f32.gmra.mxu2 %vm570_vm1, %v1511_v21  ;;  %5074 = vmatmul.msk.f32.gmra.mxu3 %vm570_vm1, %v1511_v21  ;;  %v1514_v21 = vrot.slane %v5872_v45, 3 }
 0x13c   : > { %v972_v33 = vpop.f32.mrf.mxu2  ;;  %v1073_v9 = vpop.f32.mrf.mxu3  ;;  %4979 = vmatmul.msk.f32.gmra.mxu0 %vm570_vm1, %v1126_v5  ;;  %5008 = vmatmul.msk.f32.gmra.mxu1 %vm570_vm1, %v1126_v5 }
 0x13d   : > { %v6272_v30 = vadd.f32 %v972_v33, %v708_v26  ;;  %v6274_v39 = vadd.f32 %v1073_v9, %v809_v59  ;;  %v1515_v26 = vsel %vm1494_vm3, %v1512_v47, %v1514_v21  ;;  %v1131_v47 = vrot.slane %v5883_v48, 2 }
 0x13f   : > { %9353 = vst [vmem:[#allocation25_spill] sm:$0xff] %v6272_v30  ;;  %v1132_v61 = vsel %vm1109_vm4, %v1129_v4, %v1131_v47 }
 0x140   : > { %9354 = vst [vmem:[#allocation26_spill] sm:$0xff] %v6274_v39 }
 0x141   : > { %v711_v56 = vpop.f32.mrf.mxu0  ;;  %v812_v14 = vpop.f32.mrf.mxu1  ;;  %5046 = vmatmul.msk.f32.gmra.mxu2 %vm570_vm1, %v1513_v25  ;;  %5075 = vmatmul.msk.f32.gmra.mxu3 %vm570_vm1, %v1513_v25  ;;  %v1516_v25 = vrot.slane %v5883_v48, 3 }
 0x144   : > { %v975_v36 = vpop.f32.mrf.mxu2  ;;  %v1076_v5 = vpop.f32.mrf.mxu3  ;;  %4980 = vmatmul.msk.f32.gmra.mxu0 %vm570_vm1, %v1128_v32  ;;  %5009 = vmatmul.msk.f32.gmra.mxu1 %vm570_vm1, %v1128_v32 }
 0x145   : > { %v6284_v33 = vadd.f32 %v975_v36, %v711_v56  ;;  %v6286_v42 = vadd.f32 %v1076_v5, %v812_v14  ;;  %v1517_v56 = vsel %vm1494_vm3, %v1514_v21, %v1516_v25  ;;  %v1133_v21 = vrot.slane %v5894_v51, 2 }
 0x147   : > { %9355 = vst [vmem:[#allocation27_spill] sm:$0xff] %v6284_v33  ;;  %v1134_v4 = vsel %vm1109_vm4, %v1131_v47, %v1133_v21 }
 0x148   : > { %9356 = vst [vmem:[#allocation28_spill] sm:$0xff] %v6286_v42 }
 0x149   : > { %v714_v59 = vpop.f32.mrf.mxu0  ;;  %v815_v9 = vpop.f32.mrf.mxu1  ;;  %5047 = vmatmul.msk.f32.gmra.mxu2 %vm570_vm1, %v1515_v26  ;;  %5076 = vmatmul.msk.f32.gmra.mxu3 %vm570_vm1, %v1515_v26  ;;  %v1518_v26 = vrot.slane %v5894_v51, 3 }
 0x14c   : > { %v978_v39 = vpop.f32.mrf.mxu2  ;;  %v1079_v32 = vpop.f32.mrf.mxu3  ;;  %4981 = vmatmul.msk.f32.gmra.mxu0 %vm570_vm1, %v1130_v40  ;;  %5010 = vmatmul.msk.f32.gmra.mxu1 %vm570_vm1, %v1130_v40 }
 0x14d   : > { %v6296_v36 = vadd.f32 %v978_v39, %v714_v59  ;;  %v6298_v45 = vadd.f32 %v1079_v32, %v815_v9  ;;  %v1519_v59 = vsel %vm1494_vm3, %v1516_v25, %v1518_v26  ;;  %v1135_v25 = vrot.slane %v5905_v54, 2 }
 0x14f   : > { %9357 = vst [vmem:[#allocation29_spill] sm:$0xff] %v6296_v36  ;;  %v1136_v47 = vsel %vm1109_vm4, %v1133_v21, %v1135_v25 }
 0x150   : > { %9358 = vst [vmem:[#allocation30_spill] sm:$0xff] %v6298_v45 }
 0x151   : > { %v717_v14 = vpop.f32.mrf.mxu0  ;;  %v818_v5 = vpop.f32.mrf.mxu1  ;;  %5048 = vmatmul.msk.f32.gmra.mxu2 %vm570_vm1, %v1517_v56  ;;  %5077 = vmatmul.msk.f32.gmra.mxu3 %vm570_vm1, %v1517_v56  ;;  %v1520_v56 = vrot.slane %v5905_v54, 3 }
 0x154   : > { %v981_v42 = vpop.f32.mrf.mxu2  ;;  %v1082_v40 = vpop.f32.mrf.mxu3  ;;  %4982 = vmatmul.msk.f32.gmra.mxu0 %vm570_vm1, %v1132_v61  ;;  %5011 = vmatmul.msk.f32.gmra.mxu1 %vm570_vm1, %v1132_v61 }
 0x155   : > { %v6308_v39 = vadd.f32 %v981_v42, %v717_v14  ;;  %v6310_v48 = vadd.f32 %v1082_v40, %v818_v5  ;;  %v1521_v14 = vsel %vm1494_vm3, %v1518_v26, %v1520_v56  ;;  %v1137_v26 = vrot.slane %v5916_v57, 2 }
 0x157   : > { %9359 = vst [vmem:[#allocation31_spill] sm:$0xff] %v6308_v39  ;;  %v1138_v21 = vsel %vm1109_vm4, %v1135_v25, %v1137_v26 }
 0x158   : > { %9360 = vst [vmem:[#allocation32_spill] sm:$0xff] %v6310_v48 }
 0x159   : > { %v720_v9 = vpop.f32.mrf.mxu0  ;;  %v821_v32 = vpop.f32.mrf.mxu1  ;;  %5049 = vmatmul.msk.f32.gmra.mxu2 %vm570_vm1, %v1519_v59  ;;  %5078 = vmatmul.msk.f32.gmra.mxu3 %vm570_vm1, %v1519_v59  ;;  %v1522_v59 = vrot.slane %v5916_v57, 3 }
 0x15c   : > { %v984_v45 = vpop.f32.mrf.mxu2  ;;  %v1085_v61 = vpop.f32.mrf.mxu3  ;;  %4983 = vmatmul.msk.f32.gmra.mxu0 %vm570_vm1, %v1134_v4  ;;  %5012 = vmatmul.msk.f32.gmra.mxu1 %vm570_vm1, %v1134_v4 }
 0x15d   : > { %v6320_v42 = vadd.f32 %v984_v45, %v720_v9  ;;  %v6322_v51 = vadd.f32 %v1085_v61, %v821_v32  ;;  %v1523_v9 = vsel %vm1494_vm3, %v1520_v56, %v1522_v59  ;;  %v1139_v56 = vrot.slane %v5927_v60, 2 }
 0x15f   : > { %9361 = vst [vmem:[#allocation33_spill] sm:$0xff] %v6320_v42  ;;  %v1140_v25 = vsel %vm1109_vm4, %v1137_v26, %v1139_v56 }
 0x160   : > { %9362 = vst [vmem:[#allocation34_spill] sm:$0xff] %v6322_v51 }
 0x161   : > { %v723_v5 = vpop.f32.mrf.mxu0  ;;  %v824_v40 = vpop.f32.mrf.mxu1  ;;  %5050 = vmatmul.msk.f32.gmra.mxu2 %vm570_vm1, %v1521_v14  ;;  %5079 = vmatmul.msk.f32.gmra.mxu3 %vm570_vm1, %v1521_v14  ;;  %v1524_v14 = vrot.slane %v5927_v60, 3 }
 0x164   : > { %v987_v48 = vpop.f32.mrf.mxu2  ;;  %v1088_v4 = vpop.f32.mrf.mxu3  ;;  %4984 = vmatmul.msk.f32.gmra.mxu0 %vm570_vm1, %v1136_v47  ;;  %5013 = vmatmul.msk.f32.gmra.mxu1 %vm570_vm1, %v1136_v47 }
 0x165   : > { %v6332_v45 = vadd.f32 %v987_v48, %v723_v5  ;;  %v6334_v54 = vadd.f32 %v1088_v4, %v824_v40  ;;  %v1525_v5 = vsel %vm1494_vm3, %v1522_v59, %v1524_v14  ;;  %v1141_v59 = vrot.slane %v5938_v63, 2 }
 0x167   : > { %9363 = vst [vmem:[#allocation35_spill] sm:$0xff] %v6332_v45  ;;  %v1142_v26 = vsel %vm1109_vm4, %v1139_v56, %v1141_v59 }
 0x168   : > { %9364 = vst [vmem:[#allocation36_spill] sm:$0xff] %v6334_v54 }
 0x169   : > { %v726_v32 = vpop.f32.mrf.mxu0  ;;  %v827_v61 = vpop.f32.mrf.mxu1  ;;  %5051 = vmatmul.msk.f32.gmra.mxu2 %vm570_vm1, %v1523_v9  ;;  %5080 = vmatmul.msk.f32.gmra.mxu3 %vm570_vm1, %v1523_v9  ;;  %v1526_v9 = vrot.slane %v5938_v63, 3 }
 0x16c   : > { %v990_v51 = vpop.f32.mrf.mxu2  ;;  %v1091_v47 = vpop.f32.mrf.mxu3  ;;  %4985 = vmatmul.msk.f32.gmra.mxu0 %vm570_vm1, %v1138_v21  ;;  %5014 = vmatmul.msk.f32.gmra.mxu1 %vm570_vm1, %v1138_v21 }
 0x16d   : > { %v6344_v48 = vadd.f32 %v990_v51, %v726_v32  ;;  %v6346_v57 = vadd.f32 %v1091_v47, %v827_v61  ;;  %v1527_v32 = vsel %vm1494_vm3, %v1524_v14, %v1526_v9  ;;  %v1143_v14 = vrot.slane %v5949_v2, 2 }
 0x16f   : > { %9365 = vst [vmem:[#allocation37_spill] sm:$0xff] %v6344_v48  ;;  %v1144_v56 = vsel %vm1109_vm4, %v1141_v59, %v1143_v14 }
 0x170   : > { %9366 = vst [vmem:[#allocation38_spill] sm:$0xff] %v6346_v57 }
 0x171   : > { %v729_v40 = vpop.f32.mrf.mxu0  ;;  %v830_v4 = vpop.f32.mrf.mxu1  ;;  %5052 = vmatmul.msk.f32.gmra.mxu2 %vm570_vm1, %v1525_v5  ;;  %5081 = vmatmul.msk.f32.gmra.mxu3 %vm570_vm1, %v1525_v5  ;;  %v1528_v5 = vrot.slane %v5949_v2, 3 }
 0x174   : > { %v993_v54 = vpop.f32.mrf.mxu2  ;;  %v1094_v21 = vpop.f32.mrf.mxu3  ;;  %4986 = vmatmul.msk.f32.gmra.mxu0 %vm570_vm1, %v1140_v25  ;;  %5015 = vmatmul.msk.f32.gmra.mxu1 %vm570_vm1, %v1140_v25 }
 0x175   : > { %v6356_v51 = vadd.f32 %v993_v54, %v729_v40  ;;  %v6358_v60 = vadd.f32 %v1094_v21, %v830_v4  ;;  %v1529_v40 = vsel %vm1494_vm3, %v1526_v9, %v1528_v5 }
 0x177   : > { %9367 = vst [vmem:[#allocation39_spill] sm:$0xff] %v6356_v51 }
 0x178   : > { %9368 = vst [vmem:[#allocation40_spill] sm:$0xff] %v6358_v60 }
 0x179   : > { %v732_v61 = vpop.f32.mrf.mxu0  ;;  %v833_v47 = vpop.f32.mrf.mxu1  ;;  %5053 = vmatmul.msk.f32.gmra.mxu2 %vm570_vm1, %v1527_v32  ;;  %5082 = vmatmul.msk.f32.gmra.mxu3 %vm570_vm1, %v1527_v32 }
 0x17c   : > { %v996_v57 = vpop.f32.mrf.mxu2  ;;  %v1097_v25 = vpop.f32.mrf.mxu3  ;;  %4987 = vmatmul.msk.f32.gmra.mxu0 %vm570_vm1, %v1142_v26  ;;  %5016 = vmatmul.msk.f32.gmra.mxu1 %vm570_vm1, %v1142_v26 }
 0x17d   : > { %v6368_v54 = vadd.f32 %v996_v57, %v732_v61  ;;  %v6370_v63 = vadd.f32 %v1097_v25, %v833_v47  ;;  %v1530_v57 = vrot.slane %v5960_v7, 3  ;;  %v1145_v25 = vrot.slane %v5960_v7, 2 }
 0x17f   : > { %9369 = vst [vmem:[#allocation41_spill] sm:$0xff] %v6368_v54  ;;  %v1531_v59 = vsel %vm1494_vm3, %v1528_v5, %v1530_v57 }
 0x180   : > { %9370 = vst [vmem:[#allocation42_spill] sm:$0xff] %v6370_v63 }
 0x181   : > { %v1244_v4 = vpop.f32.mrf.mxu0  ;;  %v1345_v21 = vpop.f32.mrf.mxu1  ;;  %5054 = vmatmul.msk.f32.gmra.mxu2 %vm570_vm1, %v1529_v40  ;;  %5083 = vmatmul.msk.f32.gmra.mxu3 %vm570_vm1, %v1529_v40 }
 0x182   : > { %v1429_v32 = vadd.f32 %v1244_v4, %v5964_v10  ;;  %v1430_v26 = vadd.f32 %v1345_v21, %v5966_v11  ;;  %v1146_v11 = vsel %vm1109_vm4, %v1143_v14, %v1145_v25 }
 0x184   : > { %4988 = vmatmul.msk.f32.gmra.mxu0 %vm570_vm1, %v1144_v56  ;;  %5017 = vmatmul.msk.f32.gmra.mxu1 %vm570_vm1, %v1144_v56  ;;  %v1629_v2 = vpop.f32.mrf.mxu2  ;;  %v1730_v9 = vpop.f32.mrf.mxu3  ;;  %v1532_v56 = vrot.slane %v5975_v18, 3 }
 0x185   : > { %v6382_v61 = vadd.f32 %v1629_v2, %v1429_v32  ;;  %v6384_v47 = vadd.f32 %v1730_v9, %v1430_v26  ;;  %v1147_v2 = vrot.slane %v5975_v18, 2 }
 0x186   : > { %v1533_v14 = vsel %vm1494_vm3, %v1530_v57, %v1532_v56 }
 0x189   : > { %v1247_v40 = vpop.f32.mrf.mxu0  ;;  %v1348_v10 = vpop.f32.mrf.mxu1  ;;  %5055 = vmatmul.msk.f32.gmra.mxu2 %vm570_vm1, %v1531_v59  ;;  %5084 = vmatmul.msk.f32.gmra.mxu3 %vm570_vm1, %v1531_v59 }
 0x18a   : > { %v1431_v4 = vadd.f32 %v1247_v40, %v5979_v22  ;;  %v1432_v21 = vadd.f32 %v1348_v10, %v5981_v23  ;;  %v1148_v23 = vsel %vm1109_vm4, %v1145_v25, %v1147_v2  ;;  %v1534_v10 = vrot.slane %v5990_v31, 3 }
 0x18c   : > { %4989 = vmatmul.msk.f32.gmra.mxu0 %vm570_vm1, %v1146_v11  ;;  %5018 = vmatmul.msk.f32.gmra.mxu1 %vm570_vm1, %v1146_v11  ;;  %v1632_v7 = vpop.f32.mrf.mxu2  ;;  %v1733_v5 = vpop.f32.mrf.mxu3  ;;  %v1535_v25 = vsel %vm1494_vm3, %v1532_v56, %v1534_v10 }
 0x18d   : > { %v6396_v32 = vadd.f32 %v1632_v7, %v1431_v4  ;;  %v6398_v26 = vadd.f32 %v1733_v5, %v1432_v21  ;;  %v1149_v21 = vrot.slane %v5990_v31, 2 }
 0x191   : > { %v1250_v9 = vpop.f32.mrf.mxu0  ;;  %v1351_v22 = vpop.f32.mrf.mxu1  ;;  %5056 = vmatmul.msk.f32.gmra.mxu2 %vm570_vm1, %v1533_v14  ;;  %5085 = vmatmul.msk.f32.gmra.mxu3 %vm570_vm1, %v1533_v14 }
 0x192   : > { %v1433_v59 = vadd.f32 %v1250_v9, %v5994_v35  ;;  %v1434_v40 = vadd.f32 %v1351_v22, %v5996_v37  ;;  %v1150_v37 = vsel %vm1109_vm4, %v1147_v2, %v1149_v21  ;;  %v1536_v9 = vrot.slane %v6005_v44, 3 }
 0x194   : > { %4990 = vmatmul.msk.f32.gmra.mxu0 %vm570_vm1, %v1148_v23  ;;  %5019 = vmatmul.msk.f32.gmra.mxu1 %vm570_vm1, %v1148_v23  ;;  %v1635_v18 = vpop.f32.mrf.mxu2  ;;  %v1736_v57 = vpop.f32.mrf.mxu3  ;;  %v1537_v2 = vsel %vm1494_vm3, %v1534_v10, %v1536_v9 }
 0x195   : > { %v6410_v11 = vadd.f32 %v1635_v18, %v1433_v59  ;;  %v6412_v4 = vadd.f32 %v1736_v57, %v1434_v40  ;;  %v1151_v59 = vrot.slane %v6005_v44, 2  ;;  %v1538_v18 = vrot.slane %v6020_v58, 3 }
 0x196   : > { %v1153_v44 = vrot.slane %v6020_v58, 2  ;;  %v1155_v58 = vrot.slane %v6035_v6, 2 }
 0x197   : > { %v1539_v10 = vsel %vm1494_vm3, %v1536_v9, %v1538_v18 }
 0x199   : > { %v1253_v7 = vpop.f32.mrf.mxu0  ;;  %v1354_v35 = vpop.f32.mrf.mxu1  ;;  %5057 = vmatmul.msk.f32.gmra.mxu2 %vm570_vm1, %v1535_v25  ;;  %5086 = vmatmul.msk.f32.gmra.mxu3 %vm570_vm1, %v1535_v25 }
 0x19a   : > { %v1435_v5 = vadd.f32 %v1253_v7, %v6009_v49  ;;  %v1436_v14 = vadd.f32 %v1354_v35, %v6011_v50  ;;  %v1152_v50 = vsel %vm1109_vm4, %v1149_v21, %v1151_v59  ;;  %v1154_v21 = vsel %vm1109_vm4, %v1151_v59, %v1153_v44  ;;  %v5101_v35 = vld [vmem:[%s9311_s1 + $0x130] sm:$0xf] }
 0x19b   : > { %v1540_v7 = vrot.slane %v6035_v6, 3  ;;  %5103 = vmatpush.msk.msra.mxu0 %vm627_vm0, %v5101_v35  ;;  %v1156_v6 = vsel %vm1109_vm4, %v1153_v44, %v1155_v58  ;;  %v1544_v44 = vrot.slane %v6079_v53, 3 }
 0x19c   : > { %4991 = vmatmul.msk.f32.gmra.mxu0 %vm570_vm1, %v1150_v37  ;;  %5020 = vmatmul.msk.f32.gmra.mxu1 %vm570_vm1, %v1150_v37  ;;  %v1638_v31 = vpop.f32.mrf.mxu2  ;;  %v1739_v56 = vpop.f32.mrf.mxu3  ;;  %v5102_v37 = vld [vmem:[%s9311_s1 + $0x138] sm:$0xf] }
 0x19d   : > { %v6424_v22 = vadd.f32 %v1638_v31, %v1435_v5  ;;  %v6426_v23 = vadd.f32 %v1739_v56, %v1436_v14  ;;  %v1541_v5 = vsel %vm1494_vm3, %v1538_v18, %v1540_v7  ;;  %5132 = vmatpush.msk.msra.mxu1 %vm627_vm0, %v5102_v37  ;;  %v1542_v31 = vrot.slane %v6058_v28, 3 }
 0x19e   : > { %v1157_v56 = vrot.slane %v6058_v28, 2  ;;  %v1159_v28 = vrot.slane %v6079_v53, 2  ;;  %v5098_v53 = vld [vmem:[%s9311_s1 + $0x118] sm:$0xff] }
 0x19f   : > { %v1543_v59 = vsel %vm1494_vm3, %v1540_v7, %v1542_v31  ;;  %v1545_v7 = vsel %vm1494_vm3, %v1542_v31, %v1544_v44  ;;  %v5095_v31 = vld [vmem:[%s9311_s1 + $0x100] sm:$0xff] }
 0x1a0   : > { %v1158_v18 = vsel %vm1109_vm4, %v1155_v58, %v1157_v56  ;;  %v5097_v58 = vld [vmem:[%s9311_s1 + $0x110] sm:$0xff] }
 0x1a1   : > { %v6430_v40 = vpop.f32.mrf.mxu0  ;;  %v6432_v49 = vpop.f32.mrf.mxu1  ;;  %5058 = vmatmul.msk.f32.gmra.mxu2 %vm570_vm1, %v1537_v2  ;;  %5087 = vmatmul.msk.f32.gmra.mxu3 %vm570_vm1, %v1537_v2 }
 0x1a4   : > { %4992 = vmatmul.msk.f32.gmra.mxu0 %vm570_vm1, %v1152_v50  ;;  %5021 = vmatmul.msk.f32.gmra.mxu1 %vm570_vm1, %v1152_v50  ;;  %v6578_v42 = vpop.f32.mrf.mxu3 }
 0x1a9   : > { %v6442_v57 = vpop.f32.mrf.mxu0  ;;  %v6444_v25 = vpop.f32.mrf.mxu1  ;;  %5059 = vmatmul.msk.f32.gmra.mxu2 %vm570_vm1, %v1539_v10  ;;  %5088 = vmatmul.msk.f32.gmra.mxu3 %vm570_vm1, %v1539_v10  ;;  %v5099_v10 = vld [vmem:[%s9311_s1 + $0x120] sm:$0xff] }
 0x1aa   : > { %2009 = vmatpush.msra.mxu0 %v5099_v10 }
 0x1ac   : > { %4993 = vmatmul.msk.f32.gmra.mxu0 %vm570_vm1, %v1154_v21  ;;  %5022 = vmatmul.msk.f32.gmra.mxu1 %vm570_vm1, %v1154_v21  ;;  %v5100_v21 = vld [vmem:[%s9311_s1 + $0x128] sm:$0xff]  ;;  %v6593_v27 = vpop.f32.mrf.mxu3 }
 0x1ad   : > { %2110 = vmatpush.msra.mxu1 %v5100_v21  ;;  %2010 = vmatpush.msra.mxu0 %v5097_v58  ;;  %v1548_v58 = vrot.slane %v6147_v8, 3 }
 0x1af   : > { %2111 = vmatpush.msra.mxu1 %v5098_v53  ;;  %2011 = vmatpush.msra.mxu0 %v5095_v31 }
 0x1b1   : > { %v6462_v14 = vpop.f32.mrf.mxu0  ;;  %v6464_v9 = vpop.f32.mrf.mxu1  ;;  %5060 = vmatmul.msk.f32.gmra.mxu2 %vm570_vm1, %v1541_v5  ;;  %5089 = vmatmul.msk.f32.gmra.mxu3 %vm570_vm1, %v1541_v5  ;;  %v1160_v5 = vsel %vm1109_vm4, %v1157_v56, %v1159_v28 }
 0x1b4   : > { %4994 = vmatmul.msk.f32.gmra.mxu0 %vm570_vm1, %v1156_v6  ;;  %5023 = vmatmul.msk.f32.gmra.mxu1 %vm570_vm1, %v1156_v6  ;;  %v1546_v6 = vrot.slane %v6126_v41, 3 }
 0x1b6   : > { %v1547_v56 = vsel %vm1494_vm3, %v1544_v44, %v1546_v6  ;;  %v1549_v44 = vsel %vm1494_vm3, %v1546_v6, %v1548_v58  ;;  %v5502_v6 = vld [vmem:[%s5768_s15] sm:$0xff] }
 0x1b9   : > { %v6474_v2 = vpop.f32.mrf.mxu0  ;;  %v6476_v50 = vpop.f32.mrf.mxu1  ;;  %5061 = vmatmul.msk.f32.gmra.mxu2 %vm570_vm1, %v1543_v59  ;;  %5090 = vmatmul.msk.f32.gmra.mxu3 %vm570_vm1, %v1543_v59  ;;  %v5096_v59 = vld [vmem:[%s9311_s1 + $0x108] sm:$0xff] }
 0x1ba   : > { %2112 = vmatpush.msra.mxu1 %v5096_v59  ;;  %v1879_v59 = vrot.slane %v5502_v6, 4 }
 0x1bc   : > { %4995 = vmatmul.msk.f32.gmra.mxu0 %vm570_vm1, %v1158_v18  ;;  %5024 = vmatmul.msk.f32.gmra.mxu1 %vm570_vm1, %v1158_v18  ;;  %v1161_v18 = vrot.slane %v6126_v41, 2  ;;  %v1163_v41 = vrot.slane %v6147_v8, 2 }
 0x1c1   : > { %v6498_v35 = vpop.f32.mrf.mxu0  ;;  %v6500_v37 = vpop.f32.mrf.mxu1  ;;  %5062 = vmatmul.msk.f32.gmra.mxu2 %vm570_vm1, %v1545_v7  ;;  %5091 = vmatmul.msk.f32.gmra.mxu3 %vm570_vm1, %v1545_v7  ;;  %v1162_v7 = vsel %vm1109_vm4, %v1159_v28, %v1161_v18  ;;  %v1164_v28 = vsel %vm1109_vm4, %v1161_v18, %v1163_v41  ;;  %v5503_v18 = vld [vmem:[%s5768_s15 + $0x8] sm:$0xff] }
 0x1c4   : > { %4996 = vmatmul.msk.f32.gmra.mxu0 %vm570_vm1, %v1160_v5  ;;  %5025 = vmatmul.msk.f32.gmra.mxu1 %vm570_vm1, %v1160_v5 }
 0x1c9   : > { %v6516_v10 = vpop.f32.mrf.mxu0  ;;  %v6518_v21 = vpop.f32.mrf.mxu1  ;;  %5063 = vmatmul.msk.f32.gmra.mxu2 %vm570_vm1, %v1547_v56  ;;  %5092 = vmatmul.msk.f32.gmra.mxu3 %vm570_vm1, %v1547_v56  ;;  %v1880_v56 = vrot.slane %v5503_v18, 4  ;;  %v5505_v18 = vld [vmem:[%s5768_s15 + $0x18] sm:$0xff] }
 0x1cc   : > { %4997 = vmatmul.msk.f32.gmra.mxu0 %vm570_vm1, %v1162_v7  ;;  %5026 = vmatmul.msk.f32.gmra.mxu1 %vm570_vm1, %v1162_v7 }
 0x1d1   : > { %v6528_v53 = vpop.f32.mrf.mxu0  ;;  %v6530_v5 = vpop.f32.mrf.mxu1  ;;  %5064 = vmatmul.msk.f32.gmra.mxu2 %vm570_vm1, %v1549_v44  ;;  %5093 = vmatmul.msk.f32.gmra.mxu3 %vm570_vm1, %v1549_v44 }
 0x1d4   : > { %4998 = vmatmul.msk.f32.gmra.mxu0 %vm570_vm1, %v1164_v28  ;;  %5027 = vmatmul.msk.f32.gmra.mxu1 %vm570_vm1, %v1164_v28  ;;  %v1881_v28 = vsel %vm627_vm0, %v1879_v59, %v1880_v56  ;;  %v1884_v59 = vrot.slane %v5505_v18, 4  ;;  %v6576_v18 = vpop.f32.mrf.mxu2 }
 0x1d9   : > { %v6537_v31 = vpop.f32.mrf.mxu0  ;;  %v6539_v8 = vpop.f32.mrf.mxu1  ;;  %5065 = vmatmul.msk.f32.gmra.mxu2 %vm570_vm1, %v1548_v58  ;;  %5094 = vmatmul.msk.f32.gmra.mxu3 %vm570_vm1, %v1548_v58  ;;  %v5504_v58 = vld [vmem:[%s5768_s15 + $0x10] sm:$0xff] }
 0x1da   : > { %9371 = vst [vmem:[#allocation43_spill] sm:$0xff] %v6539_v8  ;;  %v1882_v63 = vrot.slane %v5504_v58, 4  ;;  %v5506_v58 = vld [vmem:[%s5768_s15 + $0x20] sm:$0xff] }
 0x1dc   : > { %4999 = vmatmul.msk.f32.gmra.mxu0 %vm570_vm1, %v1163_v41  ;;  %5028 = vmatmul.msk.f32.gmra.mxu1 %vm570_vm1, %v1163_v41  ;;  %v1883_v6 = vsel %vm627_vm0, %v1880_v56, %v1882_v63  ;;  %v1886_v56 = vrot.slane %v5506_v58, 4  ;;  %v6591_v30 = vpop.f32.mrf.mxu2 }
 0x1e1   : > { %v6547_v7 = vpop.f32.mrf.mxu0  ;;  %v6549_v44 = vpop.f32.mrf.mxu1 }
 0x1e2   : > { %9372 = vst [vmem:[#allocation44_spill] sm:$0xff] %v6547_v7 }
 0x1e3   : > { %9373 = vst [vmem:[#allocation45_spill] sm:$0xff] %v6549_v44  ;;  %v2350_v44 = vld [vmem:[%s9313_s3 + $0x110] sm:$0xff] }
 0x1e4   : > { %5104 = vmatmul.msk.f32.vlgmr.msra.gmra.mxu0 %vm570_vm1, %v1881_v28  ;;  %5133 = vmatmul.msk.f32.vlgmr.msra.gmra.mxu1 %vm570_vm1, %v1881_v28  ;;  %v1885_v28 = vsel %vm627_vm0, %v1882_v63, %v1884_v59  ;;  %v5507_v63 = vld [vmem:[%s5768_s15 + $0x28] sm:$0xff] }
 0x1e9   : > { %v6555_v54 = vpop.f32.mrf.mxu0  ;;  %v6557_v41 = vpop.f32.mrf.mxu1 }
 0x1ea   : > { %9374 = vst [vmem:[#allocation46_spill] sm:$0xff] %v6555_v54  ;;  %v2358_v54 = vld [vmem:[%s9313_s3 + $0x150] sm:$0xff] }
 0x1eb   : > { %9375 = vst [vmem:[#allocation47_spill] sm:$0xff] %v6557_v41 }
 0x1ec   : > { %5105 = vmatmul.msk.f32.gmra.mxu0 %vm570_vm1, %v1883_v6  ;;  %5134 = vmatmul.msk.f32.gmra.mxu1 %vm570_vm1, %v1883_v6  ;;  %v1887_v6 = vsel %vm627_vm0, %v1884_v59, %v1886_v56  ;;  %v5508_v59 = vld [vmem:[%s5768_s15 + $0x30] sm:$0xff] }
 0x1ed   : > { %v1890_v33 = vrot.slane %v5508_v59, 4  ;;  %v6605_v59 = vpop.f32.mrf.mxu3 }
 0x1f1   : > { %v6563_v60 = vpop.f32.mrf.mxu0  ;;  %v6565_v51 = vpop.f32.mrf.mxu1 }
 0x1f2   : > { %9376 = vst [vmem:[#allocation48_spill] sm:$0xff] %v6563_v60 }
 0x1f3   : > { %9377 = vst [vmem:[#allocation49_spill] sm:$0xff] %v6565_v51 }
 0x1f4   : > { %5106 = vmatmul.msk.f32.gmra.mxu0 %vm570_vm1, %v1885_v28  ;;  %5135 = vmatmul.msk.f32.gmra.mxu1 %vm570_vm1, %v1885_v28  ;;  %v1888_v28 = vrot.slane %v5507_v63, 4 }
 0x1f6   : > { %v1889_v36 = vsel %vm627_vm0, %v1886_v56, %v1888_v28  ;;  %v1891_v24 = vsel %vm627_vm0, %v1888_v28, %v1890_v33  ;;  %v5509_v56 = vld [vmem:[%s5768_s15 + $0x38] sm:$0xff]  ;;  %v5510_v28 = vld [vmem:[%s5768_s15 + $0x40] sm:$0xff] }
 0x1f9   : > { %v6571_v48 = vpop.f32.mrf.mxu0  ;;  %v6573_v45 = vpop.f32.mrf.mxu1 }
 0x1fa   : > { %9378 = vst [vmem:[#allocation50_spill] sm:$0xff] %v6571_v48 }
 0x1fb   : > { %9379 = vst [vmem:[#allocation51_spill] sm:$0xff] %v6573_v45 }
 0x1fc   : > { %5107 = vmatmul.msk.f32.gmra.mxu0 %vm570_vm1, %v1887_v6  ;;  %5136 = vmatmul.msk.f32.gmra.mxu1 %vm570_vm1, %v1887_v6 }
 0x201   : > { %v6583_v39 = vpop.f32.mrf.mxu0  ;;  %v6585_v58 = vpop.f32.mrf.mxu1 }
 0x202   : > { %9380 = vst [vmem:[#allocation52_spill] sm:$0xff] %v6583_v39 }
 0x203   : > { %9381 = vst [vmem:[#allocation53_spill] sm:$0xff] %v6585_v58  ;;  %v1892_v58 = vrot.slane %v5509_v56, 4 }
 0x204   : > { %5108 = vmatmul.msk.f32.gmra.mxu0 %vm570_vm1, %v1889_v36  ;;  %5137 = vmatmul.msk.f32.gmra.mxu1 %vm570_vm1, %v1889_v36  ;;  %v6603_v36 = vpop.f32.mrf.mxu2 }
 0x209   : > { %v6595_v6 = vpop.f32.mrf.mxu0  ;;  %v6597_v63 = vpop.f32.mrf.mxu1 }
 0x20a   : > { %9382 = vst [vmem:[#allocation54_spill] sm:$0xff] %v6595_v6  ;;  %v1893_v6 = vsel %vm627_vm0, %v1890_v33, %v1892_v58  ;;  %v5511_v33 = vld [vmem:[%s5768_s15 + $0x48] sm:$0xff] }
 0x20b   : > { %9383 = vst [vmem:[#allocation55_spill] sm:$0xff] %v6597_v63  ;;  %v1894_v63 = vrot.slane %v5510_v28, 4 }
 0x20c   : > { %5109 = vmatmul.msk.f32.gmra.mxu0 %vm570_vm1, %v1891_v24  ;;  %5138 = vmatmul.msk.f32.gmra.mxu1 %vm570_vm1, %v1891_v24  ;;  %v6620_v48 = vpop.f32.mrf.mxu2 }
 0x20d   : > { %v1895_v45 = vsel %vm627_vm0, %v1892_v58, %v1894_v63  ;;  %v5512_v58 = vld [vmem:[%s5768_s15 + $0x50] sm:$0xff] }
 0x20e   : > { %v1898_v51 = vrot.slane %v5512_v58, 4  ;;  %v2374_v58 = vld [vmem:[%s9313_s3 + $0x1d0] sm:$0xff] }
 0x20f   : > { %2564 = vmatpush.msra.mxu3 %v2374_v58 }
 0x211   : > { %v6607_v39 = vpop.f32.mrf.mxu0  ;;  %v6609_v20 = vpop.f32.mrf.mxu1 }
 0x212   : > { %9384 = vst [vmem:[#allocation56_spill] sm:$0xff] %v6607_v39  ;;  %v6622_v39 = vpop.f32.mrf.mxu3 }
 0x213   : > { %9385 = vst [vmem:[#allocation57_spill] sm:$0xff] %v6609_v20  ;;  %v1896_v20 = vrot.slane %v5511_v33, 4 }
 0x214   : > { %5110 = vmatmul.msk.f32.gmra.mxu0 %vm570_vm1, %v1893_v6  ;;  %5139 = vmatmul.msk.f32.gmra.mxu1 %vm570_vm1, %v1893_v6  ;;  %v6632_v17 = vpop.f32.mrf.mxu2 }
 0x219   : > { %v6615_v24 = vpop.f32.mrf.mxu0  ;;  %v6617_v56 = vpop.f32.mrf.mxu1 }
 0x21a   : > { %9386 = vst [vmem:[#allocation58_spill] sm:$0xff] %v6615_v24  ;;  %v1897_v24 = vsel %vm627_vm0, %v1894_v63, %v1896_v20  ;;  %v2344_v63 = vld [vmem:[%s9313_s3 + $0xe0] sm:$0xff] }
 0x21b   : > { %9387 = vst [vmem:[#allocation59_spill] sm:$0xff] %v6617_v56  ;;  %v6634_v56 = vpop.f32.mrf.mxu3 }
 0x21c   : > { %5111 = vmatmul.msk.f32.gmra.mxu0 %vm570_vm1, %v1895_v45  ;;  %5140 = vmatmul.msk.f32.gmra.mxu1 %vm570_vm1, %v1895_v45  ;;  %v2346_v45 = vld [vmem:[%s9313_s3 + $0xf0] sm:$0xff]  ;;  %v6671_v58 = vpop.f32.mrf.mxu2 }
 0x21d   : > { %2461 = vmatpush.msra.mxu2 %v2346_v45  ;;  %v2340_v45 = vld [vmem:[%s9313_s3 + $0xc0] sm:$0xff] }
 0x21f   : > { %2462 = vmatpush.msra.mxu2 %v2344_v63  ;;  %v5513_v63 = vld [vmem:[%s5768_s15 + $0x58] sm:$0xff] }
 0x221   : > { %v6627_v6 = vpop.f32.mrf.mxu0  ;;  %v6629_v28 = vpop.f32.mrf.mxu1 }
 0x222   : > { %9388 = vst [vmem:[#allocation60_spill] sm:$0xff] %v6627_v6  ;;  %v1899_v6 = vsel %vm627_vm0, %v1896_v20, %v1898_v51  ;;  %v2372_v20 = vld [vmem:[%s9313_s3 + $0x1c0] sm:$0xff] }
 0x223   : > { %9389 = vst [vmem:[#allocation61_spill] sm:$0xff] %v6629_v28  ;;  %2565 = vmatpush.msra.mxu3 %v2372_v20  ;;  %v2368_v20 = vld [vmem:[%s9313_s3 + $0x1a0] sm:$0xff] }
 0x224   : > { %5112 = vmatmul.msk.f32.gmra.mxu0 %vm570_vm1, %v1897_v24  ;;  %5141 = vmatmul.msk.f32.gmra.mxu1 %vm570_vm1, %v1897_v24  ;;  %v2342_v24 = vld [vmem:[%s9313_s3 + $0xd0] sm:$0xff] }
 0x225   : > { %2463 = vmatpush.msra.mxu2 %v2342_v24  ;;  %v2338_v24 = vld [vmem:[%s9313_s3 + $0xb0] sm:$0xff] }
 0x227   : > { %2464 = vmatpush.msra.mxu2 %v2340_v45  ;;  %v2336_v45 = vld [vmem:[%s9313_s3 + $0xa0] sm:$0xff] }
 0x229   : > { %v6645_v33 = vpop.f32.mrf.mxu0  ;;  %v6647_v28 = vpop.f32.mrf.mxu1  ;;  %2465 = vmatpush.msra.mxu2 %v2338_v24  ;;  %v2334_v24 = vld [vmem:[%s9313_s3 + $0x90] sm:$0xff] }
 0x22a   : > { %9390 = vst [vmem:[#allocation62_spill] sm:$0xff] %v6645_v33  ;;  %v6673_v33 = vpop.f32.mrf.mxu3 }
 0x22b   : > { %9391 = vst [vmem:[#allocation63_spill] sm:$0xff] %v6647_v28  ;;  %v1900_v28 = vrot.slane %v5513_v63, 4  ;;  %2466 = vmatpush.msra.mxu2 %v2336_v45  ;;  %v2364_v45 = vld [vmem:[%s9313_s3 + $0x180] sm:$0xff] }
 0x22c   : > { %5113 = vmatmul.msk.f32.gmra.mxu0 %vm570_vm1, %v1899_v6  ;;  %5142 = vmatmul.msk.f32.gmra.mxu1 %vm570_vm1, %v1899_v6  ;;  %v2370_v6 = vld [vmem:[%s9313_s3 + $0x1b0] sm:$0xff] }
 0x22d   : > { %2566 = vmatpush.msra.mxu3 %v2370_v6  ;;  %v1901_v46 = vsel %vm627_vm0, %v1898_v51, %v1900_v28  ;;  %v2366_v6 = vld [vmem:[%s9313_s3 + $0x190] sm:$0xff]  ;;  %2467 = vmatpush.msra.mxu2 %v2334_v24  ;;  %v2332_v51 = vld [vmem:[%s9313_s3 + $0x80] sm:$0xff] }
 0x22e   : > { %v2330_v24 = vld [vmem:[%s9313_s3 + $0x70] sm:$0xff] }
 0x22f   : > { %2567 = vmatpush.msra.mxu3 %v2368_v20  ;;  %v5514_v20 = vld [vmem:[%s5768_s15 + $0x60] sm:$0xff]  ;;  %2468 = vmatpush.msra.mxu2 %v2332_v51 }
 0x230   : > { %v2328_v51 = vld [vmem:[%s9313_s3 + $0x60] sm:$0xff] }
 0x231   : > { %v6681_v63 = vpop.f32.mrf.mxu0  ;;  %v6683_v60 = vpop.f32.mrf.mxu1  ;;  %2568 = vmatpush.msra.mxu3 %v2366_v6  ;;  %2469 = vmatpush.msra.mxu2 %v2330_v24 }
 0x232   : > { %9392 = vst [vmem:[#allocation64_spill] sm:$0xff] %v6681_v63  ;;  %v6707_v6 = vpop.f32.mrf.mxu2  ;;  %v6709_v63 = vpop.f32.mrf.mxu3 }
 0x233   : > { %9393 = vst [vmem:[#allocation65_spill] sm:$0xff] %v6683_v60  ;;  %v1902_v60 = vrot.slane %v5514_v20, 4  ;;  %2569 = vmatpush.msra.mxu3 %v2364_v45  ;;  %v2360_v45 = vld [vmem:[%s9313_s3 + $0x160] sm:$0xff]  ;;  %2470 = vmatpush.msra.mxu2 %v2328_v51 }
 0x234   : > { %5114 = vmatmul.msk.f32.gmra.mxu0 %vm570_vm1, %v1901_v46  ;;  %5143 = vmatmul.msk.f32.gmra.mxu1 %vm570_vm1, %v1901_v46  ;;  %v2362_v46 = vld [vmem:[%s9313_s3 + $0x170] sm:$0xff]  ;;  %v2356_v51 = vld [vmem:[%s9313_s3 + $0x140] sm:$0xff] }
 0x235   : > { %2570 = vmatpush.msra.mxu3 %v2362_v46  ;;  %v1903_v24 = vsel %vm627_vm0, %v1900_v28, %v1902_v60  ;;  %v2326_v46 = vld [vmem:[%s9313_s3 + $0x50] sm:$0xff]  ;;  %v2324_v28 = vld [vmem:[%s9313_s3 + $0x40] sm:$0xff] }
 0x236   : > { %2471 = vmatpush.msra.mxu2 %v2326_v46  ;;  %v2320_v46 = vld [vmem:[%s9313_s3 + $0x20] sm:$0xff] }
 0x237   : > { %2571 = vmatpush.msra.mxu3 %v2360_v45  ;;  %v5515_v45 = vld [vmem:[%s5768_s15 + $0x68] sm:$0xff] }
 0x238   : > { %2472 = vmatpush.msra.mxu2 %v2324_v28 }
 0x239   : > { %v6717_v20 = vpop.f32.mrf.mxu0  ;;  %v6719_v41 = vpop.f32.mrf.mxu1  ;;  %2572 = vmatpush.msra.mxu3 %v2358_v54  ;;  %v2322_v54 = vld [vmem:[%s9313_s3 + $0x30] sm:$0xff] }
 0x23a   : > { %9394 = vst [vmem:[#allocation66_spill] sm:$0xff] %v6717_v20  ;;  %2473 = vmatpush.msra.mxu2 %v2322_v54  ;;  %v6754_v29 = vpop.f32.mrf.mxu2  ;;  %v6756_v54 = vpop.f32.mrf.mxu3 }
 0x23b   : > { %9395 = vst [vmem:[#allocation67_spill] sm:$0xff] %v6719_v41  ;;  %v1904_v41 = vrot.slane %v5515_v45, 4  ;;  %2573 = vmatpush.msra.mxu3 %v2356_v51  ;;  %v2352_v45 = vld [vmem:[%s9313_s3 + $0x120] sm:$0xff] }
 0x23c   : > { %5115 = vmatmul.msk.f32.gmra.mxu0 %vm570_vm1, %v1903_v24  ;;  %5144 = vmatmul.msk.f32.gmra.mxu1 %vm570_vm1, %v1903_v24  ;;  %v2354_v24 = vld [vmem:[%s9313_s3 + $0x130] sm:$0xff]  ;;  %9398 = vst [vmem:[#allocation70_spill] sm:$0xff] %v6754_v29 }
 0x23d   : > { %2574 = vmatpush.msra.mxu3 %v2354_v24  ;;  %v1905_v20 = vsel %vm627_vm0, %v1902_v60, %v1904_v41  ;;  %2474 = vmatpush.msra.mxu2 %v2320_v46  ;;  %9399 = vst [vmem:[#allocation71_spill] sm:$0xff] %v6756_v54  ;;  %v2318_v24 = vld [vmem:[%s9313_s3 + $0x10] sm:$0xff]  ;;  %v2316_v60 = vld [vmem:[%s9313_s3] sm:$0xff]  ;;  %v1908_v54 = vrot.slane %v5517_v16, 4 }
 0x23e   : > { %v2348_v46 = vld [vmem:[%s9313_s3 + $0x100] sm:$0xff] }
 0x23f   : > { %2575 = vmatpush.msra.mxu3 %v2352_v45  ;;  %2475 = vmatpush.msra.mxu2 %v2318_v24  ;;  %v5516_v45 = vld [vmem:[%s5768_s15 + $0x70] sm:$0xff] }
 0x241   : > { %v6749_v28 = vpop.f32.mrf.mxu0  ;;  %v6751_v51 = vpop.f32.mrf.mxu1  ;;  %2576 = vmatpush.msra.mxu3 %v2350_v44  ;;  %2476 = vmatpush.msra.mxu2 %v2316_v60 }
 0x242   : > { %9396 = vst [vmem:[#allocation68_spill] sm:$0xff] %v6749_v28  ;;  %v6780_v7 = vpop.f32.mrf.mxu3 }
 0x243   : > { %9397 = vst [vmem:[#allocation69_spill] sm:$0xff] %v6751_v51  ;;  %v1906_v51 = vrot.slane %v5516_v45, 4  ;;  %2577 = vmatpush.msra.mxu3 %v2348_v46 }
 0x244   : > { %5116 = vmatmul.msk.f32.gmra.mxu0 %vm570_vm1, %v1905_v20  ;;  %5145 = vmatmul.msk.f32.gmra.mxu1 %vm570_vm1, %v1905_v20  ;;  %v6778_v20 = vpop.f32.mrf.mxu2  ;;  %9403 = vst [vmem:[#allocation75_spill] sm:$0xff] %v6780_v7 }
 0x245   : > { %v1907_v28 = vsel %vm627_vm0, %v1904_v41, %v1906_v51  ;;  %9402 = vst [vmem:[#allocation74_spill] sm:$0xff] %v6778_v20  ;;  %v1909_v45 = vsel %vm627_vm0, %v1906_v51, %v1908_v54  ;;  %v5518_v41 = vld [vmem:[%s5768_s15 + $0x80] sm:$0xff] }
 0x246   : > { %v2254_v51 = vld [vmem:[%s9312_s2] sm:$0x3] }
 0x249   : > { %v6773_v24 = vpop.f32.mrf.mxu0  ;;  %v6775_v44 = vpop.f32.mrf.mxu1 }
 0x24a   : > { %9400 = vst [vmem:[#allocation72_spill] sm:$0xff] %v6773_v24  ;;  %v6795_v7 = vpop.f32.mrf.mxu3 }
 0x24b   : > { %9401 = vst [vmem:[#allocation73_spill] sm:$0xff] %v6775_v44  ;;  %v1910_v44 = vrot.slane %v5518_v41, 4 }
 0x24c   : > { %5117 = vmatmul.msk.f32.gmra.mxu0 %vm570_vm1, %v1907_v28  ;;  %5146 = vmatmul.msk.f32.gmra.mxu1 %vm570_vm1, %v1907_v28  ;;  %v6793_v24 = vpop.f32.mrf.mxu2  ;;  %9407 = vst [vmem:[#allocation79_spill] sm:$0xff] %v6795_v7 }
 0x24d   : > { %9406 = vst [vmem:[#allocation78_spill] sm:$0xff] %v6793_v24 }
 0x251   : > { %v6785_v60 = vpop.f32.mrf.mxu0  ;;  %v6787_v46 = vpop.f32.mrf.mxu1 }
 0x252   : > { %9404 = vst [vmem:[#allocation76_spill] sm:$0xff] %v6785_v60  ;;  %v1911_v60 = vsel %vm627_vm0, %v1908_v54, %v1910_v44  ;;  %v6810_v7 = vpop.f32.mrf.mxu3 }
 0x253   : > { %9405 = vst [vmem:[#allocation77_spill] sm:$0xff] %v6787_v46 }
 0x254   : > { %5118 = vmatmul.msk.f32.gmra.mxu0 %vm570_vm1, %v1909_v45  ;;  %5147 = vmatmul.msk.f32.gmra.mxu1 %vm570_vm1, %v1909_v45  ;;  %v5519_v45 = vld [vmem:[%s5768_s15 + $0x88] sm:$0xff]  ;;  %v6808_v46 = vpop.f32.mrf.mxu2  ;;  %9411 = vst [vmem:[#allocation83_spill] sm:$0xff] %v6810_v7 }
 0x255   : > { %v1912_v41 = vrot.slane %v5519_v45, 4  ;;  %9410 = vst [vmem:[#allocation82_spill] sm:$0xff] %v6808_v46 }
 0x257   : > { %v1913_v20 = vsel %vm627_vm0, %v1910_v44, %v1912_v41 }
 0x259   : > { %v6797_v28 = vpop.f32.mrf.mxu0  ;;  %v6799_v16 = vpop.f32.mrf.mxu1 }
 0x25a   : > { %9408 = vst [vmem:[#allocation80_spill] sm:$0xff] %v6797_v28  ;;  %v6812_v28 = vperm.slane %v2254_v51, 0 }
 0x25b   : > { %9409 = vst [vmem:[#allocation81_spill] sm:$0xff] %v6799_v16  ;;  %v6814_v16 = vperm.slane %v2254_v51, 1  ;;  %v5520_v51 = vld [vmem:[%s5768_s15 + $0x90] sm:$0xff] }
 0x25c   : > { %5119 = vmatmul.msk.f32.gmra.mxu0 %vm570_vm1, %v1911_v60  ;;  %5148 = vmatmul.msk.f32.gmra.mxu1 %vm570_vm1, %v1911_v60  ;;  %v1914_v7 = vrot.slane %v5520_v51, 4  ;;  %v6832_v44 = vpop.f32.mrf.mxu2 }
 0x25d   : > { %9412 = vst [vmem:[#allocation84_spill] sm:$0xff] %v6832_v44 }
 0x261   : > { %v2013_v54 = vpop.f32.mrf.mxu0  ;;  %v2114_v24 = vpop.f32.mrf.mxu1 }
 0x262   : > { %v2198_v60 = vadd.f32 %v2013_v54, %v6382_v61  ;;  %v2199_v29 = vadd.f32 %v2114_v24, %v6384_v47  ;;  %v1915_v24 = vsel %vm627_vm0, %v1912_v41, %v1914_v7  ;;  %v5521_v41 = vld [vmem:[%s5768_s15 + $0x98] sm:$0xff] }
 0x263   : > { %v1916_v46 = vrot.slane %v5521_v41, 4 }
 0x264   : > { %v6820_v8 = vadd.f32 %v6812_v28, %v2198_v60  ;;  %v6823_v45 = vadd.f32 %v6814_v16, %v2199_v29  ;;  %5120 = vmatmul.msk.f32.gmra.mxu0 %vm570_vm1, %v1913_v20  ;;  %5149 = vmatmul.msk.f32.gmra.mxu1 %vm570_vm1, %v1913_v20  ;;  %v6834_v29 = vpop.f32.mrf.mxu3 }
 0x265   : > { %9413 = vst [vmem:[#allocation85_spill] sm:$0xff] %v6834_v29 }
 0x266   : > { %2477 = vmatmul.f32.vlgmr.msra.gmra.mxu2 %v6820_v8  ;;  %5161 = vmatmul.msk.f32.vlgmr.msra.gmra.mxu3 %vm2376_vm5, %v6823_v45 }
 0x269   : > { %v2016_v61 = vpop.f32.mrf.mxu0  ;;  %v2117_v47 = vpop.f32.mrf.mxu1 }
 0x26a   : > { %v2200_v54 = vadd.f32 %v2016_v61, %v6396_v32  ;;  %v2201_v20 = vadd.f32 %v2117_v47, %v6398_v26  ;;  %v1917_v61 = vsel %vm627_vm0, %v1914_v7, %v1916_v46  ;;  %v5522_v7 = vld [vmem:[%s5768_s15 + $0xa0] sm:$0xff] }
 0x26b   : > { %v1918_v44 = vrot.slane %v5522_v7, 4 }
 0x26c   : > { %v6839_v60 = vadd.f32 %v6812_v28, %v2200_v54  ;;  %v6842_v51 = vadd.f32 %v6814_v16, %v2201_v20  ;;  %5121 = vmatmul.msk.f32.gmra.mxu0 %vm570_vm1, %v1915_v24  ;;  %5150 = vmatmul.msk.f32.gmra.mxu1 %vm570_vm1, %v1915_v24  ;;  %v6853_v20 = vpop.f32.mrf.mxu2  ;;  %v6855_v29 = vpop.f32.mrf.mxu3 }
 0x26d   : > { %9414 = vst [vmem:[#allocation86_spill] sm:$0xff] %v6855_v29 }
 0x26e   : > { %2480 = vmatmul.f32.gmra.mxu2 %v6839_v60  ;;  %5162 = vmatmul.msk.f32.gmra.mxu3 %vm2376_vm5, %v6842_v51 }
 0x271   : > { %v2019_v32 = vpop.f32.mrf.mxu0  ;;  %v2120_v26 = vpop.f32.mrf.mxu1 }
 0x272   : > { %v2202_v47 = vadd.f32 %v2019_v32, %v6410_v11  ;;  %v2203_v54 = vadd.f32 %v2120_v26, %v6412_v4  ;;  %v1919_v32 = vsel %vm627_vm0, %v1916_v46, %v1918_v44  ;;  %v5523_v46 = vld [vmem:[%s5768_s15 + $0xa8] sm:$0xff] }
 0x274   : > { %v6858_v24 = vadd.f32 %v6812_v28, %v2202_v47  ;;  %v6861_v41 = vadd.f32 %v6814_v16, %v2203_v54  ;;  %5122 = vmatmul.msk.f32.gmra.mxu0 %vm570_vm1, %v1917_v61  ;;  %5151 = vmatmul.msk.f32.gmra.mxu1 %vm570_vm1, %v1917_v61  ;;  %v1437_v54 = vadd.f32 %v6430_v40, %v6024_v62 }
 0x275   : > { %v1438_v61 = vadd.f32 %v6432_v49, %v6026_v0 }
 0x276   : > { %2483 = vmatmul.f32.gmra.mxu2 %v6858_v24  ;;  %5163 = vmatmul.msk.f32.gmra.mxu3 %vm2376_vm5, %v6861_v41  ;;  %v1822_v62 = vadd.f32 %v6576_v18, %v1437_v54  ;;  %v5524_v18 = vld [vmem:[%s5768_s15 + $0xb0] sm:$0xff] }
 0x277   : > { %v1823_v0 = vadd.f32 %v6578_v42, %v1438_v61  ;;  %v2347_v42 = vld [vmem:[%s9313_s3 + $0xf8] sm:$0xff] }
 0x278   : > { %2663 = vmatpush.msrb.mxu0 %v2347_v42  ;;  %v2343_v61 = vld [vmem:[%s9313_s3 + $0xd8] sm:$0xff] }
 0x279   : > { %v2022_v11 = vpop.f32.mrf.mxu0  ;;  %v2123_v4 = vpop.f32.mrf.mxu1  ;;  %v2339_v42 = vld [vmem:[%s9313_s3 + $0xb8] sm:$0xff] }
 0x27a   : > { %v2204_v26 = vadd.f32 %v2022_v11, %v6424_v22  ;;  %v2205_v47 = vadd.f32 %v2123_v4, %v6426_v23  ;;  %v1920_v22 = vrot.slane %v5523_v46, 4  ;;  %v6885_v11 = vpop.f32.mrf.mxu2  ;;  %v6887_v23 = vpop.f32.mrf.mxu3  ;;  %v1440_v46 = vadd.f32 %v6444_v25, %v6041_v13 }
 0x27b   : > { %9415 = vst [vmem:[#allocation87_spill] sm:$0xff] %v6885_v11 }
 0x27c   : > { %v6877_v7 = vadd.f32 %v6812_v28, %v2204_v26  ;;  %v6880_v29 = vadd.f32 %v6814_v16, %v2205_v47  ;;  %5123 = vmatmul.msk.f32.gmra.mxu0 %vm570_vm1, %v1919_v32  ;;  %5152 = vmatmul.msk.f32.gmra.mxu1 %vm570_vm1, %v1919_v32  ;;  %9416 = vst [vmem:[#allocation88_spill] sm:$0xff] %v6887_v23 }
 0x27d   : > { %v1921_v4 = vsel %vm627_vm0, %v1918_v44, %v1920_v22  ;;  %v1439_v47 = vadd.f32 %v6442_v57, %v6039_v12  ;;  %v1922_v44 = vrot.slane %v5524_v18, 4  ;;  %v2345_v12 = vld [vmem:[%s9313_s3 + $0xe8] sm:$0xff]  ;;  %v1825_v57 = vadd.f32 %v6593_v27, %v1440_v46 }
 0x27e   : > { %2486 = vmatmul.f32.gmra.mxu2 %v6877_v7  ;;  %5164 = vmatmul.msk.f32.gmra.mxu3 %vm2376_vm5, %v6880_v29  ;;  %v2369_v18 = vld [vmem:[%s9313_s3 + $0x1a8] sm:$0xff] }
 0x27f   : > { %2664 = vmatpush.msrb.mxu0 %v2345_v12  ;;  %v1824_v13 = vadd.f32 %v6591_v30, %v1439_v47 }
 0x281   : > { %v2025_v40 = vpop.f32.mrf.mxu0  ;;  %v2126_v49 = vpop.f32.mrf.mxu1  ;;  %2665 = vmatpush.msrb.mxu0 %v2343_v61  ;;  %v2367_v61 = vld [vmem:[%s9313_s3 + $0x198] sm:$0xff] }
 0x282   : > { %v2206_v32 = vadd.f32 %v2025_v40, %v1822_v62  ;;  %v2207_v26 = vadd.f32 %v2126_v49, %v1823_v0  ;;  %v6919_v25 = vpop.f32.mrf.mxu2  ;;  %v6921_v54 = vpop.f32.mrf.mxu3  ;;  %v2375_v62 = vld [vmem:[%s9313_s3 + $0x1d8] sm:$0xff]  ;;  %v1923_v49 = vsel %vm627_vm0, %v1920_v22, %v1922_v44  ;;  %v1442_v22 = vadd.f32 %v6464_v9, %v6064_v38  ;;  %v2337_v9 = vld [vmem:[%s9313_s3 + $0xa8] sm:$0xff] }
 0x283   : > { %2766 = vmatpush.msrb.mxu1 %v2375_v62 }
 0x284   : > { %v6900_v23 = vadd.f32 %v6812_v28, %v2206_v32  ;;  %v6903_v11 = vadd.f32 %v6814_v16, %v2207_v26  ;;  %5124 = vmatmul.msk.f32.gmra.mxu0 %vm570_vm1, %v1921_v4  ;;  %5153 = vmatmul.msk.f32.gmra.mxu1 %vm570_vm1, %v1921_v4  ;;  %v2341_v4 = vld [vmem:[%s9313_s3 + $0xc8] sm:$0xff]  ;;  %v1441_v26 = vadd.f32 %v6462_v14, %v6062_v34  ;;  %v2371_v34 = vld [vmem:[%s9313_s3 + $0x1b8] sm:$0xff] }
 0x285   : > { %v2373_v32 = vld [vmem:[%s9313_s3 + $0x1c8] sm:$0xff]  ;;  %2666 = vmatpush.msrb.mxu0 %v2341_v4  ;;  %v5525_v14 = vld [vmem:[%s5768_s15 + $0xb8] sm:$0xff] }
 0x286   : > { %2489 = vmatmul.f32.gmra.mxu2 %v6900_v23  ;;  %5165 = vmatmul.msk.f32.gmra.mxu3 %vm2376_vm5, %v6903_v11  ;;  %v1924_v38 = vrot.slane %v5525_v14, 4  ;;  %v1826_v12 = vadd.f32 %v6603_v36, %v1441_v26  ;;  %v2365_v4 = vld [vmem:[%s9313_s3 + $0x188] sm:$0xff] }
 0x287   : > { %2767 = vmatpush.msrb.mxu1 %v2373_v32  ;;  %2667 = vmatpush.msrb.mxu0 %v2339_v42  ;;  %v1444_v32 = vadd.f32 %v6476_v50, %v6093_v3  ;;  %v2331_v42 = vld [vmem:[%s9313_s3 + $0x78] sm:$0xff]  ;;  %v2329_v50 = vld [vmem:[%s9313_s3 + $0x68] sm:$0xff] }
 0x289   : > { %v2028_v0 = vpop.f32.mrf.mxu0  ;;  %v2129_v40 = vpop.f32.mrf.mxu1  ;;  %2768 = vmatpush.msrb.mxu1 %v2371_v34  ;;  %2668 = vmatpush.msrb.mxu0 %v2337_v9  ;;  %v2361_v34 = vld [vmem:[%s9313_s3 + $0x168] sm:$0xff]  ;;  %v1829_v9 = vadd.f32 %v6622_v39, %v1444_v32 }
 0x28a   : > { %v2208_v27 = vadd.f32 %v2028_v0, %v1824_v13  ;;  %v2209_v30 = vadd.f32 %v2129_v40, %v1825_v57  ;;  %v1827_v13 = vadd.f32 %v6605_v59, %v1442_v22  ;;  %v2335_v57 = vld [vmem:[%s9313_s3 + $0x98] sm:$0xff]  ;;  %v1925_v40 = vsel %vm627_vm0, %v1922_v44, %v1924_v38  ;;  %v6975_v36 = vpop.f32.mrf.mxu3  ;;  %v2325_v39 = vld [vmem:[%s9313_s3 + $0x48] sm:$0xff] }
 0x28b   : > { %2769 = vmatpush.msrb.mxu1 %v2369_v18  ;;  %2669 = vmatpush.msrb.mxu0 %v2335_v57  ;;  %v1443_v44 = vadd.f32 %v6474_v2, %v6091_v1  ;;  %v2363_v1 = vld [vmem:[%s9313_s3 + $0x178] sm:$0xff]  ;;  %v5526_v2 = vld [vmem:[%s5768_s15 + $0xc0] sm:$0xff]  ;;  %v2353_v32 = vld [vmem:[%s9313_s3 + $0x128] sm:$0xff] }
 0x28c   : > { %v6941_v47 = vadd.f32 %v6812_v28, %v2208_v27  ;;  %v6944_v46 = vadd.f32 %v6814_v16, %v2209_v30  ;;  %5125 = vmatmul.msk.f32.gmra.mxu0 %vm570_vm1, %v1923_v49  ;;  %5154 = vmatmul.msk.f32.gmra.mxu1 %vm570_vm1, %v1923_v49  ;;  %v6973_v49 = vpop.f32.mrf.mxu2  ;;  %v2333_v30 = vld [vmem:[%s9313_s3 + $0x88] sm:$0xff]  ;;  %v1926_v3 = vrot.slane %v5526_v2, 4  ;;  %v2327_v18 = vld [vmem:[%s9313_s3 + $0x58] sm:$0xff] }
 0x28d   : > { %2770 = vmatpush.msrb.mxu1 %v2367_v61  ;;  %2670 = vmatpush.msrb.mxu0 %v2333_v30  ;;  %v1828_v14 = vadd.f32 %v6620_v48, %v1443_v44  ;;  %v2357_v48 = vld [vmem:[%s9313_s3 + $0x148] sm:$0xff]  ;;  %v2319_v2 = vld [vmem:[%s9313_s3 + $0x18] sm:$0xff] }
 0x28e   : > { %2492 = vmatmul.f32.gmra.mxu2 %v6941_v47  ;;  %5166 = vmatmul.msk.f32.gmra.mxu3 %vm2376_vm5, %v6944_v46  ;;  %v1927_v61 = vsel %vm627_vm0, %v1924_v38, %v1926_v3  ;;  %v1446_v38 = vadd.f32 %v6500_v37, %v6138_v55  ;;  %v2355_v55 = vld [vmem:[%s9313_s3 + $0x138] sm:$0xff]  ;;  %v2321_v44 = vld [vmem:[%s9313_s3 + $0x28] sm:$0xff] }
 0x28f   : > { %2771 = vmatpush.msrb.mxu1 %v2365_v4  ;;  %2671 = vmatpush.msrb.mxu0 %v2331_v42 }
 0x291   : > { %v2031_v62 = vpop.f32.mrf.mxu0  ;;  %v2132_v0 = vpop.f32.mrf.mxu1  ;;  %2772 = vmatpush.msrb.mxu1 %v2363_v1  ;;  %2672 = vmatpush.msrb.mxu0 %v2329_v50  ;;  %v1831_v1 = vadd.f32 %v6634_v56, %v1446_v38  ;;  %v2351_v50 = vld [vmem:[%s9313_s3 + $0x118] sm:$0xff]  ;;  %v2349_v56 = vld [vmem:[%s9313_s3 + $0x108] sm:$0xff] }
 0x292   : > { %v2210_v59 = vadd.f32 %v2031_v62, %v1826_v12  ;;  %v2211_v27 = vadd.f32 %v2132_v0, %v1827_v13  ;;  %v2359_v12 = vld [vmem:[%s9313_s3 + $0x158] sm:$0xff] }
 0x293   : > { %2773 = vmatpush.msrb.mxu1 %v2361_v34  ;;  %2673 = vmatpush.msrb.mxu0 %v2327_v18 }
 0x294   : > { %v6988_v26 = vadd.f32 %v6812_v28, %v2210_v59  ;;  %v6991_v22 = vadd.f32 %v6814_v16, %v2211_v27  ;;  %5126 = vmatmul.msk.f32.gmra.mxu0 %vm570_vm1, %v1925_v40  ;;  %5155 = vmatmul.msk.f32.gmra.mxu1 %vm570_vm1, %v1925_v40  ;;  %v1445_v40 = vadd.f32 %v6498_v35, %v6136_v52  ;;  %v7030_v59 = vpop.f32.mrf.mxu2  ;;  %v7032_v27 = vpop.f32.mrf.mxu3  ;;  %v2323_v52 = vld [vmem:[%s9313_s3 + $0x38] sm:$0xff]  ;;  %v5527_v35 = vld [vmem:[%s5768_s15 + $0xc8] sm:$0xff] }
 0x295   : > { %2774 = vmatpush.msrb.mxu1 %v2359_v12  ;;  %2674 = vmatpush.msrb.mxu0 %v2325_v39  ;;  %v1928_v37 = vrot.slane %v5527_v35, 4  ;;  %v9417_v35 = vld [vmem:[#allocation8_spill] sm:$0xff] }
 0x296   : > { %2495 = vmatmul.f32.gmra.mxu2 %v6988_v26  ;;  %5167 = vmatmul.msk.f32.gmra.mxu3 %vm2376_vm5, %v6991_v22  ;;  %v1830_v42 = vadd.f32 %v6632_v17, %v1445_v40  ;;  %v2317_v17 = vld [vmem:[%s9313_s3 + $0x8] sm:$0xff] }
 0x297   : > { %2775 = vmatpush.msrb.mxu1 %v2357_v48  ;;  %2675 = vmatpush.msrb.mxu0 %v2323_v52 }
 0x299   : > { %v2034_v13 = vpop.f32.mrf.mxu0  ;;  %v2135_v57 = vpop.f32.mrf.mxu1  ;;  %2776 = vmatpush.msrb.mxu1 %v2355_v55  ;;  %2676 = vmatpush.msrb.mxu0 %v2321_v44  ;;  %v1449_v55 = vadd.f32 %v6528_v53, %v6163_v43  ;;  %v1450_v44 = vadd.f32 %v6530_v5, %v9417_v35  ;;  %v9425_v35 = vld [vmem:[#allocation12_spill] sm:$0xff] }
 0x29a   : > { %v2212_v62 = vadd.f32 %v2034_v13, %v1828_v14  ;;  %v2213_v0 = vadd.f32 %v2135_v57, %v1829_v9  ;;  %v1929_v9 = vsel %vm627_vm0, %v1926_v3, %v1928_v37  ;;  %v1447_v13 = vadd.f32 %v6516_v10, %v6151_v15 }
 0x29b   : > { %2777 = vmatpush.msrb.mxu1 %v2353_v32  ;;  %2677 = vmatpush.msrb.mxu0 %v2319_v2  ;;  %v1448_v3 = vadd.f32 %v6518_v21, %v6153_v19  ;;  %v1834_v43 = vadd.f32 %v6707_v6, %v1449_v55  ;;  %v1835_v53 = vadd.f32 %v6709_v63, %v1450_v44  ;;  %v9426_v44 = vld [vmem:[#allocation45_spill] sm:$0xff] }
 0x29c   : > { %v7035_v30 = vadd.f32 %v6812_v28, %v2212_v62  ;;  %v7038_v4 = vadd.f32 %v6814_v16, %v2213_v0  ;;  %5127 = vmatmul.msk.f32.gmra.mxu0 %vm570_vm1, %v1927_v61  ;;  %5156 = vmatmul.msk.f32.gmra.mxu1 %vm570_vm1, %v1927_v61  ;;  %v5528_v62 = vld [vmem:[%s5768_s15 + $0xd0] sm:$0xff]  ;;  %v7086_v39 = vpop.f32.mrf.mxu2  ;;  %v7088_v15 = vpop.f32.mrf.mxu3  ;;  %v1832_v19 = vadd.f32 %v6671_v58, %v1447_v13  ;;  %v9421_v13 = vld [vmem:[#allocation70_spill] sm:$0xff] }
 0x29d   : > { %2778 = vmatpush.msrb.mxu1 %v2351_v50  ;;  %2678 = vmatpush.msrb.mxu0 %v2317_v17  ;;  %v1930_v0 = vrot.slane %v5528_v62, 4  ;;  %v1833_v10 = vadd.f32 %v6673_v33, %v1448_v3  ;;  %v5529_v33 = vld [vmem:[%s5768_s15 + $0xd8] sm:$0xff]  ;;  %v9420_v17 = vld [vmem:[#allocation43_spill] sm:$0xff]  ;;  %s432_s15 = sand.u32 1, %s5584_s26  }
 0x29e   : > { %2498 = vmatmul.f32.gmra.mxu2 %v7035_v30  ;;  %5168 = vmatmul.msk.f32.gmra.mxu3 %vm2376_vm5, %v7038_v4  ;;  %v1932_v58 = vrot.slane %v5529_v33, 4  ;;  %v9422_v3 = vld [vmem:[#allocation71_spill] sm:$0xff]  ;;  %v1454_v33 = vadd.f32 %v9426_v44, %v9425_v35  ;;  %s4837_s22 = sshll.u32 %s432_s15, 3  ;;  %s4759_s24 = scalar_lea.sflag [#allocation3], %s432_s15 }
 0x29f   : > { %2779 = vmatpush.msrb.mxu1 %v2349_v56  ;;  %v1931_v40 = vsel %vm627_vm0, %v1928_v37, %v1930_v0  ;;  %s434_s14 = scalar_lea.vmem [#allocation2], %s4837_s22 }
 0x2a0   : > { %v1933_v50 = vsel %vm627_vm0, %v1930_v0, %v1932_v58  ;;  %s4771_s21 = sshll.u32 %s434_s14, 4  ;;  %s4772_s21 = int_to_ptr.vmem [resolvable:$true] %s4771_s21 }
 0x2a1   : > { %v2037_v34 = vpop.f32.mrf.mxu0  ;;  %v2138_v14 = vpop.f32.mrf.mxu1 }
 0x2a2   : > { %v2214_v18 = vadd.f32 %v2037_v34, %v1830_v42  ;;  %v2215_v12 = vadd.f32 %v2138_v14, %v1831_v1 }
 0x2a4   : > { %v7078_v57 = vadd.f32 %v6812_v28, %v2214_v18  ;;  %v7081_v61 = vadd.f32 %v6814_v16, %v2215_v12  ;;  %5128 = vmatmul.msk.f32.gmra.mxu0 %vm570_vm1, %v1929_v9  ;;  %5157 = vmatmul.msk.f32.gmra.mxu1 %vm570_vm1, %v1929_v9  ;;  %v7114_v5 = vpop.f32.mrf.mxu2  ;;  %v7116_v37 = vpop.f32.mrf.mxu3  ;;  %v9418_v9 = vld [vmem:[#allocation9_spill] sm:$0xff]  ;;  %v9419_v12 = vld [vmem:[#allocation10_spill] sm:$0xff] }
 0x2a5   : > { %v1451_v18 = vadd.f32 %v6537_v31, %v9418_v9  ;;  %v1452_v56 = vadd.f32 %v9420_v17, %v9419_v12  ;;  %v9429_v17 = vld [vmem:[#allocation13_spill] sm:$0xff] }
 0x2a6   : > { %2501 = vmatmul.f32.gmra.mxu2 %v7078_v57  ;;  %5169 = vmatmul.msk.f32.gmra.mxu3 %vm2376_vm5, %v7081_v61 }
 0x2a7   : > { %v1836_v31 = vadd.f32 %v9421_v13, %v1451_v18  ;;  %v1837_v62 = vadd.f32 %v9422_v3, %v1452_v56  ;;  %v9430_v56 = vld [vmem:[#allocation46_spill] sm:$0xff]  ;;  %v9432_v3 = vld [vmem:[#allocation47_spill] sm:$0xff] }
 0x2a8   : > { %v1455_v13 = vadd.f32 %v9430_v56, %v9429_v17  ;;  %v9439_v56 = vld [vmem:[#allocation82_spill] sm:$0xff] }
 0x2a9   : > { %v2040_v21 = vpop.f32.mrf.mxu0  ;;  %v2141_v48 = vpop.f32.mrf.mxu1 }
 0x2aa   : > { %v2216_v38 = vadd.f32 %v2040_v21, %v1832_v19  ;;  %v2217_v52 = vadd.f32 %v2141_v48, %v1833_v10 }
 0x2ac   : > { %v7101_v32 = vadd.f32 %v6812_v28, %v2216_v38  ;;  %v7104_v42 = vadd.f32 %v6814_v16, %v2217_v52  ;;  %5129 = vmatmul.msk.f32.gmra.mxu0 %vm570_vm1, %v1931_v40  ;;  %5158 = vmatmul.msk.f32.gmra.mxu1 %vm570_vm1, %v1931_v40  ;;  %v7136_v10 = vpop.f32.mrf.mxu2  ;;  %v7138_v21 = vpop.f32.mrf.mxu3  ;;  %v9423_v38 = vld [vmem:[#allocation11_spill] sm:$0xff]  ;;  %v9424_v52 = vld [vmem:[#allocation44_spill] sm:$0xff] }
 0x2ad   : > { %v1453_v55 = vadd.f32 %v9424_v52, %v9423_v38  ;;  %v9434_v52 = vld [vmem:[#allocation79_spill] sm:$0xff] }
 0x2ae   : > { %2504 = vmatmul.f32.gmra.mxu2 %v7101_v32  ;;  %5170 = vmatmul.msk.f32.gmra.mxu3 %vm2376_vm5, %v7104_v42 }
 0x2b1   : > { %v2043_v1 = vpop.f32.mrf.mxu0  ;;  %v2144_v2 = vpop.f32.mrf.mxu1 }
 0x2b2   : > { %v2218_v34 = vadd.f32 %v2043_v1, %v1834_v43  ;;  %v2219_v14 = vadd.f32 %v2144_v2, %v1835_v53  ;;  %v9427_v1 = vld [vmem:[#allocation74_spill] sm:$0xff] }
 0x2b3   : > { %v1838_v2 = vadd.f32 %v9427_v1, %v1453_v55 }
 0x2b4   : > { %v7124_v6 = vadd.f32 %v6812_v28, %v2218_v34  ;;  %v7127_v63 = vadd.f32 %v6814_v16, %v2219_v14  ;;  %5130 = vmatmul.msk.f32.gmra.mxu0 %vm570_vm1, %v1933_v50  ;;  %5159 = vmatmul.msk.f32.gmra.mxu1 %vm570_vm1, %v1933_v50  ;;  %v9428_v50 = vld [vmem:[#allocation75_spill] sm:$0xff] }
 0x2b5   : > { %v1839_v34 = vadd.f32 %v9428_v50, %v1454_v33  ;;  %v9436_v50 = vld [vmem:[#allocation48_spill] sm:$0xff] }
 0x2b6   : > { %2507 = vmatmul.f32.gmra.mxu2 %v7124_v6  ;;  %5171 = vmatmul.msk.f32.gmra.mxu3 %vm2376_vm5, %v7127_v63 }
 0x2b9   : > { %v2046_v0 = vpop.f32.mrf.mxu0  ;;  %v2147_v19 = vpop.f32.mrf.mxu1 }
 0x2ba   : > { %v2220_v48 = vadd.f32 %v2046_v0, %v1836_v31  ;;  %v2221_v40 = vadd.f32 %v2147_v19, %v1837_v62  ;;  %v9431_v31 = vld [vmem:[#allocation14_spill] sm:$0xff]  ;;  %v7163_v0 = vpop.f32.mrf.mxu3 }
 0x2bb   : > { %v1456_v62 = vadd.f32 %v9432_v3, %v9431_v31  ;;  %v9440_v31 = vld [vmem:[#allocation83_spill] sm:$0xff] }
 0x2bc   : > { %v7145_v43 = vadd.f32 %v6812_v28, %v2220_v48  ;;  %v7148_v53 = vadd.f32 %v6814_v16, %v2221_v40  ;;  %5131 = vmatmul.msk.f32.gmra.mxu0 %vm570_vm1, %v1932_v58  ;;  %5160 = vmatmul.msk.f32.gmra.mxu1 %vm570_vm1, %v1932_v58  ;;  %v7161_v58 = vpop.f32.mrf.mxu2  ;;  %v9433_v40 = vld [vmem:[#allocation78_spill] sm:$0xff] }
 0x2bd   : > { %v1840_v38 = vadd.f32 %v9433_v40, %v1455_v13  ;;  %v1841_v55 = vadd.f32 %v9434_v52, %v1456_v62  ;;  %v9441_v52 = vld [vmem:[#allocation17_spill] sm:$0xff] }
 0x2be   : > { %2510 = vmatmul.f32.gmra.mxu2 %v7145_v43  ;;  %5172 = vmatmul.msk.f32.gmra.mxu3 %vm2376_vm5, %v7148_v53 }
 0x2c1   : > { %v2049_v14 = vpop.f32.mrf.mxu0  ;;  %v2150_v9 = vpop.f32.mrf.mxu1 }
 0x2c2   : > { %v2222_v18 = vadd.f32 %v2049_v14, %v1838_v2  ;;  %v2223_v12 = vadd.f32 %v2150_v9, %v1839_v34  ;;  %v9435_v2 = vld [vmem:[#allocation15_spill] sm:$0xff]  ;;  %v9438_v14 = vld [vmem:[#allocation49_spill] sm:$0xff]  ;;  %v7194_v17 = vpop.f32.mrf.mxu3 }
 0x2c3   : > { %v1457_v34 = vadd.f32 %v9436_v50, %v9435_v2  ;;  %v9445_v50 = vld [vmem:[#allocation84_spill] sm:$0xff] }
 0x2c4   : > { %v7166_v19 = vadd.f32 %v6812_v28, %v2222_v18  ;;  %v7169_v48 = vadd.f32 %v6814_v16, %v2223_v12  ;;  %2679 = vmatmul.f32.vlgmr.msrb.gmra.mxu0 %v6820_v8  ;;  %5189 = vmatmul.msk.f32.vlgmr.msrb.gmra.mxu1 %vm2376_vm5, %v6823_v45  ;;  %v9437_v8 = vld [vmem:[#allocation16_spill] sm:$0xff]  ;;  %v7192_v12 = vpop.f32.mrf.mxu2 }
 0x2c5   : > { %v1458_v9 = vadd.f32 %v9438_v14, %v9437_v8  ;;  %v1842_v13 = vadd.f32 %v9439_v56, %v1457_v34  ;;  %v9446_v8 = vld [vmem:[#allocation85_spill] sm:$0xff] }
 0x2c6   : > { %2513 = vmatmul.f32.gmra.mxu2 %v7166_v19  ;;  %5173 = vmatmul.msk.f32.gmra.mxu3 %vm2376_vm5, %v7169_v48 }
 0x2c7   : > { %v1843_v3 = vadd.f32 %v9440_v31, %v1458_v9 }
 0x2c9   : > { %v2052_v35 = vpop.f32.mrf.mxu0  ;;  %v2153_v44 = vpop.f32.mrf.mxu1 }
 0x2ca   : > { %v2224_v33 = vadd.f32 %v2052_v35, %v1840_v38  ;;  %v2225_v1 = vadd.f32 %v2153_v44, %v1841_v55  ;;  %v9442_v55 = vld [vmem:[#allocation50_spill] sm:$0xff]  ;;  %v9444_v44 = vld [vmem:[#allocation51_spill] sm:$0xff]  ;;  %v7221_v56 = vpop.f32.mrf.mxu3 }
 0x2cb   : > { %v9443_v35 = vld [vmem:[#allocation18_spill] sm:$0xff] }
 0x2cc   : > { %v7184_v45 = vadd.f32 %v6812_v28, %v2224_v33  ;;  %v7187_v18 = vadd.f32 %v6814_v16, %v2225_v1  ;;  %2682 = vmatmul.f32.gmra.mxu0 %v6839_v60  ;;  %5190 = vmatmul.msk.f32.gmra.mxu1 %vm2376_vm5, %v6842_v51  ;;  %v1459_v51 = vadd.f32 %v9442_v55, %v9441_v52  ;;  %v7219_v9 = vpop.f32.mrf.mxu2 }
 0x2cd   : > { %v1460_v33 = vadd.f32 %v9444_v44, %v9443_v35  ;;  %v9451_v44 = vld [vmem:[#allocation86_spill] sm:$0xff] }
 0x2ce   : > { %2516 = vmatmul.f32.gmra.mxu2 %v7184_v45  ;;  %5174 = vmatmul.msk.f32.gmra.mxu3 %vm2376_vm5, %v7187_v18  ;;  %v1844_v34 = vadd.f32 %v9445_v50, %v1459_v51 }
 0x2cf   : > { %v1845_v14 = vadd.f32 %v9446_v8, %v1460_v33 }
 0x2d1   : > { %v2055_v62 = vpop.f32.mrf.mxu0  ;;  %v2156_v40 = vpop.f32.mrf.mxu1 }
 0x2d2   : > { %v2226_v38 = vadd.f32 %v2055_v62, %v1842_v13  ;;  %v2227_v60 = vadd.f32 %v2156_v40, %v1843_v3  ;;  %v9447_v62 = vld [vmem:[#allocation19_spill] sm:$0xff]  ;;  %v9448_v40 = vld [vmem:[#allocation52_spill] sm:$0xff] }
 0x2d4   : > { %v7206_v1 = vadd.f32 %v6812_v28, %v2226_v38  ;;  %v7209_v2 = vadd.f32 %v6814_v16, %v2227_v60  ;;  %2685 = vmatmul.f32.gmra.mxu0 %v6858_v24  ;;  %5191 = vmatmul.msk.f32.gmra.mxu1 %vm2376_vm5, %v6861_v41  ;;  %v1461_v41 = vadd.f32 %v9448_v40, %v9447_v62  ;;  %v9449_v38 = vld [vmem:[#allocation20_spill] sm:$0xff]  ;;  %v9450_v60 = vld [vmem:[#allocation53_spill] sm:$0xff]  ;;  %v7241_v8 = vpop.f32.mrf.mxu2  ;;  %v9455_v62 = vld [vmem:[#allocation55_spill] sm:$0xff] }
 0x2d5   : > { %v1462_v52 = vadd.f32 %v9450_v60, %v9449_v38 }
 0x2d6   : > { %2519 = vmatmul.f32.gmra.mxu2 %v7206_v1  ;;  %5175 = vmatmul.msk.f32.gmra.mxu3 %vm2376_vm5, %v7209_v2  ;;  %v1846_v35 = vadd.f32 %v6853_v20, %v1461_v41  ;;  %v9458_v41 = vld [vmem:[#allocation87_spill] sm:$0xff] }
 0x2d7   : > { %v1847_v33 = vadd.f32 %v9451_v44, %v1462_v52  ;;  %v9459_v52 = vld [vmem:[#allocation88_spill] sm:$0xff] }
 0x2d9   : > { %v2058_v13 = vpop.f32.mrf.mxu0  ;;  %v2159_v31 = vpop.f32.mrf.mxu1 }
 0x2da   : > { %v2228_v3 = vadd.f32 %v2058_v13, %v1844_v34  ;;  %v2229_v24 = vadd.f32 %v2159_v31, %v1845_v14  ;;  %v7243_v14 = vpop.f32.mrf.mxu3  ;;  %v9452_v31 = vld [vmem:[#allocation21_spill] sm:$0xff] }
 0x2dc   : > { %v7228_v55 = vadd.f32 %v6812_v28, %v2228_v3  ;;  %v7231_v51 = vadd.f32 %v6814_v16, %v2229_v24  ;;  %2688 = vmatmul.f32.gmra.mxu0 %v6877_v7  ;;  %5192 = vmatmul.msk.f32.gmra.mxu1 %vm2376_vm5, %v6880_v29  ;;  %v9453_v3 = vld [vmem:[#allocation54_spill] sm:$0xff] }
 0x2dd   : > { %v1463_v29 = vadd.f32 %v9453_v3, %v9452_v31  ;;  %v9454_v24 = vld [vmem:[#allocation22_spill] sm:$0xff]  ;;  %v9460_v31 = vld [vmem:[#allocation23_spill] sm:$0xff] }
 0x2de   : > { %2522 = vmatmul.f32.gmra.mxu2 %v7228_v55  ;;  %5176 = vmatmul.msk.f32.gmra.mxu3 %vm2376_vm5, %v7231_v51  ;;  %v1464_v40 = vadd.f32 %v9455_v62, %v9454_v24  ;;  %v9464_v62 = vld [vmem:[#allocation57_spill] sm:$0xff] }
 0x2df   : > { %v1848_v60 = vadd.f32 %v9458_v41, %v1463_v29 }
 0x2e1   : > { %v2061_v50 = vpop.f32.mrf.mxu0  ;;  %v2162_v34 = vpop.f32.mrf.mxu1 }
 0x2e2   : > { %v2230_v13 = vadd.f32 %v2061_v50, %v1846_v35  ;;  %v2231_v7 = vadd.f32 %v2162_v34, %v1847_v33  ;;  %v1849_v35 = vadd.f32 %v9459_v52, %v1464_v40 }
 0x2e4   : > { %v7250_v38 = vadd.f32 %v6812_v28, %v2230_v13  ;;  %v7253_v20 = vadd.f32 %v6814_v16, %v2231_v7  ;;  %2691 = vmatmul.f32.gmra.mxu0 %v6900_v23  ;;  %5193 = vmatmul.msk.f32.gmra.mxu1 %vm2376_vm5, %v6903_v11  ;;  %v9461_v23 = vld [vmem:[#allocation56_spill] sm:$0xff] }
 0x2e5   : > { %v1465_v3 = vadd.f32 %v9461_v23, %v9460_v31  ;;  %v9463_v11 = vld [vmem:[#allocation24_spill] sm:$0xff]  ;;  %v9469_v31 = vld [vmem:[#allocation59_spill] sm:$0xff] }
 0x2e6   : > { %9456 = vst [vmem:[#allocation8_spill] sm:$0xff] %v7250_v38  ;;  %2525 = vmatmul.f32.gmra.mxu2 %v7250_v38  ;;  %5177 = vmatmul.msk.f32.gmra.mxu3 %vm2376_vm5, %v7253_v20  ;;  %v1466_v38 = vadd.f32 %v9464_v62, %v9463_v11 }
 0x2e7   : > { %9457 = vst [vmem:[#allocation9_spill] sm:$0xff] %v7253_v20  ;;  %v1850_v40 = vadd.f32 %v6919_v25, %v1465_v3 }
 0x2e8   : > { %v1851_v41 = vadd.f32 %v6921_v54, %v1466_v38 }
 0x2e9   : > { %v2064_v44 = vpop.f32.mrf.mxu0  ;;  %v2165_v33 = vpop.f32.mrf.mxu1 }
 0x2ea   : > { %v2232_v50 = vadd.f32 %v2064_v44, %v1848_v60  ;;  %v2233_v34 = vadd.f32 %v2165_v33, %v1849_v35  ;;  %v2478_v13 = vpop.f32.mrf.mxu2  ;;  %v2579_v7 = vpop.f32.mrf.mxu3 }
 0x2eb   : > { %v7265_v24 = vadd.f32 %v2579_v7, %v2478_v13 }
 0x2ec   : > { %v7270_v20 = vadd.f32 %v6812_v28, %v2232_v50  ;;  %v7273_v29 = vadd.f32 %v6814_v16, %v2233_v34  ;;  %2694 = vmatmul.f32.gmra.mxu0 %v6941_v47  ;;  %5194 = vmatmul.msk.f32.gmra.mxu1 %vm2376_vm5, %v6944_v46  ;;  %v9465_v34 = vld [vmem:[#allocation25_spill] sm:$0xff]  ;;  %v9466_v47 = vld [vmem:[#allocation58_spill] sm:$0xff] }
 0x2ed   : > { %9462 = vst [vmem:[#allocation10_spill] sm:$0xff] %v7265_v24  ;;  %v1467_v13 = vadd.f32 %v9466_v47, %v9465_v34  ;;  %v9468_v46 = vld [vmem:[#allocation26_spill] sm:$0xff] }
 0x2ee   : > { %2528 = vmatmul.f32.gmra.mxu2 %v7270_v20  ;;  %5178 = vmatmul.msk.f32.gmra.mxu3 %vm2376_vm5, %v7273_v29  ;;  %v1468_v23 = vadd.f32 %v9469_v31, %v9468_v46 }
 0x2ef   : > { %v1852_v54 = vadd.f32 %v6973_v49, %v1467_v13 }
 0x2f0   : > { %v1853_v38 = vadd.f32 %v6975_v36, %v1468_v23 }
 0x2f1   : > { %v2067_v60 = vpop.f32.mrf.mxu0  ;;  %v2168_v52 = vpop.f32.mrf.mxu1 }
 0x2f2   : > { %v2234_v35 = vadd.f32 %v2067_v60, %v1850_v40  ;;  %v2235_v44 = vadd.f32 %v2168_v52, %v1851_v41  ;;  %v2481_v33 = vpop.f32.mrf.mxu2  ;;  %v2582_v50 = vpop.f32.mrf.mxu3 }
 0x2f3   : > { %v7285_v7 = vadd.f32 %v2582_v50, %v2481_v33  ;;  %v9474_v50 = vld [vmem:[#allocation61_spill] sm:$0xff] }
 0x2f4   : > { %v7290_v11 = vadd.f32 %v6812_v28, %v2234_v35  ;;  %v7293_v25 = vadd.f32 %v6814_v16, %v2235_v44  ;;  %2697 = vmatmul.f32.gmra.mxu0 %v6988_v26  ;;  %5195 = vmatmul.msk.f32.gmra.mxu1 %vm2376_vm5, %v6991_v22  ;;  %v9470_v35 = vld [vmem:[#allocation27_spill] sm:$0xff]  ;;  %v9471_v26 = vld [vmem:[#allocation60_spill] sm:$0xff] }
 0x2f5   : > { %9467 = vst [vmem:[#allocation43_spill] sm:$0xff] %v7285_v7  ;;  %v1469_v44 = vadd.f32 %v9471_v26, %v9470_v35  ;;  %v9473_v22 = vld [vmem:[#allocation28_spill] sm:$0xff] }
 0x2f6   : > { %2531 = vmatmul.f32.gmra.mxu2 %v7290_v11  ;;  %5179 = vmatmul.msk.f32.gmra.mxu3 %vm2376_vm5, %v7293_v25  ;;  %v1470_v34 = vadd.f32 %v9474_v50, %v9473_v22 }
 0x2f7   : > { %v1854_v36 = vadd.f32 %v7030_v59, %v1469_v44 }
 0x2f8   : > { %v1855_v13 = vadd.f32 %v7032_v27, %v1470_v34 }
 0x2f9   : > { %v2070_v3 = vpop.f32.mrf.mxu0  ;;  %v2171_v62 = vpop.f32.mrf.mxu1 }
 0x2fa   : > { %v2236_v40 = vadd.f32 %v2070_v3, %v1852_v54  ;;  %v2237_v41 = vadd.f32 %v2171_v62, %v1853_v38  ;;  %v2484_v60 = vpop.f32.mrf.mxu2  ;;  %v2585_v52 = vpop.f32.mrf.mxu3  ;;  %v9475_v62 = vld [vmem:[#allocation29_spill] sm:$0xff] }
 0x2fb   : > { %v7305_v33 = vadd.f32 %v2585_v52, %v2484_v60  ;;  %v9479_v60 = vld [vmem:[#allocation63_spill] sm:$0xff] }
 0x2fc   : > { %v7310_v47 = vadd.f32 %v6812_v28, %v2236_v40  ;;  %v7313_v49 = vadd.f32 %v6814_v16, %v2237_v41  ;;  %2700 = vmatmul.f32.gmra.mxu0 %v7035_v30  ;;  %5196 = vmatmul.msk.f32.gmra.mxu1 %vm2376_vm5, %v7038_v4  ;;  %v9476_v30 = vld [vmem:[#allocation62_spill] sm:$0xff] }
 0x2fd   : > { %9472 = vst [vmem:[#allocation70_spill] sm:$0xff] %v7305_v33  ;;  %v1471_v40 = vadd.f32 %v9476_v30, %v9475_v62  ;;  %v9478_v4 = vld [vmem:[#allocation30_spill] sm:$0xff] }
 0x2fe   : > { %2534 = vmatmul.f32.gmra.mxu2 %v7310_v47  ;;  %5180 = vmatmul.msk.f32.gmra.mxu3 %vm2376_vm5, %v7313_v49  ;;  %v1472_v52 = vadd.f32 %v9479_v60, %v9478_v4  ;;  %v9485_v4 = vld [vmem:[#allocation66_spill] sm:$0xff] }
 0x2ff   : > { %v1856_v27 = vadd.f32 %v7086_v39, %v1471_v40  ;;  %v9484_v40 = vld [vmem:[#allocation33_spill] sm:$0xff] }
 0x300   : > { %v1857_v26 = vadd.f32 %v7088_v15, %v1472_v52  ;;  %v1475_v60 = vadd.f32 %v9485_v4, %v9484_v40  ;;  %v9487_v52 = vld [vmem:[#allocation67_spill] sm:$0xff]  ;;  %v9495_v4 = vld [vmem:[#allocation73_spill] sm:$0xff] }
 0x301   : > { %v2073_v46 = vpop.f32.mrf.mxu0  ;;  %v2174_v31 = vpop.f32.mrf.mxu1 }
 0x302   : > { %v2238_v23 = vadd.f32 %v2073_v46, %v1854_v36  ;;  %v2239_v54 = vadd.f32 %v2174_v31, %v1855_v13  ;;  %v2487_v38 = vpop.f32.mrf.mxu2  ;;  %v2588_v3 = vpop.f32.mrf.mxu3  ;;  %v9480_v36 = vld [vmem:[#allocation31_spill] sm:$0xff]  ;;  %v9481_v13 = vld [vmem:[#allocation64_spill] sm:$0xff]  ;;  %v9483_v31 = vld [vmem:[#allocation65_spill] sm:$0xff] }
 0x303   : > { %v7325_v41 = vadd.f32 %v2588_v3, %v2487_v38  ;;  %v1473_v46 = vadd.f32 %v9481_v13, %v9480_v36  ;;  %v9488_v36 = vld [vmem:[#allocation35_spill] sm:$0xff]  ;;  %v9489_v13 = vld [vmem:[#allocation68_spill] sm:$0xff] }
 0x304   : > { %v7330_v35 = vadd.f32 %v6812_v28, %v2238_v23  ;;  %v7333_v59 = vadd.f32 %v6814_v16, %v2239_v54  ;;  %2703 = vmatmul.f32.gmra.mxu0 %v7078_v57  ;;  %5197 = vmatmul.msk.f32.gmra.mxu1 %vm2376_vm5, %v7081_v61  ;;  %v9482_v57 = vld [vmem:[#allocation32_spill] sm:$0xff] }
 0x305   : > { %9477 = vst [vmem:[#allocation71_spill] sm:$0xff] %v7325_v41  ;;  %v1474_v23 = vadd.f32 %v9483_v31, %v9482_v57  ;;  %v1858_v39 = vadd.f32 %v7114_v5, %v1473_v46  ;;  %v1860_v5 = vadd.f32 %v7136_v10, %v1475_v60  ;;  %v1477_v46 = vadd.f32 %v9489_v13, %v9488_v36  ;;  %v9491_v57 = vld [vmem:[#allocation69_spill] sm:$0xff] }
 0x306   : > { %2537 = vmatmul.f32.gmra.mxu2 %v7330_v35  ;;  %5181 = vmatmul.msk.f32.gmra.mxu3 %vm2376_vm5, %v7333_v59 }
 0x307   : > { %v1859_v15 = vadd.f32 %v7116_v37, %v1474_v23  ;;  %v1862_v10 = vadd.f32 %v7161_v58, %v1477_v46 }
 0x309   : > { %v2076_v44 = vpop.f32.mrf.mxu0  ;;  %v2177_v22 = vpop.f32.mrf.mxu1 }
 0x30a   : > { %v2240_v50 = vadd.f32 %v2076_v44, %v1856_v27  ;;  %v2241_v34 = vadd.f32 %v2177_v22, %v1857_v26  ;;  %v7433_v46 = vpop.f32.mrf.mxu2 }
 0x30c   : > { %v7348_v61 = vadd.f32 %v6812_v28, %v2240_v50  ;;  %v7351_v54 = vadd.f32 %v6814_v16, %v2241_v34  ;;  %2706 = vmatmul.f32.gmra.mxu0 %v7101_v32  ;;  %5198 = vmatmul.msk.f32.gmra.mxu1 %vm2376_vm5, %v7104_v42  ;;  %v9486_v32 = vld [vmem:[#allocation34_spill] sm:$0xff] }
 0x30d   : > { %v1476_v27 = vadd.f32 %v9487_v52, %v9486_v32 }
 0x30e   : > { %2540 = vmatmul.f32.gmra.mxu2 %v7348_v61  ;;  %5182 = vmatmul.msk.f32.gmra.mxu3 %vm2376_vm5, %v7351_v54 }
 0x30f   : > { %v1861_v37 = vadd.f32 %v7138_v21, %v1476_v27 }
 0x311   : > { %v2079_v38 = vpop.f32.mrf.mxu0  ;;  %v2180_v3 = vpop.f32.mrf.mxu1 }
 0x312   : > { %v2242_v62 = vadd.f32 %v2079_v38, %v1858_v39  ;;  %v2243_v30 = vadd.f32 %v2180_v3, %v1859_v15 }
 0x314   : > { %v7366_v42 = vadd.f32 %v6812_v28, %v2242_v62  ;;  %v7369_v26 = vadd.f32 %v6814_v16, %v2243_v30  ;;  %2709 = vmatmul.f32.gmra.mxu0 %v7124_v6  ;;  %5199 = vmatmul.msk.f32.gmra.mxu1 %vm2376_vm5, %v7127_v63  ;;  %v9490_v6 = vld [vmem:[#allocation36_spill] sm:$0xff]  ;;  %v9492_v62 = vld [vmem:[#allocation37_spill] sm:$0xff] }
 0x315   : > { %v1478_v31 = vadd.f32 %v9491_v57, %v9490_v6  ;;  %v9493_v30 = vld [vmem:[#allocation72_spill] sm:$0xff]  ;;  %v7435_v6 = vpop.f32.mrf.mxu3 }
 0x316   : > { %2543 = vmatmul.f32.gmra.mxu2 %v7366_v42  ;;  %5183 = vmatmul.msk.f32.gmra.mxu3 %vm2376_vm5, %v7369_v26  ;;  %v1479_v40 = vadd.f32 %v9493_v30, %v9492_v62 }
 0x317   : > { %v1863_v21 = vadd.f32 %v7163_v0, %v1478_v31 }
 0x318   : > { %v1864_v58 = vadd.f32 %v7192_v12, %v1479_v40 }
 0x319   : > { %v2082_v44 = vpop.f32.mrf.mxu0  ;;  %v2183_v22 = vpop.f32.mrf.mxu1 }
 0x31a   : > { %v2244_v50 = vadd.f32 %v2082_v44, %v1860_v5  ;;  %v2245_v34 = vadd.f32 %v2183_v22, %v1861_v37  ;;  %v9496_v44 = vld [vmem:[#allocation39_spill] sm:$0xff]  ;;  %v9497_v22 = vld [vmem:[#allocation76_spill] sm:$0xff] }
 0x31c   : > { %v7384_v63 = vadd.f32 %v6812_v28, %v2244_v50  ;;  %v7387_v23 = vadd.f32 %v6814_v16, %v2245_v34  ;;  %2712 = vmatmul.f32.gmra.mxu0 %v7145_v43  ;;  %5200 = vmatmul.msk.f32.gmra.mxu1 %vm2376_vm5, %v7148_v53  ;;  %v9494_v43 = vld [vmem:[#allocation38_spill] sm:$0xff]  ;;  %v1481_v50 = vadd.f32 %v9497_v22, %v9496_v44  ;;  %v9499_v34 = vld [vmem:[#allocation77_spill] sm:$0xff] }
 0x31d   : > { %v1480_v60 = vadd.f32 %v9495_v4, %v9494_v43  ;;  %v7455_v4 = vpop.f32.mrf.mxu2 }
 0x31e   : > { %2546 = vmatmul.f32.gmra.mxu2 %v7384_v63  ;;  %5184 = vmatmul.msk.f32.gmra.mxu3 %vm2376_vm5, %v7387_v23  ;;  %v1866_v12 = vadd.f32 %v7219_v9, %v1481_v50 }
 0x31f   : > { %v1865_v0 = vadd.f32 %v7194_v17, %v1480_v60  ;;  %v7457_v60 = vpop.f32.mrf.mxu3 }
 0x321   : > { %v2085_v39 = vpop.f32.mrf.mxu0  ;;  %v2186_v15 = vpop.f32.mrf.mxu1 }
 0x322   : > { %v2246_v38 = vadd.f32 %v2085_v39, %v1862_v10  ;;  %v2247_v3 = vadd.f32 %v2186_v15, %v1863_v21  ;;  %v9500_v21 = vld [vmem:[#allocation41_spill] sm:$0xff]  ;;  %v9501_v39 = vld [vmem:[#allocation80_spill] sm:$0xff]  ;;  %v9502_v15 = vld [vmem:[#allocation42_spill] sm:$0xff] }
 0x324   : > { %v7402_v53 = vadd.f32 %v6812_v28, %v2246_v38  ;;  %v7405_v32 = vadd.f32 %v6814_v16, %v2247_v3  ;;  %2715 = vmatmul.f32.gmra.mxu0 %v7166_v19  ;;  %5201 = vmatmul.msk.f32.gmra.mxu1 %vm2376_vm5, %v7169_v48  ;;  %v9498_v19 = vld [vmem:[#allocation40_spill] sm:$0xff]  ;;  %v9503_v38 = vld [vmem:[#allocation81_spill] sm:$0xff] }
 0x325   : > { %v1482_v36 = vadd.f32 %v9499_v34, %v9498_v19  ;;  %v1484_v3 = vadd.f32 %v9503_v38, %v9502_v15 }
 0x326   : > { %2549 = vmatmul.f32.gmra.mxu2 %v7402_v53  ;;  %5185 = vmatmul.msk.f32.gmra.mxu3 %vm2376_vm5, %v7405_v32 }
 0x327   : > { %v1867_v17 = vadd.f32 %v7221_v56, %v1482_v36  ;;  %v1869_v30 = vadd.f32 %v7243_v14, %v1484_v3 }
 0x329   : > { %v2088_v52 = vpop.f32.mrf.mxu0  ;;  %v2189_v27 = vpop.f32.mrf.mxu1 }
 0x32a   : > { %v2248_v5 = vadd.f32 %v2088_v52, %v1864_v58  ;;  %v2249_v37 = vadd.f32 %v2189_v27, %v1865_v0  ;;  %v7475_v52 = vpop.f32.mrf.mxu2  ;;  %v9507_v27 = vld [vmem:[#allocation9_spill] sm:$0xff] }
 0x32c   : > { %v7420_v48 = vadd.f32 %v6812_v28, %v2248_v5  ;;  %v7423_v13 = vadd.f32 %v6814_v16, %v2249_v37  ;;  %2718 = vmatmul.f32.gmra.mxu0 %v7184_v45  ;;  %5202 = vmatmul.msk.f32.gmra.mxu1 %vm2376_vm5, %v7187_v18  ;;  %v1483_v18 = vadd.f32 %v9501_v39, %v9500_v21 }
 0x32e   : > { %2552 = vmatmul.f32.gmra.mxu2 %v7420_v48  ;;  %5186 = vmatmul.msk.f32.gmra.mxu3 %vm2376_vm5, %v7423_v13  ;;  %v1868_v56 = vadd.f32 %v7241_v8, %v1483_v18 }
 0x331   : > { %v2091_v57 = vpop.f32.mrf.mxu0  ;;  %v2192_v31 = vpop.f32.mrf.mxu1 }
 0x332   : > { %v2250_v10 = vadd.f32 %v2091_v57, %v1866_v12  ;;  %v2251_v45 = vadd.f32 %v2192_v31, %v1867_v17  ;;  %v7489_v5 = vpop.f32.mrf.mxu2 }
 0x334   : > { %v7442_v62 = vadd.f32 %v6812_v28, %v2250_v10  ;;  %v7445_v9 = vadd.f32 %v6814_v16, %v2251_v45  ;;  %2721 = vmatmul.f32.gmra.mxu0 %v7206_v1  ;;  %5203 = vmatmul.msk.f32.gmra.mxu1 %vm2376_vm5, %v7209_v2 }
 0x336   : > { %2555 = vmatmul.f32.gmra.mxu2 %v7442_v62  ;;  %5187 = vmatmul.msk.f32.gmra.mxu3 %vm2376_vm5, %v7445_v9 }
 0x339   : > { %v2094_v40 = vpop.f32.mrf.mxu0  ;;  %v2195_v43 = vpop.f32.mrf.mxu1 }
 0x33a   : > { %v2252_v58 = vadd.f32 %v2094_v40, %v1868_v56  ;;  %v2253_v1 = vadd.f32 %v2195_v43, %v1869_v30  ;;  %v7500_v50 = vpop.f32.mrf.mxu2 }
 0x33c   : > { %v7460_v0 = vadd.f32 %v6812_v28, %v2252_v58  ;;  %v7463_v2 = vadd.f32 %v6814_v16, %v2253_v1  ;;  %2724 = vmatmul.f32.gmra.mxu0 %v7228_v55  ;;  %5204 = vmatmul.msk.f32.gmra.mxu1 %vm2376_vm5, %v7231_v51  ;;  %v7477_v28 = vpop.f32.mrf.mxu3  ;;  %v9506_v16 = vld [vmem:[#allocation8_spill] sm:$0xff] }
 0x33e   : > { %2558 = vmatmul.f32.gmra.mxu2 %v7460_v0  ;;  %5188 = vmatmul.msk.f32.gmra.mxu3 %vm2376_vm5, %v7463_v2 }
 0x341   : > { %v7471_v8 = vpop.f32.mrf.mxu0  ;;  %v7473_v14 = vpop.f32.mrf.mxu1 }
 0x342   : > { %9504 = vst [vmem:[#allocation11_spill] sm:$0xff] %v7471_v8 }
 0x343   : > { %9505 = vst [vmem:[#allocation44_spill] sm:$0xff] %v7473_v14 }
 0x344   : > { %2727 = vmatmul.f32.gmra.mxu0 %v9506_v16  ;;  %5205 = vmatmul.msk.f32.gmra.mxu1 %vm2376_vm5, %v9507_v27  ;;  %v7491_v37 = vpop.f32.mrf.mxu3 }
 0x349   : > { %v7482_v55 = vpop.f32.mrf.mxu0  ;;  %v7484_v51 = vpop.f32.mrf.mxu1 }
 0x34a   : > { %9508 = vst [vmem:[#allocation12_spill] sm:$0xff] %v7482_v55 }
 0x34b   : > { %9509 = vst [vmem:[#allocation45_spill] sm:$0xff] %v7484_v51 }
 0x34c   : > { %2730 = vmatmul.f32.gmra.mxu0 %v7270_v20  ;;  %5206 = vmatmul.msk.f32.gmra.mxu1 %vm2376_vm5, %v7273_v29  ;;  %v7502_v19 = vpop.f32.mrf.mxu3 }
 0x351   : > { %v7493_v44 = vpop.f32.mrf.mxu0  ;;  %v7495_v22 = vpop.f32.mrf.mxu1 }
 0x352   : > { %9510 = vst [vmem:[#allocation74_spill] sm:$0xff] %v7493_v44 }
 0x353   : > { %9511 = vst [vmem:[#allocation75_spill] sm:$0xff] %v7495_v22 }
 0x354   : > { %2733 = vmatmul.f32.gmra.mxu0 %v7290_v11  ;;  %5207 = vmatmul.msk.f32.gmra.mxu1 %vm2376_vm5, %v7293_v25  ;;  %v7515_v11 = vpop.f32.mrf.mxu2  ;;  %v7517_v25 = vpop.f32.mrf.mxu3 }
 0x359   : > { %v7504_v20 = vpop.f32.mrf.mxu0  ;;  %v7506_v29 = vpop.f32.mrf.mxu1 }
 0x35a   : > { %9512 = vst [vmem:[#allocation13_spill] sm:$0xff] %v7506_v29 }
 0x35c   : > { %2736 = vmatmul.f32.gmra.mxu0 %v7310_v47  ;;  %5208 = vmatmul.msk.f32.gmra.mxu1 %vm2376_vm5, %v7313_v49  ;;  %v7526_v47 = vpop.f32.mrf.mxu2  ;;  %v7528_v49 = vpop.f32.mrf.mxu3 }
 0x361   : > { %v7511_v34 = vpop.f32.mrf.mxu0  ;;  %v7513_v36 = vpop.f32.mrf.mxu1 }
 0x364   : > { %2739 = vmatmul.f32.gmra.mxu0 %v7330_v35  ;;  %5209 = vmatmul.msk.f32.gmra.mxu1 %vm2376_vm5, %v7333_v59  ;;  %v2511_v35 = vpop.f32.mrf.mxu2  ;;  %v2612_v59 = vpop.f32.mrf.mxu3 }
 0x369   : > { %v7522_v12 = vpop.f32.mrf.mxu0  ;;  %v7524_v17 = vpop.f32.mrf.mxu1 }
 0x36c   : > { %2742 = vmatmul.f32.gmra.mxu0 %v7348_v61  ;;  %5210 = vmatmul.msk.f32.gmra.mxu1 %vm2376_vm5, %v7351_v54  ;;  %v2514_v61 = vpop.f32.mrf.mxu2  ;;  %v2615_v54 = vpop.f32.mrf.mxu3 }
 0x36d   : > { %v2616_v44 = vadd.f32 %v2615_v54, %v2514_v61 }
 0x371   : > { %v7533_v57 = vpop.f32.mrf.mxu0  ;;  %v7535_v31 = vpop.f32.mrf.mxu1 }
 0x374   : > { %2745 = vmatmul.f32.gmra.mxu0 %v7366_v42  ;;  %5211 = vmatmul.msk.f32.gmra.mxu1 %vm2376_vm5, %v7369_v26  ;;  %v2517_v18 = vpop.f32.mrf.mxu2  ;;  %v2618_v15 = vpop.f32.mrf.mxu3 }
 0x375   : > { %v2619_v51 = vadd.f32 %v2618_v15, %v2517_v18  ;;  %v9524_v18 = vld [vmem:[#allocation44_spill] sm:$0xff] }
 0x379   : > { %v7540_v10 = vpop.f32.mrf.mxu0  ;;  %v7542_v45 = vpop.f32.mrf.mxu1 }
 0x37c   : > { %2748 = vmatmul.f32.gmra.mxu0 %v7384_v63  ;;  %5212 = vmatmul.msk.f32.gmra.mxu1 %vm2376_vm5, %v7387_v23  ;;  %v2520_v38 = vpop.f32.mrf.mxu2  ;;  %v2621_v3 = vpop.f32.mrf.mxu3 }
 0x37d   : > { %v2622_v14 = vadd.f32 %v2621_v3, %v2520_v38 }
 0x381   : > { %v7547_v21 = vpop.f32.mrf.mxu0  ;;  %v2805_v39 = vpop.f32.mrf.mxu1 }
 0x384   : > { %2751 = vmatmul.f32.gmra.mxu0 %v7402_v53  ;;  %5213 = vmatmul.msk.f32.gmra.mxu1 %vm2376_vm5, %v7405_v32  ;;  %v2624_v56 = vpop.f32.mrf.mxu3 }
 0x389   : > { %v2707_v42 = vpop.f32.mrf.mxu0  ;;  %v2808_v26 = vpop.f32.mrf.mxu1 }
 0x38c   : > { %2754 = vmatmul.f32.gmra.mxu0 %v7420_v48  ;;  %5214 = vmatmul.msk.f32.gmra.mxu1 %vm2376_vm5, %v7423_v13  ;;  %v2523_v48 = vpop.f32.mrf.mxu2  ;;  %v7563_v43 = vpop.f32.mrf.mxu3 }
 0x38d   : > { %9514 = vst [vmem:[#allocation14_spill] sm:$0xff] %v7563_v43  ;;  %v2625_v7 = vadd.f32 %v2624_v56, %v2523_v48  ;;  %v2610_v56 = vadd.f32 %v7528_v49, %v7526_v47 }
 0x391   : > { %v2710_v63 = vpop.f32.mrf.mxu0  ;;  %v2811_v23 = vpop.f32.mrf.mxu1 }
 0x392   : > { %v2812_v38 = vadd.f32 %v2811_v23, %v2710_v63  ;;  %v9525_v63 = vld [vmem:[#allocation70_spill] sm:$0xff] }
 0x394   : > { %2757 = vmatmul.f32.gmra.mxu0 %v7442_v62  ;;  %5215 = vmatmul.msk.f32.gmra.mxu1 %vm2376_vm5, %v7445_v9  ;;  %v7561_v40 = vpop.f32.mrf.mxu2  ;;  %v7567_v27 = vpop.f32.mrf.mxu3  ;;  %v2875_v54 = vmax.f32 %v2610_v56, %v2812_v38 }
 0x395   : > { %9513 = vst [vmem:[#allocation46_spill] sm:$0xff] %v7561_v40 }
 0x396   : > { %9516 = vst [vmem:[#allocation78_spill] sm:$0xff] %v7567_v27 }
 0x399   : > { %v2713_v53 = vpop.f32.mrf.mxu0  ;;  %v2814_v32 = vpop.f32.mrf.mxu1 }
 0x39c   : > { %2760 = vmatmul.f32.gmra.mxu0 %v7460_v0  ;;  %5216 = vmatmul.msk.f32.gmra.mxu1 %vm2376_vm5, %v7463_v2  ;;  %v7565_v9 = vpop.f32.mrf.mxu2  ;;  %v7571_v41 = vpop.f32.mrf.mxu3 }
 0x39d   : > { %9515 = vst [vmem:[#allocation47_spill] sm:$0xff] %v7565_v9  ;;  %v2815_v9 = vadd.f32 %v2814_v32, %v2713_v53  ;;  %v9526_v53 = vld [vmem:[#allocation43_spill] sm:$0xff] }
 0x3a1   : > { %v2716_v30 = vpop.f32.mrf.mxu0  ;;  %v2817_v13 = vpop.f32.mrf.mxu1 }
 0x3a2   : > { %v2818_v55 = vadd.f32 %v2817_v13, %v2716_v30 }
 0x3a4   : > { %v7569_v8 = vpop.f32.mrf.mxu2  ;;  %v2877_v3 = vmax.f32 %v2616_v44, %v2818_v55  ;;  %v2604_v55 = vadd.f32 %v7502_v19, %v7500_v50  ;;  %v2803_v44 = vadd.f32 %v7542_v45, %v7540_v10  ;;  %v2598_v50 = vadd.f32 %v7477_v28, %v7475_v52 }
 0x3a5   : > { %v2797_v19 = vadd.f32 %v7524_v17, %v7522_v12  ;;  %v2595_v10 = vadd.f32 %v7457_v60, %v7455_v4  ;;  %v2794_v45 = vadd.f32 %v7513_v36, %v7511_v34  ;;  %v9518_v60 = vld [vmem:[#allocation74_spill] sm:$0xff]  ;;  %v9519_v34 = vld [vmem:[#allocation75_spill] sm:$0xff] }
 0x3a6   : > { %v2788_v36 = vadd.f32 %v9519_v34, %v9518_v60 }
 0x3a7   : > { %v2870_v52 = vmax.f32 %v2595_v10, %v2797_v19 }
 0x3a8   : > { %v2867_v23 = vmax.f32 %v9525_v63, %v2788_v36  ;;  %v2895_v36 = vld [vmem:[%s9314_s4 + $0x10] sm:$0xff] }
 0x3a9   : > { %v2719_v58 = vpop.f32.mrf.mxu0  ;;  %v2820_v62 = vpop.f32.mrf.mxu1 }
 0x3aa   : > { %v2821_v40 = vadd.f32 %v2820_v62, %v2719_v58 }
 0x3ac   : > { %v2878_v29 = vmax.f32 %v2619_v51, %v2821_v40  ;;  %v7581_v61 = vpop.f32.mrf.mxu2  ;;  %v7583_v51 = vpop.f32.mrf.mxu3  ;;  %v9527_v40 = vld [vmem:[#allocation10_spill] sm:$0xff] }
 0x3b1   : > { %v2722_v1 = vpop.f32.mrf.mxu0  ;;  %v2823_v16 = vpop.f32.mrf.mxu1 }
 0x3b2   : > { %v2824_v2 = vadd.f32 %v2823_v16, %v2722_v1 }
 0x3b4   : > { %v2879_v22 = vmax.f32 %v2622_v14, %v2824_v2  ;;  %v2607_v14 = vadd.f32 %v7517_v25, %v7515_v11  ;;  %v2601_v11 = vadd.f32 %v7491_v37, %v7489_v5  ;;  %v2800_v25 = vadd.f32 %v7535_v31, %v7533_v57  ;;  %v9517_v57 = vld [vmem:[#allocation13_spill] sm:$0xff]  ;;  %v7610_v28 = vpop.f32.mrf.mxu2  ;;  %v7612_v12 = vpop.f32.mrf.mxu3 }
 0x3b5   : > { %v2592_v37 = vadd.f32 %v7435_v6, %v7433_v46  ;;  %v2791_v31 = vadd.f32 %v9517_v57, %v7504_v20  ;;  %v9521_v46 = vld [vmem:[#allocation45_spill] sm:$0xff] }
 0x3b6   : > { %v2871_v5 = vmax.f32 %v2598_v50, %v2800_v25 }
 0x3b9   : > { %v2725_v0 = vpop.f32.mrf.mxu0  ;;  %v2826_v24 = vpop.f32.mrf.mxu1 }
 0x3ba   : > { %v2827_v33 = vadd.f32 %v2826_v24, %v2725_v0  ;;  %v2613_v24 = vadd.f32 %v2612_v59, %v2511_v35  ;;  %v2872_v59 = vmax.f32 %v2601_v11, %v2803_v44 }
 0x3bc   : > { %v2880_v43 = vmax.f32 %v2625_v7, %v2827_v33  ;;  %v2809_v7 = vadd.f32 %v2808_v26, %v2707_v42  ;;  %v2876_v33 = vmax.f32 %v2613_v24, %v2815_v9  ;;  %v9522_v42 = vld [vmem:[#allocation71_spill] sm:$0xff]  ;;  %v2541_v58 = vpop.f32.mrf.mxu2  ;;  %v2642_v62 = vpop.f32.mrf.mxu3 }
 0x3bd   : > { %v2868_v20 = vmax.f32 %v9522_v42, %v2791_v31  ;;  %v9523_v26 = vld [vmem:[#allocation11_spill] sm:$0xff] }
 0x3be   : > { %3017 = vmatpush.msrb.mxu2 %v2880_v43  ;;  %v2782_v15 = vadd.f32 %v9524_v18, %v9523_v26 }
 0x3c0   : > { %3018 = vmatpush.msrb.mxu2 %v2879_v22  ;;  %v2806_v22 = vadd.f32 %v2805_v39, %v7547_v21  ;;  %v2869_v21 = vmax.f32 %v2592_v37, %v2794_v45  ;;  %v9520_v39 = vld [vmem:[#allocation12_spill] sm:$0xff]  ;;  %v2865_v43 = vmax.f32 %v9527_v40, %v2782_v15  ;;  %v2893_v45 = vld [vmem:[%s9314_s4] sm:$0xff] }
 0x3c1   : > { %v7573_v27 = vpop.f32.mrf.mxu0  ;;  %v7575_v48 = vpop.f32.mrf.mxu1  ;;  %v2785_v6 = vadd.f32 %v9521_v46, %v9520_v39 }
 0x3c2   : > { %3019 = vmatpush.msrb.mxu2 %v2878_v29  ;;  %v2874_v29 = vmax.f32 %v2607_v14, %v2809_v7  ;;  %v2873_v35 = vmax.f32 %v2604_v55, %v2806_v22 }
 0x3c3   : > { %v2866_v32 = vmax.f32 %v9526_v53, %v2785_v6 }
 0x3c4   : > { %3020 = vmatpush.msrb.mxu2 %v2877_v3  ;;  %v2544_v9 = vpop.f32.mrf.mxu2  ;;  %v2645_v0 = vpop.f32.mrf.mxu3 }
 0x3c5   : > { %v2646_v40 = vadd.f32 %v2645_v0, %v2544_v9 }
 0x3c6   : > { %3021 = vmatpush.msrb.mxu2 %v2876_v33 }
 0x3c8   : > { %3022 = vmatpush.msrb.mxu2 %v2875_v54 }
 0x3c9   : > { %v7590_v47 = vpop.f32.mrf.mxu0  ;;  %v7592_v49 = vpop.f32.mrf.mxu1 }
 0x3ca   : > { %3023 = vmatpush.msrb.mxu2 %v2874_v29 }
 0x3cc   : > { %3024 = vmatpush.msrb.mxu2 %v2873_v35  ;;  %v2547_v38 = vpop.f32.mrf.mxu2  ;;  %v2648_v3 = vpop.f32.mrf.mxu3 }
 0x3cd   : > { %v2649_v63 = vadd.f32 %v2648_v3, %v2547_v38 }
 0x3ce   : > { %3025 = vmatpush.msrb.mxu2 %v2872_v59 }
 0x3d0   : > { %3026 = vmatpush.msrb.mxu2 %v2871_v5 }
 0x3d1   : > { %v7614_v17 = vpop.f32.mrf.mxu0  ;;  %v7616_v4 = vpop.f32.mrf.mxu1 }
 0x3d2   : > { %3027 = vmatpush.msrb.mxu2 %v2870_v52  ;;  %v2836_v9 = vadd.f32 %v7616_v4, %v7614_v17  ;;  %v2830_v17 = vadd.f32 %v7575_v48, %v7573_v27  ;;  %v2896_v27 = vld [vmem:[%s9314_s4 + $0x18] sm:$0xff]  ;;  %v2903_v48 = vld [vmem:[%s9314_s4 + $0x50] sm:$0xff] }
 0x3d4   : > { %3028 = vmatpush.msrb.mxu2 %v2869_v21  ;;  %v2550_v33 = vpop.f32.mrf.mxu2  ;;  %v2651_v14 = vpop.f32.mrf.mxu3 }
 0x3d5   : > { %v2652_v26 = vadd.f32 %v2651_v14, %v2550_v33  ;;  %v2640_v33 = vadd.f32 %v7612_v12, %v7610_v28  ;;  %v2634_v28 = vadd.f32 %v7571_v41, %v7569_v8  ;;  %v2833_v12 = vadd.f32 %v7592_v49, %v7590_v47  ;;  %v2894_v8 = vld [vmem:[%s9314_s4 + $0x8] sm:$0xff]  ;;  %v2901_v47 = vld [vmem:[%s9314_s4 + $0x40] sm:$0xff]  ;;  %v2907_v14 = vld [vmem:[%s9314_s4 + $0x70] sm:$0xff] }
 0x3d6   : > { %3029 = vmatpush.msrb.mxu2 %v2868_v20  ;;  %v2898_v49 = vld [vmem:[%s9314_s4 + $0x28] sm:$0xff] }
 0x3d7   : > { %v2883_v4 = vmax.f32 %v2634_v28, %v2836_v9  ;;  %v2932_v9 = vld [vmem:[%s9314_s4 + $0x138] sm:$0xff] }
 0x3d8   : > { %3030 = vmatpush.msrb.mxu2 %v2867_v23 }
 0x3d9   : > { %v7627_v30 = vpop.f32.mrf.mxu0  ;;  %v7629_v13 = vpop.f32.mrf.mxu1 }
 0x3da   : > { %3031 = vmatpush.msrb.mxu2 %v2866_v32  ;;  %v2897_v32 = vld [vmem:[%s9314_s4 + $0x20] sm:$0xff]  ;;  %v2839_v38 = vadd.f32 %v7629_v13, %v7627_v30  ;;  %v9528_v13 = vld [vmem:[#allocation47_spill] sm:$0xff] }
 0x3dc   : > { %3032 = vmatpush.msrb.mxu2 %v2865_v43  ;;  %v2553_v29 = vpop.f32.mrf.mxu2  ;;  %v2654_v11 = vpop.f32.mrf.mxu3 }
 0x3dd   : > { %3033 = vmatmul.f32.vlgmr.msrb.gmra.mxu2 %v2893_v45  ;;  %v2655_v6 = vadd.f32 %v2654_v11, %v2553_v29  ;;  %v2904_v11 = vld [vmem:[%s9314_s4 + $0x58] sm:$0xff]  ;;  %v2910_v45 = vld [vmem:[%s9314_s4 + $0x88] sm:$0xff] }
 0x3e1   : > { %v2740_v1 = vpop.f32.mrf.mxu0  ;;  %v2841_v16 = vpop.f32.mrf.mxu1 }
 0x3e4   : > { %v2556_v50 = vpop.f32.mrf.mxu2  ;;  %v2657_v19 = vpop.f32.mrf.mxu3 }
 0x3e5   : > { %v2658_v21 = vadd.f32 %v2657_v19, %v2556_v50  ;;  %3036 = vmatmul.f32.gmra.mxu2 %v2895_v36  ;;  %v2906_v50 = vld [vmem:[%s9314_s4 + $0x68] sm:$0xff]  ;;  %v2913_v19 = vld [vmem:[%s9314_s4 + $0xa0] sm:$0xff] }
 0x3e6   : > { %v2918_v36 = vld [vmem:[%s9314_s4 + $0xc8] sm:$0xff] }
 0x3e9   : > { %v2743_v2 = vpop.f32.mrf.mxu0  ;;  %v2844_v24 = vpop.f32.mrf.mxu1 }
 0x3ea   : > { %v2845_v43 = vadd.f32 %v2844_v24, %v2743_v2  ;;  %v2905_v24 = vld [vmem:[%s9314_s4 + $0x60] sm:$0xff] }
 0x3ec   : > { %v2559_v5 = vpop.f32.mrf.mxu2  ;;  %v2660_v37 = vpop.f32.mrf.mxu3 }
 0x3ed   : > { %v2661_v52 = vadd.f32 %v2660_v37, %v2559_v5  ;;  %3039 = vmatmul.f32.gmra.mxu2 %v2897_v32  ;;  %v2917_v5 = vld [vmem:[%s9314_s4 + $0xc0] sm:$0xff]  ;;  %v2912_v37 = vld [vmem:[%s9314_s4 + $0x98] sm:$0xff] }
 0x3ee   : > { %v2933_v32 = vld [vmem:[%s9314_s4 + $0x140] sm:$0xff] }
 0x3f1   : > { %v2746_v56 = vpop.f32.mrf.mxu0  ;;  %v2847_v7 = vpop.f32.mrf.mxu1 }
 0x3f2   : > { %v2848_v23 = vadd.f32 %v2847_v7, %v2746_v56  ;;  %v2637_v56 = vadd.f32 %v7583_v51, %v7581_v61  ;;  %v9529_v61 = vld [vmem:[#allocation78_spill] sm:$0xff]  ;;  %v2900_v7 = vld [vmem:[%s9314_s4 + $0x38] sm:$0xff] }
 0x3f3   : > { %v2631_v51 = vadd.f32 %v9529_v61, %v9528_v13  ;;  %v2936_v61 = vld [vmem:[%s9314_s4 + $0x158] sm:$0xff] }
 0x3f4   : > { %v2887_v29 = vmax.f32 %v2646_v40, %v2848_v23  ;;  %v2884_v30 = vmax.f32 %v2637_v56, %v2839_v38  ;;  %v2937_v38 = vld [vmem:[%s9314_s4 + $0x160] sm:$0xff] }
 0x3f5   : > { %v2882_v2 = vmax.f32 %v2631_v51, %v2833_v12  ;;  %v2934_v12 = vld [vmem:[%s9314_s4 + $0x148] sm:$0xff] }
 0x3f9   : > { %v2749_v22 = vpop.f32.mrf.mxu0  ;;  %v2850_v54 = vpop.f32.mrf.mxu1 }
 0x3fa   : > { %v2851_v18 = vadd.f32 %v2850_v54, %v2749_v22  ;;  %v2902_v22 = vld [vmem:[%s9314_s4 + $0x48] sm:$0xff]  ;;  %v2909_v54 = vld [vmem:[%s9314_s4 + $0x80] sm:$0xff] }
 0x401   : > { %v2752_v55 = vpop.f32.mrf.mxu0  ;;  %v2853_v44 = vpop.f32.mrf.mxu1 }
 0x402   : > { %v2854_v42 = vadd.f32 %v2853_v44, %v2752_v55  ;;  %v2643_v55 = vadd.f32 %v2642_v62, %v2541_v58  ;;  %v2842_v44 = vadd.f32 %v2841_v16, %v2740_v1  ;;  %v2899_v58 = vld [vmem:[%s9314_s4 + $0x30] sm:$0xff]  ;;  %v9530_v62 = vld [vmem:[#allocation46_spill] sm:$0xff] }
 0x403   : > { %3042 = vmatmul.f32.gmra.mxu2 %v2899_v58  ;;  %v9531_v1 = vld [vmem:[#allocation14_spill] sm:$0xff] }
 0x404   : > { %v2889_v53 = vmax.f32 %v2652_v26, %v2854_v42  ;;  %v2886_v3 = vmax.f32 %v2643_v55, %v2845_v43  ;;  %v2885_v0 = vmax.f32 %v2640_v33, %v2842_v44  ;;  %v2628_v16 = vadd.f32 %v9531_v1, %v9530_v62  ;;  %v2929_v26 = vld [vmem:[%s9314_s4 + $0x120] sm:$0xff]  ;;  %v2935_v55 = vld [vmem:[%s9314_s4 + $0x150] sm:$0xff]  ;;  %v2930_v33 = vld [vmem:[%s9314_s4 + $0x128] sm:$0xff] }
 0x405   : > { %v3247_v62 = vld [vmem:[%s9315_s5 + $0xe0] sm:$0xff]  ;;  %v3248_v1 = vld [vmem:[%s9315_s5 + $0xe8] sm:$0xff] }
 0x406   : > { %v2881_v41 = vmax.f32 %v2628_v16, %v2830_v17  ;;  %v3249_v17 = vld [vmem:[%s9315_s5 + $0xf0] sm:$0xff]  ;;  %v2938_v16 = vld [vmem:[%s9314_s4 + $0x168] sm:$0xff] }
 0x407   : > { %3437 = vmatpush.msra.mxu0 %v3249_v17  ;;  %v5259_v17 = vld [vmem:[%s9315_s5 + $0x188] sm:$0xff] }
 0x409   : > { %v2755_v25 = vpop.f32.mrf.mxu0  ;;  %v2856_v35 = vpop.f32.mrf.mxu1  ;;  %3438 = vmatpush.msra.mxu0 %v3247_v62  ;;  %v3224_v62 = vld [vmem:[%s9315_s5 + $0x28] sm:$0xff] }
 0x40a   : > { %v2857_v39 = vadd.f32 %v2856_v35, %v2755_v25  ;;  %v2888_v25 = vmax.f32 %v2649_v63, %v2851_v18  ;;  %v2911_v35 = vld [vmem:[%s9314_s4 + $0x90] sm:$0xff] }
 0x40b   : > { %3045 = vmatmul.f32.gmra.mxu2 %v2901_v47  ;;  %v2931_v63 = vld [vmem:[%s9314_s4 + $0x130] sm:$0xff]  ;;  %v3243_v47 = vld [vmem:[%s9315_s5 + $0xc0] sm:$0xff] }
 0x40c   : > { %v2890_v15 = vmax.f32 %v2655_v6, %v2857_v39  ;;  %v2927_v6 = vld [vmem:[%s9314_s4 + $0x110] sm:$0xff] }
 0x411   : > { %v2758_v59 = vpop.f32.mrf.mxu0  ;;  %v2859_v10 = vpop.f32.mrf.mxu1 }
 0x412   : > { %v2860_v60 = vadd.f32 %v2859_v10, %v2758_v59  ;;  %v2908_v59 = vld [vmem:[%s9314_s4 + $0x78] sm:$0xff]  ;;  %v2915_v10 = vld [vmem:[%s9314_s4 + $0xb0] sm:$0xff] }
 0x413   : > { %3048 = vmatmul.f32.gmra.mxu2 %v2903_v48 }
 0x414   : > { %v2891_v20 = vmax.f32 %v2658_v21, %v2860_v60  ;;  %v2916_v60 = vld [vmem:[%s9314_s4 + $0xb8] sm:$0xff]  ;;  %v2925_v21 = vld [vmem:[%s9314_s4 + $0x100] sm:$0xff] }
 0x419   : > { %v2761_v57 = vpop.f32.mrf.mxu0  ;;  %v2862_v31 = vpop.f32.mrf.mxu1 }
 0x41a   : > { %v2863_v34 = vadd.f32 %v2862_v31, %v2761_v57  ;;  %v2919_v57 = vld [vmem:[%s9314_s4 + $0xd0] sm:$0xff]  ;;  %v2914_v31 = vld [vmem:[%s9314_s4 + $0xa8] sm:$0xff] }
 0x41b   : > { %3051 = vmatmul.f32.gmra.mxu2 %v2905_v24  ;;  %v3242_v24 = vld [vmem:[%s9315_s5 + $0xb8] sm:$0xff] }
 0x41c   : > { %v2892_v46 = vmax.f32 %v2661_v52, %v2863_v34  ;;  %v2921_v52 = vld [vmem:[%s9314_s4 + $0xe0] sm:$0xff]  ;;  %v2923_v34 = vld [vmem:[%s9314_s4 + $0xf0] sm:$0xff] }
 0x41e   : > { %5217 = vmatpush.msk.msrb.mxu3 %vm627_vm0, %v2892_v46  ;;  %v2920_v46 = vld [vmem:[%s9314_s4 + $0xd8] sm:$0xff] }
 0x420   : > { %3111 = vmatpush.msrb.mxu3 %v2891_v20  ;;  %v2922_v20 = vld [vmem:[%s9314_s4 + $0xe8] sm:$0xff] }
 0x422   : > { %3112 = vmatpush.msrb.mxu3 %v2890_v15  ;;  %v2924_v15 = vld [vmem:[%s9314_s4 + $0xf8] sm:$0xff] }
 0x423   : > { %3054 = vmatmul.f32.gmra.mxu2 %v2907_v14  ;;  %v3240_v14 = vld [vmem:[%s9315_s5 + $0xa8] sm:$0xff] }
 0x424   : > { %3113 = vmatpush.msrb.mxu3 %v2889_v53  ;;  %v2926_v53 = vld [vmem:[%s9314_s4 + $0x108] sm:$0xff] }
 0x426   : > { %3114 = vmatpush.msrb.mxu3 %v2888_v25  ;;  %v2928_v25 = vld [vmem:[%s9314_s4 + $0x118] sm:$0xff] }
 0x428   : > { %3115 = vmatpush.msrb.mxu3 %v2887_v29 }
 0x42a   : > { %3116 = vmatpush.msrb.mxu3 %v2886_v3 }
 0x42b   : > { %3057 = vmatmul.f32.gmra.mxu2 %v2909_v54  ;;  %v2940_v54 = vld [vmem:[%s9314_s4 + $0x178] sm:$0xff] }
 0x42c   : > { %3117 = vmatpush.msrb.mxu3 %v2885_v0  ;;  %v2939_v0 = vld [vmem:[%s9314_s4 + $0x170] sm:$0xff] }
 0x42e   : > { %3118 = vmatpush.msrb.mxu3 %v2884_v30 }
 0x430   : > { %3119 = vmatpush.msrb.mxu3 %v2883_v4  ;;  %v3250_v4 = vld [vmem:[%s9315_s5 + $0xf8] sm:$0xff] }
 0x431   : > { %3490 = vmatpush.msra.mxu1 %v3250_v4  ;;  %v3223_v4 = vld [vmem:[%s9315_s5 + $0x20] sm:$0xff] }
 0x432   : > { %3120 = vmatpush.msrb.mxu3 %v2882_v2 }
 0x433   : > { %3060 = vmatmul.f32.gmra.mxu2 %v2911_v35  ;;  %3491 = vmatpush.msra.mxu1 %v3248_v1  ;;  %v3237_v35 = vld [vmem:[%s9315_s5 + $0x90] sm:$0xff] }
 0x434   : > { %3121 = vmatpush.msrb.mxu3 %v2881_v41  ;;  %v3245_v41 = vld [vmem:[%s9315_s5 + $0xd0] sm:$0xff] }
 0x435   : > { %5218 = vmatmul.msk.f32.vlgmr.msrb.gmra.mxu3 %vm2941_vm6, %v2894_v8  ;;  %v3246_v8 = vld [vmem:[%s9315_s5 + $0xd8] sm:$0xff]  ;;  %3439 = vmatpush.msra.mxu0 %v3245_v41  ;;  %v5256_v1 = vld [vmem:[%s9315_s5 + $0x170] sm:$0xff] }
 0x436   : > { %3492 = vmatpush.msra.mxu1 %v3246_v8  ;;  %v3221_v41 = vld [vmem:[%s9315_s5 + $0x10] sm:$0xff]  ;;  %v3222_v8 = vld [vmem:[%s9315_s5 + $0x18] sm:$0xff] }
 0x437   : > { %3440 = vmatpush.msra.mxu0 %v3243_v47  ;;  %v5254_v47 = vld [vmem:[%s9315_s5 + $0x160] sm:$0xff] }
 0x43b   : > { %3063 = vmatmul.f32.gmra.mxu2 %v2913_v19  ;;  %v5270_v19 = vld [vmem:[%s9315_s5 + $0x1e0] sm:$0xff] }
 0x43d   : > { %5219 = vmatmul.msk.f32.gmra.mxu3 %vm2941_vm6, %v2896_v27  ;;  %v3244_v27 = vld [vmem:[%s9315_s5 + $0xc8] sm:$0xff] }
 0x43e   : > { %3493 = vmatpush.msra.mxu1 %v3244_v27  ;;  %v5255_v27 = vld [vmem:[%s9315_s5 + $0x168] sm:$0xff] }
 0x440   : > { %3494 = vmatpush.msra.mxu1 %v3242_v24  ;;  %v3220_v24 = vld [vmem:[%s9315_s5 + $0x8] sm:$0xff] }
 0x442   : > { %3495 = vmatpush.msra.mxu1 %v3240_v14  ;;  %v5253_v14 = vld [vmem:[%s9315_s5 + $0x158] sm:$0xff] }
 0x443   : > { %3066 = vmatmul.f32.gmra.mxu2 %v2915_v10 }
 0x445   : > { %5220 = vmatmul.msk.f32.gmra.mxu3 %vm2941_vm6, %v2898_v49  ;;  %v3241_v49 = vld [vmem:[%s9315_s5 + $0xb0] sm:$0xff] }
 0x446   : > { %3441 = vmatpush.msra.mxu0 %v3241_v49  ;;  %v3219_v49 = vld [vmem:[%s9315_s5] sm:$0xff] }
 0x44b   : > { %3069 = vmatmul.f32.gmra.mxu2 %v2917_v5  ;;  %v5268_v5 = vld [vmem:[%s9315_s5 + $0x1d0] sm:$0xff] }
 0x44d   : > { %5221 = vmatmul.msk.f32.gmra.mxu3 %vm2941_vm6, %v2900_v7  ;;  %v3239_v7 = vld [vmem:[%s9315_s5 + $0xa0] sm:$0xff] }
 0x44e   : > { %3442 = vmatpush.msra.mxu0 %v3239_v7  ;;  %v5252_v7 = vld [vmem:[%s9315_s5 + $0x150] sm:$0xff] }
 0x450   : > { %3443 = vmatpush.msra.mxu0 %v3237_v35  ;;  %v5251_v35 = vld [vmem:[%s9315_s5 + $0x148] sm:$0xff] }
 0x453   : > { %3072 = vmatmul.f32.gmra.mxu2 %v2919_v57  ;;  %v5269_v57 = vld [vmem:[%s9315_s5 + $0x1d8] sm:$0xff] }
 0x455   : > { %5222 = vmatmul.msk.f32.gmra.mxu3 %vm2941_vm6, %v2902_v22  ;;  %v5272_v22 = vld [vmem:[%s9315_s5 + $0x1f0] sm:$0xff] }
 0x456   : > { %3331 = vmatpush.msra.mxu2 %v5272_v22 }
 0x458   : > { %3332 = vmatpush.msra.mxu2 %v5270_v19  ;;  %v5249_v19 = vld [vmem:[%s9315_s5 + $0x138] sm:$0xff] }
 0x45a   : > { %3333 = vmatpush.msra.mxu2 %v5268_v5  ;;  %v5244_v5 = vld [vmem:[%s9315_s5 + $0x110] sm:$0xff] }
 0x45b   : > { %3075 = vmatmul.f32.gmra.mxu2 %v2921_v52  ;;  %v3233_v52 = vld [vmem:[%s9315_s5 + $0x70] sm:$0xff] }
 0x45d   : > { %5223 = vmatmul.msk.f32.gmra.mxu3 %vm2941_vm6, %v2904_v11  ;;  %v5273_v11 = vld [vmem:[%s9315_s5 + $0x1f8] sm:$0xff] }
 0x45e   : > { %3384 = vmatpush.msra.mxu3 %v5273_v11  ;;  %v5250_v11 = vld [vmem:[%s9315_s5 + $0x140] sm:$0xff] }
 0x460   : > { %v7754_v39 = vpop.f32.mrf.mxu2 }
 0x463   : > { %3078 = vmatmul.f32.gmra.mxu2 %v2923_v34  ;;  %v5266_v34 = vld [vmem:[%s9315_s5 + $0x1c0] sm:$0xff] }
 0x464   : > { %3334 = vmatpush.msra.mxu2 %v5266_v34 }
 0x465   : > { %5224 = vmatmul.msk.f32.gmra.mxu3 %vm2941_vm6, %v2906_v50  ;;  %v3238_v50 = vld [vmem:[%s9315_s5 + $0x98] sm:$0xff] }
 0x466   : > { %3496 = vmatpush.msra.mxu1 %v3238_v50  ;;  %v5248_v50 = vld [vmem:[%s9315_s5 + $0x130] sm:$0xff] }
 0x468   : > { %v7763_v42 = vpop.f32.mrf.mxu2 }
 0x46b   : > { %3081 = vmatmul.f32.gmra.mxu2 %v2925_v21  ;;  %v3231_v21 = vld [vmem:[%s9315_s5 + $0x60] sm:$0xff] }
 0x46d   : > { %5225 = vmatmul.msk.f32.gmra.mxu3 %vm2941_vm6, %v2908_v59  ;;  %v5271_v59 = vld [vmem:[%s9315_s5 + $0x1e8] sm:$0xff] }
 0x46e   : > { %3385 = vmatpush.msra.mxu3 %v5271_v59  ;;  %v5246_v59 = vld [vmem:[%s9315_s5 + $0x120] sm:$0xff] }
 0x470   : > { %v7772_v18 = vpop.f32.mrf.mxu2  ;;  %3386 = vmatpush.msra.mxu3 %v5269_v57 }
 0x473   : > { %3084 = vmatmul.f32.gmra.mxu2 %v2927_v6  ;;  %v5264_v6 = vld [vmem:[%s9315_s5 + $0x1b0] sm:$0xff] }
 0x474   : > { %3335 = vmatpush.msra.mxu2 %v5264_v6 }
 0x475   : > { %5226 = vmatmul.msk.f32.gmra.mxu3 %vm2941_vm6, %v2910_v45  ;;  %v3235_v45 = vld [vmem:[%s9315_s5 + $0x80] sm:$0xff] }
 0x476   : > { %3444 = vmatpush.msra.mxu0 %v3235_v45  ;;  %v5247_v45 = vld [vmem:[%s9315_s5 + $0x128] sm:$0xff] }
 0x478   : > { %3445 = vmatpush.msra.mxu0 %v3233_v52  ;;  %v5242_v52 = vld [vmem:[%s9315_s5 + $0x100] sm:$0xff] }
 0x47a   : > { %3446 = vmatpush.msra.mxu0 %v3231_v21 }
 0x47b   : > { %3087 = vmatmul.f32.gmra.mxu2 %v2929_v26  ;;  %v3229_v26 = vld [vmem:[%s9315_s5 + $0x50] sm:$0xff] }
 0x47c   : > { %3447 = vmatpush.msra.mxu0 %v3229_v26 }
 0x47d   : > { %5227 = vmatmul.msk.f32.gmra.mxu3 %vm2941_vm6, %v2912_v37  ;;  %v3236_v37 = vld [vmem:[%s9315_s5 + $0x88] sm:$0xff] }
 0x47e   : > { %3497 = vmatpush.msra.mxu1 %v3236_v37  ;;  %v5245_v37 = vld [vmem:[%s9315_s5 + $0x118] sm:$0xff] }
 0x483   : > { %3090 = vmatmul.f32.gmra.mxu2 %v2931_v63  ;;  %v5262_v63 = vld [vmem:[%s9315_s5 + $0x1a0] sm:$0xff] }
 0x484   : > { %3336 = vmatpush.msra.mxu2 %v5262_v63 }
 0x485   : > { %5228 = vmatmul.msk.f32.gmra.mxu3 %vm2941_vm6, %v2914_v31 }
 0x486   : > { %v7781_v23 = vpop.f32.mrf.mxu2 }
 0x48b   : > { %3093 = vmatmul.f32.gmra.mxu2 %v2933_v32  ;;  %v3227_v32 = vld [vmem:[%s9315_s5 + $0x40] sm:$0xff] }
 0x48c   : > { %3448 = vmatpush.msra.mxu0 %v3227_v32 }
 0x48d   : > { %5229 = vmatmul.msk.f32.gmra.mxu3 %vm2941_vm6, %v2916_v60  ;;  %v3234_v60 = vld [vmem:[%s9315_s5 + $0x78] sm:$0xff] }
 0x48e   : > { %v7792_v43 = vpop.f32.mrf.mxu2  ;;  %3498 = vmatpush.msra.mxu1 %v3234_v60  ;;  %v5243_v60 = vld [vmem:[%s9315_s5 + $0x108] sm:$0xff] }
 0x493   : > { %3096 = vmatmul.f32.gmra.mxu2 %v2935_v55  ;;  %v5260_v55 = vld [vmem:[%s9315_s5 + $0x190] sm:$0xff] }
 0x494   : > { %3337 = vmatpush.msra.mxu2 %v5260_v55 }
 0x495   : > { %5230 = vmatmul.msk.f32.gmra.mxu3 %vm2941_vm6, %v2918_v36  ;;  %v5267_v36 = vld [vmem:[%s9315_s5 + $0x1c8] sm:$0xff] }
 0x496   : > { %v7803_v29 = vpop.f32.mrf.mxu2  ;;  %3387 = vmatpush.msra.mxu3 %v5267_v36 }
 0x49b   : > { %3099 = vmatmul.f32.gmra.mxu2 %v2937_v38  ;;  %v5261_v38 = vld [vmem:[%s9315_s5 + $0x198] sm:$0xff] }
 0x49d   : > { %5231 = vmatmul.msk.f32.gmra.mxu3 %vm2941_vm6, %v2920_v46  ;;  %v3232_v46 = vld [vmem:[%s9315_s5 + $0x68] sm:$0xff] }
 0x49e   : > { %v7814_v56 = vpop.f32.mrf.mxu2  ;;  %3499 = vmatpush.msra.mxu1 %v3232_v46 }
 0x4a3   : > { %3102 = vmatmul.f32.gmra.mxu2 %v2939_v0  ;;  %v3225_v0 = vld [vmem:[%s9315_s5 + $0x30] sm:$0xff] }
 0x4a4   : > { %3449 = vmatpush.msra.mxu0 %v3225_v0 }
 0x4a5   : > { %5232 = vmatmul.msk.f32.gmra.mxu3 %vm2941_vm6, %v2922_v20  ;;  %v5265_v20 = vld [vmem:[%s9315_s5 + $0x1b8] sm:$0xff] }
 0x4a6   : > { %v7825_v28 = vpop.f32.mrf.mxu2  ;;  %3388 = vmatpush.msra.mxu3 %v5265_v20  ;;  %3450 = vmatpush.msra.mxu0 %v3223_v4 }
 0x4a8   : > { %3451 = vmatpush.msra.mxu0 %v3221_v41 }
 0x4aa   : > { %3452 = vmatpush.msra.mxu0 %v3219_v49 }
 0x4ad   : > { %5233 = vmatmul.msk.f32.gmra.mxu3 %vm2941_vm6, %v2924_v15  ;;  %v3230_v15 = vld [vmem:[%s9315_s5 + $0x58] sm:$0xff] }
 0x4ae   : > { %v7833_v13 = vpop.f32.mrf.mxu2  ;;  %3500 = vmatpush.msra.mxu1 %v3230_v15 }
 0x4b5   : > { %5234 = vmatmul.msk.f32.gmra.mxu3 %vm2941_vm6, %v2926_v53  ;;  %v5263_v53 = vld [vmem:[%s9315_s5 + $0x1a8] sm:$0xff] }
 0x4b6   : > { %v7856_v2 = vpop.f32.mrf.mxu2  ;;  %3389 = vmatpush.msra.mxu3 %v5263_v53 }
 0x4b8   : > { %v7790_v40 = vpop.f32.mrf.mxu3  ;;  %3390 = vmatpush.msra.mxu3 %v5261_v38 }
 0x4b9   : > { %v3124_v6 = vadd.f32 %v7790_v40, %v7754_v39 }
 0x4ba   : > { %3391 = vmatpush.msra.mxu3 %v5259_v17 }
 0x4bd   : > { %5235 = vmatmul.msk.f32.gmra.mxu3 %vm2941_vm6, %v2928_v25  ;;  %v3228_v25 = vld [vmem:[%s9315_s5 + $0x48] sm:$0xff] }
 0x4be   : > { %v7906_v10 = vpop.f32.mrf.mxu2  ;;  %3501 = vmatpush.msra.mxu1 %v3228_v25 }
 0x4c0   : > { %v7801_v44 = vpop.f32.mrf.mxu3 }
 0x4c1   : > { %v3127_v32 = vadd.f32 %v7801_v44, %v7763_v42 }
 0x4c5   : > { %5236 = vmatmul.msk.f32.gmra.mxu3 %vm2941_vm6, %v2930_v33 }
 0x4c6   : > { %v7968_v33 = vpop.f32.mrf.mxu2 }
 0x4c8   : > { %v7812_v3 = vpop.f32.mrf.mxu3 }
 0x4cd   : > { %5237 = vmatmul.msk.f32.gmra.mxu3 %vm2941_vm6, %v2932_v9 }
 0x4d0   : > { %v7823_v58 = vpop.f32.mrf.mxu3 }
 0x4d5   : > { %5238 = vmatmul.msk.f32.gmra.mxu3 %vm2941_vm6, %v2934_v12  ;;  %v3226_v12 = vld [vmem:[%s9315_s5 + $0x38] sm:$0xff] }
 0x4d6   : > { %3502 = vmatpush.msra.mxu1 %v3226_v12 }
 0x4d8   : > { %v7831_v30 = vpop.f32.mrf.mxu3  ;;  %3503 = vmatpush.msra.mxu1 %v3224_v62  ;;  %v3130_v62 = vadd.f32 %v7812_v3, %v7772_v18 }
 0x4da   : > { %3504 = vmatpush.msra.mxu1 %v3222_v8 }
 0x4dc   : > { %3505 = vmatpush.msra.mxu1 %v3220_v24 }
 0x4dd   : > { %5239 = vmatmul.msk.f32.gmra.mxu3 %vm2941_vm6, %v2936_v61  ;;  %v5258_v61 = vld [vmem:[%s9315_s5 + $0x180] sm:$0xff] }
 0x4de   : > { %3338 = vmatpush.msra.mxu2 %v5258_v61 }
 0x4e0   : > { %v7839_v51 = vpop.f32.mrf.mxu3  ;;  %3339 = vmatpush.msra.mxu2 %v5256_v1 }
 0x4e2   : > { %3340 = vmatpush.msra.mxu2 %v5254_v47 }
 0x4e4   : > { %3341 = vmatpush.msra.mxu2 %v5252_v7 }
 0x4e5   : > { %5240 = vmatmul.msk.f32.gmra.mxu3 %vm2941_vm6, %v2938_v16  ;;  %v5257_v16 = vld [vmem:[%s9315_s5 + $0x178] sm:$0xff] }
 0x4e6   : > { %3392 = vmatpush.msra.mxu3 %v5257_v16  ;;  %3342 = vmatpush.msra.mxu2 %v5250_v11 }
 0x4e8   : > { %v7871_v48 = vpop.f32.mrf.mxu3  ;;  %3393 = vmatpush.msra.mxu3 %v5255_v27  ;;  %3343 = vmatpush.msra.mxu2 %v5248_v50 }
 0x4ea   : > { %3394 = vmatpush.msra.mxu3 %v5253_v14  ;;  %3344 = vmatpush.msra.mxu2 %v5246_v59 }
 0x4ec   : > { %3395 = vmatpush.msra.mxu3 %v5251_v35  ;;  %3345 = vmatpush.msra.mxu2 %v5244_v5 }
 0x4ed   : > { %5241 = vmatmul.msk.f32.gmra.mxu3 %vm2941_vm6, %v2940_v54  ;;  %v3070_v54 = vpop.f32.mrf.mxu2 }
 0x4ee   : > { %3396 = vmatpush.msra.mxu3 %v5249_v19  ;;  %3346 = vmatpush.msra.mxu2 %v5242_v52 }
 0x4f0   : > { %v7921_v31 = vpop.f32.mrf.mxu3  ;;  %3397 = vmatpush.msra.mxu3 %v5247_v45 }
 0x4f2   : > { %3398 = vmatpush.msra.mxu3 %v5245_v37 }
 0x4f4   : > { %3399 = vmatpush.msra.mxu3 %v5243_v60 }
 0x4f5   : > { %v3073_v34 = vpop.f32.mrf.mxu2 }
 0x4f8   : > { %v7973_v9 = vpop.f32.mrf.mxu3 }
 0x4fd   : > { %v3076_v21 = vpop.f32.mrf.mxu2 }
 0x500   : > { %v8023_v22 = vpop.f32.mrf.mxu3 }
 0x505   : > { %v3079_v63 = vpop.f32.mrf.mxu2 }
 0x508   : > { %v8049_v57 = vpop.f32.mrf.mxu3 }
 0x50d   : > { %v3082_v16 = vpop.f32.mrf.mxu2 }
 0x510   : > { %v8057_v36 = vpop.f32.mrf.mxu3 }
 0x515   : > { %v3085_v45 = vpop.f32.mrf.mxu2 }
 0x518   : > { %v3159_v46 = vpop.f32.mrf.mxu3 }
 0x519   : > { %v3160_v20 = vadd.f32 %v3159_v46, %v3070_v54  ;;  %v3133_v54 = vadd.f32 %v7823_v58, %v7781_v23 }
 0x51b   : > { %v3195_v26 = vmax.f32 %v3124_v6, %v3160_v20 }
 0x51d   : > { %v3207_v15 = vmax.f32 %v3195_v26, 0.0 }
 0x51f   : > { %3453 = vmatmul.f32.vlgmr.msra.gmra.mxu0 %v3207_v15  ;;  %3506 = vmatmul.f32.vlgmr.msra.gmra.mxu1 %v3207_v15  ;;  %v3296_v0 = vrot.slane %v3207_v15, 1  ;;  %v3774_v12 = vrot.slane %v3207_v15, 3  ;;  %v3576_v61 = vrot.slane %v3207_v15, 2  ;;  %v3972_v41 = vrot.slane %v3207_v15, 4 }
 0x520   : > { %v3162_v53 = vpop.f32.mrf.mxu3 }
 0x521   : > { %v3163_v25 = vadd.f32 %v3162_v53, %v3073_v34 }
 0x523   : > { %v3196_v55 = vmax.f32 %v3127_v32, %v3163_v25  ;;  %v3088_v32 = vpop.f32.mrf.mxu2 }
 0x525   : > { %v3208_v38 = vmax.f32 %v3196_v55, 0.0 }
 0x527   : > { %3456 = vmatmul.f32.gmra.mxu0 %v3208_v38  ;;  %3509 = vmatmul.f32.gmra.mxu1 %v3208_v38  ;;  %v3297_v17 = vrot.slane %v3208_v38, 1  ;;  %v3775_v39 = vrot.slane %v3208_v38, 3  ;;  %v3577_v40 = vrot.slane %v3208_v38, 2  ;;  %v3973_v4 = vrot.slane %v3208_v38, 4 }
 0x528   : > { %v3165_v1 = vpop.f32.mrf.mxu3 }
 0x529   : > { %v3166_v8 = vadd.f32 %v3165_v1, %v3076_v21  ;;  %v3298_v42 = vsel %vm514_vm2, %v3296_v0, %v3297_v17  ;;  %v8067_v44 = vsel %vm1494_vm3, %v3774_v12, %v3775_v39  ;;  %v8070_v47 = vsel %vm1109_vm4, %v3576_v61, %v3577_v40  ;;  %v5336_v61 = vld [vmem:[%s9315_s5 + $0x3f0] sm:$0xff] }
 0x52a   : > { %3347 = vmatmul.f32.vlgmr.msra.gmra.mxu2 %v3298_v42  ;;  %3400 = vmatmul.f32.vlgmr.msra.gmra.mxu3 %v3298_v42  ;;  %v8073_v27 = vsel %vm627_vm0, %v3972_v41, %v3973_v4  ;;  %v3136_v21 = vadd.f32 %v7831_v30, %v7792_v43  ;;  %v3139_v0 = vadd.f32 %v7839_v51, %v7803_v29  ;;  %v5334_v29 = vld [vmem:[%s9315_s5 + $0x3e0] sm:$0xff]  ;;  %v5335_v51 = vld [vmem:[%s9315_s5 + $0x3e8] sm:$0xff]  ;;  %v5332_v41 = vld [vmem:[%s9315_s5 + $0x3d0] sm:$0xff] }
 0x52b   : > { %v3197_v49 = vmax.f32 %v3130_v62, %v3166_v8  ;;  %3809 = vmatpush.msrb.mxu0 %v5336_v61  ;;  %v5333_v8 = vld [vmem:[%s9315_s5 + $0x3d8] sm:$0xff]  ;;  %v3145_v61 = vadd.f32 %v7921_v31, %v7825_v28  ;;  %v5298_v28 = vld [vmem:[%s9315_s5 + $0x2c0] sm:$0xff]  ;;  %v5299_v31 = vld [vmem:[%s9315_s5 + $0x2c8] sm:$0xff] }
 0x52d   : > { %v3209_v24 = vmax.f32 %v3197_v49, 0.0  ;;  %3810 = vmatpush.msrb.mxu0 %v5334_v29  ;;  %v5330_v49 = vld [vmem:[%s9315_s5 + $0x3c0] sm:$0xff]  ;;  %v5323_v29 = vld [vmem:[%s9315_s5 + $0x388] sm:$0xff] }
 0x52f   : > { %3459 = vmatmul.f32.gmra.mxu0 %v3209_v24  ;;  %3512 = vmatmul.f32.gmra.mxu1 %v3209_v24  ;;  %v3299_v18 = vrot.slane %v3209_v24, 1  ;;  %v3777_v3 = vrot.slane %v3209_v24, 3  ;;  %v3579_v7 = vrot.slane %v3209_v24, 2  ;;  %v3975_v14 = vrot.slane %v3209_v24, 4  ;;  %v5331_v24 = vld [vmem:[%s9315_s5 + $0x3c8] sm:$0xff] }
 0x530   : > { %v3168_v11 = vpop.f32.mrf.mxu3  ;;  %3811 = vmatpush.msrb.mxu0 %v5332_v41 }
 0x531   : > { %v3169_v35 = vadd.f32 %v3168_v11, %v3079_v63  ;;  %v3300_v50 = vsel %vm514_vm2, %v3297_v17, %v3299_v18  ;;  %v8079_v19 = vsel %vm1494_vm3, %v3775_v39, %v3777_v3  ;;  %v8082_v59 = vsel %vm1109_vm4, %v3577_v40, %v3579_v7  ;;  %v5337_v17 = vld [vmem:[%s9315_s5 + $0x3f8] sm:$0xff] }
 0x532   : > { %3350 = vmatmul.f32.gmra.mxu2 %v3300_v50  ;;  %3403 = vmatmul.f32.gmra.mxu3 %v3300_v50  ;;  %v8085_v5 = vsel %vm627_vm0, %v3973_v4, %v3975_v14  ;;  %v3142_v11 = vadd.f32 %v7871_v48, %v7814_v56  ;;  %v5328_v50 = vld [vmem:[%s9315_s5 + $0x3b0] sm:$0xff]  ;;  %v5326_v56 = vld [vmem:[%s9315_s5 + $0x3a0] sm:$0xff]  ;;  %v5327_v48 = vld [vmem:[%s9315_s5 + $0x3a8] sm:$0xff] }
 0x533   : > { %v3198_v37 = vmax.f32 %v3133_v54, %v3169_v35  ;;  %3862 = vmatpush.msrb.mxu1 %v5337_v17  ;;  %3812 = vmatpush.msrb.mxu0 %v5330_v49 }
 0x535   : > { %v3210_v52 = vmax.f32 %v3198_v37, 0.0  ;;  %3863 = vmatpush.msrb.mxu1 %v5335_v51  ;;  %3813 = vmatpush.msrb.mxu0 %v5328_v50  ;;  %v5295_v50 = vld [vmem:[%s9315_s5 + $0x2a8] sm:$0xff] }
 0x537   : > { %3462 = vmatmul.f32.gmra.mxu0 %v3210_v52  ;;  %3515 = vmatmul.f32.gmra.mxu1 %v3210_v52  ;;  %v3301_v23 = vrot.slane %v3210_v52, 1  ;;  %v3779_v58 = vrot.slane %v3210_v52, 3  ;;  %v3581_v60 = vrot.slane %v3210_v52, 2  ;;  %v3977_v34 = vrot.slane %v3210_v52, 4 }
 0x538   : > { %v3171_v46 = vpop.f32.mrf.mxu3  ;;  %3864 = vmatpush.msrb.mxu1 %v5333_v8  ;;  %3814 = vmatpush.msrb.mxu0 %v5326_v56  ;;  %v5320_v8 = vld [vmem:[%s9315_s5 + $0x370] sm:$0xff]  ;;  %v3148_v56 = vadd.f32 %v7973_v9, %v7833_v13  ;;  %v5293_v9 = vld [vmem:[%s9315_s5 + $0x298] sm:$0xff] }
 0x539   : > { %v3172_v6 = vadd.f32 %v3171_v46, %v3082_v16  ;;  %v3302_v20 = vsel %vm514_vm2, %v3299_v18, %v3301_v23  ;;  %v8091_v26 = vsel %vm1494_vm3, %v3777_v3, %v3779_v58  ;;  %v8094_v15 = vsel %vm1109_vm4, %v3579_v7, %v3581_v60  ;;  %v3091_v18 = vpop.f32.mrf.mxu2  ;;  %v5305_v46 = vld [vmem:[%s9315_s5 + $0x2f8] sm:$0xff]  ;;  %v5292_v13 = vld [vmem:[%s9315_s5 + $0x290] sm:$0xff] }
 0x53a   : > { %3353 = vmatmul.f32.gmra.mxu2 %v3302_v20  ;;  %3406 = vmatmul.f32.gmra.mxu3 %v3302_v20  ;;  %v8097_v63 = vsel %vm627_vm0, %v3975_v14, %v3977_v34 }
 0x53b   : > { %v3199_v53 = vmax.f32 %v3136_v21, %v3172_v6  ;;  %3865 = vmatpush.msrb.mxu1 %v5331_v24  ;;  %v5304_v21 = vld [vmem:[%s9315_s5 + $0x2f0] sm:$0xff]  ;;  %3664 = vmatpush.msrb.mxu3 %v5305_v46 }
 0x53c   : > { %3611 = vmatpush.msrb.mxu2 %v5304_v21  ;;  %v5324_v6 = vld [vmem:[%s9315_s5 + $0x390] sm:$0xff]  ;;  %v5317_v21 = vld [vmem:[%s9315_s5 + $0x358] sm:$0xff] }
 0x53d   : > { %v3211_v25 = vmax.f32 %v3199_v53, 0.0  ;;  %v5325_v53 = vld [vmem:[%s9315_s5 + $0x398] sm:$0xff]  ;;  %3815 = vmatpush.msrb.mxu0 %v5324_v6 }
 0x53f   : > { %3465 = vmatmul.f32.gmra.mxu0 %v3211_v25  ;;  %3518 = vmatmul.f32.gmra.mxu1 %v3211_v25  ;;  %v3303_v43 = vrot.slane %v3211_v25, 1  ;;  %v3781_v30 = vrot.slane %v3211_v25, 3  ;;  %v3583_v55 = vrot.slane %v3211_v25, 2  ;;  %v3979_v38 = vrot.slane %v3211_v25, 4  ;;  %v5303_v25 = vld [vmem:[%s9315_s5 + $0x2e8] sm:$0xff] }
 0x540   : > { %v3174_v12 = vpop.f32.mrf.mxu3  ;;  %3665 = vmatpush.msrb.mxu3 %v5303_v25 }
 0x541   : > { %v3175_v39 = vadd.f32 %v3174_v12, %v3085_v45  ;;  %v3304_v40 = vsel %vm514_vm2, %v3301_v23, %v3303_v43  ;;  %v8109_v4 = vsel %vm1494_vm3, %v3779_v58, %v3781_v30  ;;  %v8118_v62 = vsel %vm1109_vm4, %v3581_v60, %v3583_v55  ;;  %v5329_v45 = vld [vmem:[%s9315_s5 + $0x3b8] sm:$0xff] }
 0x542   : > { %3356 = vmatmul.f32.gmra.mxu2 %v3304_v40  ;;  %3409 = vmatmul.f32.gmra.mxu3 %v3304_v40  ;;  %v8121_v1 = vsel %vm627_vm0, %v3977_v34, %v3979_v38  ;;  %v5322_v40 = vld [vmem:[%s9315_s5 + $0x380] sm:$0xff] }
 0x543   : > { %v3200_v16 = vmax.f32 %v3139_v0, %v3175_v39  ;;  %3866 = vmatpush.msrb.mxu1 %v5329_v45  ;;  %v3094_v39 = vpop.f32.mrf.mxu2  ;;  %3816 = vmatpush.msrb.mxu0 %v5322_v40  ;;  %v5288_v40 = vld [vmem:[%s9315_s5 + $0x270] sm:$0xff] }
 0x545   : > { %v8129_v42 = vmax.f32 %v3200_v16, 0.0  ;;  %3867 = vmatpush.msrb.mxu1 %v5327_v48  ;;  %3817 = vmatpush.msrb.mxu0 %v5320_v8  ;;  %v3151_v8 = vadd.f32 %v8023_v22, %v7856_v2  ;;  %v5286_v2 = vld [vmem:[%s9315_s5 + $0x260] sm:$0xff]  ;;  %v5287_v22 = vld [vmem:[%s9315_s5 + $0x268] sm:$0xff] }
 0x547   : > { %3468 = vmatmul.f32.gmra.mxu0 %v8129_v42  ;;  %3521 = vmatmul.f32.gmra.mxu1 %v8129_v42  ;;  %v3305_v3 = vrot.slane %v8129_v42, 1  ;;  %v3783_v7 = vrot.slane %v8129_v42, 3  ;;  %v3585_v14 = vrot.slane %v8129_v42, 2  ;;  %v3981_v54 = vrot.slane %v8129_v42, 4  ;;  %v5321_v42 = vld [vmem:[%s9315_s5 + $0x378] sm:$0xff] }
 0x548   : > { %v3177_v35 = vpop.f32.mrf.mxu3  ;;  %3868 = vmatpush.msrb.mxu1 %v5325_v53 }
 0x549   : > { %v3178_v37 = vadd.f32 %v3177_v35, %v3088_v32  ;;  %v3306_v52 = vsel %vm514_vm2, %v3303_v43, %v3305_v3  ;;  %v8153_v23 = vsel %vm1494_vm3, %v3781_v30, %v3783_v7  ;;  %v8156_v58 = vsel %vm1109_vm4, %v3583_v55, %v3585_v14  ;;  %v5302_v32 = vld [vmem:[%s9315_s5 + $0x2e0] sm:$0xff]  ;;  %v5300_v30 = vld [vmem:[%s9315_s5 + $0x2d0] sm:$0xff]  ;;  %v5301_v55 = vld [vmem:[%s9315_s5 + $0x2d8] sm:$0xff] }
 0x54a   : > { %3359 = vmatmul.f32.gmra.mxu2 %v3306_v52  ;;  %3412 = vmatmul.f32.gmra.mxu3 %v3306_v52  ;;  %v8165_v60 = vsel %vm627_vm0, %v3979_v38, %v3981_v54  ;;  %v5294_v35 = vld [vmem:[%s9315_s5 + $0x2a0] sm:$0xff] }
 0x54b   : > { %v3201_v34 = vmax.f32 %v3142_v11, %v3178_v37  ;;  %3612 = vmatpush.msrb.mxu2 %v5302_v32  ;;  %3666 = vmatpush.msrb.mxu3 %v5301_v55  ;;  %v5319_v11 = vld [vmem:[%s9315_s5 + $0x368] sm:$0xff]  ;;  %v3097_v25 = vpop.f32.mrf.mxu2 }
 0x54c   : > { %3869 = vmatpush.msrb.mxu1 %v5323_v29  ;;  %v5289_v29 = vld [vmem:[%s9315_s5 + $0x278] sm:$0xff] }
 0x54d   : > { %v8176_v20 = vmax.f32 %v3201_v34, 0.0  ;;  %3613 = vmatpush.msrb.mxu2 %v5300_v30  ;;  %3667 = vmatpush.msrb.mxu3 %v5299_v31  ;;  %v5316_v34 = vld [vmem:[%s9315_s5 + $0x350] sm:$0xff]  ;;  %v5315_v30 = vld [vmem:[%s9315_s5 + $0x348] sm:$0xff] }
 0x54e   : > { %3870 = vmatpush.msrb.mxu1 %v5321_v42 }
 0x54f   : > { %3471 = vmatmul.f32.gmra.mxu0 %v8176_v20  ;;  %3524 = vmatmul.f32.gmra.mxu1 %v8176_v20  ;;  %v3307_v43 = vrot.slane %v8176_v20, 1  ;;  %v3785_v38 = vrot.slane %v8176_v20, 3  ;;  %v3587_v0 = vrot.slane %v8176_v20, 2  ;;  %v3983_v12 = vrot.slane %v8176_v20, 4  ;;  %v5312_v20 = vld [vmem:[%s9315_s5 + $0x330] sm:$0xff] }
 0x550   : > { %v3180_v17 = vpop.f32.mrf.mxu3  ;;  %3614 = vmatpush.msrb.mxu2 %v5298_v28  ;;  %3871 = vmatpush.msrb.mxu1 %v5319_v11  ;;  %v5308_v11 = vld [vmem:[%s9315_s5 + $0x310] sm:$0xff] }
 0x551   : > { %v3181_v51 = vadd.f32 %v3180_v17, %v3091_v18  ;;  %v3308_v16 = vsel %vm514_vm2, %v3305_v3, %v3307_v43  ;;  %v8215_v41 = vsel %vm1494_vm3, %v3783_v7, %v3785_v38  ;;  %v8226_v49 = vsel %vm1109_vm4, %v3585_v14, %v3587_v0  ;;  %v5296_v3 = vld [vmem:[%s9315_s5 + $0x2b0] sm:$0xff]  ;;  %v5297_v7 = vld [vmem:[%s9315_s5 + $0x2b8] sm:$0xff]  ;;  %v5290_v17 = vld [vmem:[%s9315_s5 + $0x280] sm:$0xff] }
 0x552   : > { %3362 = vmatmul.f32.gmra.mxu2 %v3308_v16  ;;  %3415 = vmatmul.f32.gmra.mxu3 %v3308_v16  ;;  %v8231_v24 = vsel %vm627_vm0, %v3981_v54, %v3983_v12  ;;  %v5318_v54 = vld [vmem:[%s9315_s5 + $0x360] sm:$0xff] }
 0x553   : > { %v3202_v18 = vmax.f32 %v3145_v61, %v3181_v51  ;;  %3615 = vmatpush.msrb.mxu2 %v5296_v3  ;;  %3668 = vmatpush.msrb.mxu3 %v5297_v7  ;;  %v5311_v3 = vld [vmem:[%s9315_s5 + $0x328] sm:$0xff] }
 0x554   : > { %3818 = vmatpush.msrb.mxu0 %v5318_v54  ;;  %3872 = vmatpush.msrb.mxu1 %v5317_v21 }
 0x555   : > { %v8239_v14 = vmax.f32 %v3202_v18, 0.0  ;;  %3616 = vmatpush.msrb.mxu2 %v5294_v35  ;;  %3669 = vmatpush.msrb.mxu3 %v5295_v50  ;;  %v5310_v18 = vld [vmem:[%s9315_s5 + $0x320] sm:$0xff]  ;;  %v5309_v35 = vld [vmem:[%s9315_s5 + $0x318] sm:$0xff] }
 0x556   : > { %3819 = vmatpush.msrb.mxu0 %v5316_v34  ;;  %3873 = vmatpush.msrb.mxu1 %v5315_v30  ;;  %v3100_v34 = vpop.f32.mrf.mxu2  ;;  %v3154_v30 = vadd.f32 %v8049_v57, %v7906_v10  ;;  %v5278_v10 = vld [vmem:[%s9315_s5 + $0x220] sm:$0xff]  ;;  %v5279_v57 = vld [vmem:[%s9315_s5 + $0x228] sm:$0xff] }
 0x557   : > { %3474 = vmatmul.f32.gmra.mxu0 %v8239_v14  ;;  %3527 = vmatmul.f32.gmra.mxu1 %v8239_v14  ;;  %v3309_v45 = vrot.slane %v8239_v14, 1  ;;  %v3787_v37 = vrot.slane %v8239_v14, 3  ;;  %v3589_v52 = vrot.slane %v8239_v14, 2  ;;  %v3985_v46 = vrot.slane %v8239_v14, 4 }
 0x558   : > { %v3183_v48 = vpop.f32.mrf.mxu3  ;;  %3617 = vmatpush.msrb.mxu2 %v5292_v13  ;;  %3670 = vmatpush.msrb.mxu3 %v5293_v9 }
 0x559   : > { %v3184_v6 = vadd.f32 %v3183_v48, %v3094_v39  ;;  %v3310_v53 = vsel %vm514_vm2, %v3307_v43, %v3309_v45  ;;  %v8275_v32 = vsel %vm1494_vm3, %v3785_v38, %v3787_v37  ;;  %v5314_v43 = vld [vmem:[%s9315_s5 + $0x340] sm:$0xff]  ;;  %v8286_v55 = vsel %vm1109_vm4, %v3587_v0, %v3589_v52  ;;  %v5291_v39 = vld [vmem:[%s9315_s5 + $0x288] sm:$0xff]  ;;  %v5285_v48 = vld [vmem:[%s9315_s5 + $0x258] sm:$0xff] }
 0x55a   : > { %3365 = vmatmul.f32.gmra.mxu2 %v3310_v53  ;;  %3418 = vmatmul.f32.gmra.mxu3 %v3310_v53  ;;  %v8291_v38 = vsel %vm627_vm0, %v3983_v12, %v3985_v46  ;;  %v5313_v12 = vld [vmem:[%s9315_s5 + $0x338] sm:$0xff]  ;;  %v5283_v53 = vld [vmem:[%s9315_s5 + $0x248] sm:$0xff] }
 0x55b   : > { %v3203_v61 = vmax.f32 %v3148_v56, %v3184_v6  ;;  %3820 = vmatpush.msrb.mxu0 %v5314_v43  ;;  %3618 = vmatpush.msrb.mxu2 %v5290_v17  ;;  %v5282_v6 = vld [vmem:[%s9315_s5 + $0x240] sm:$0xff]  ;;  %v5280_v17 = vld [vmem:[%s9315_s5 + $0x230] sm:$0xff] }
 0x55c   : > { %3671 = vmatpush.msrb.mxu3 %v5291_v39  ;;  %3874 = vmatpush.msrb.mxu1 %v5313_v12  ;;  %v5281_v39 = vld [vmem:[%s9315_s5 + $0x238] sm:$0xff] }
 0x55d   : > { %v8299_v0 = vmax.f32 %v3203_v61, 0.0  ;;  %3821 = vmatpush.msrb.mxu0 %v5312_v20  ;;  %3619 = vmatpush.msrb.mxu2 %v5288_v40 }
 0x55e   : > { %3672 = vmatpush.msrb.mxu3 %v5289_v29  ;;  %3875 = vmatpush.msrb.mxu1 %v5311_v3 }
 0x55f   : > { %3477 = vmatmul.f32.gmra.mxu0 %v8299_v0  ;;  %3530 = vmatmul.f32.gmra.mxu1 %v8299_v0  ;;  %v3311_v51 = vrot.slane %v8299_v0, 1  ;;  %v3789_v16 = vrot.slane %v8299_v0, 3  ;;  %v3591_v28 = vrot.slane %v8299_v0, 2  ;;  %v3987_v31 = vrot.slane %v8299_v0, 4 }
 0x560   : > { %v3186_v42 = vpop.f32.mrf.mxu3  ;;  %3822 = vmatpush.msrb.mxu0 %v5310_v18  ;;  %3620 = vmatpush.msrb.mxu2 %v5286_v2  ;;  %v3103_v18 = vpop.f32.mrf.mxu2 }
 0x561   : > { %v3187_v7 = vadd.f32 %v3186_v42, %v3097_v25  ;;  %v3312_v14 = vsel %vm514_vm2, %v3309_v45, %v3311_v51  ;;  %v8335_v54 = vsel %vm1494_vm3, %v3787_v37, %v3789_v16  ;;  %v8344_v50 = vsel %vm1109_vm4, %v3589_v52, %v3591_v28  ;;  %v5284_v37 = vld [vmem:[%s9315_s5 + $0x250] sm:$0xff]  ;;  %3673 = vmatpush.msrb.mxu3 %v5287_v22  ;;  %v5306_v52 = vld [vmem:[%s9315_s5 + $0x300] sm:$0xff]  ;;  %v5277_v42 = vld [vmem:[%s9315_s5 + $0x218] sm:$0xff] }
 0x562   : > { %3368 = vmatmul.f32.gmra.mxu2 %v3312_v14  ;;  %3421 = vmatmul.f32.gmra.mxu3 %v3312_v14  ;;  %v8347_v45 = vsel %vm627_vm0, %v3985_v46, %v3987_v31  ;;  %v5307_v46 = vld [vmem:[%s9315_s5 + $0x308] sm:$0xff]  ;;  %v3157_v14 = vadd.f32 %v8057_v36, %v7968_v33  ;;  %v5274_v22 = vld [vmem:[%s9315_s5 + $0x200] sm:$0xff] }
 0x563   : > { %v3204_v56 = vmax.f32 %v3151_v8, %v3187_v7  ;;  %3823 = vmatpush.msrb.mxu0 %v5308_v11  ;;  %3876 = vmatpush.msrb.mxu1 %v5309_v35  ;;  %v5276_v8 = vld [vmem:[%s9315_s5 + $0x210] sm:$0xff]  ;;  %v5275_v11 = vld [vmem:[%s9315_s5 + $0x208] sm:$0xff] }
 0x564   : > { %3621 = vmatpush.msrb.mxu2 %v5284_v37  ;;  %3674 = vmatpush.msrb.mxu3 %v5285_v48 }
 0x565   : > { %v3216_v21 = vmax.f32 %v3204_v56, 0.0  ;;  %3824 = vmatpush.msrb.mxu0 %v5306_v52  ;;  %3877 = vmatpush.msrb.mxu1 %v5307_v46 }
 0x566   : > { %3622 = vmatpush.msrb.mxu2 %v5282_v6  ;;  %3675 = vmatpush.msrb.mxu3 %v5283_v53 }
 0x567   : > { %3480 = vmatmul.f32.gmra.mxu0 %v3216_v21  ;;  %3533 = vmatmul.f32.gmra.mxu1 %v3216_v21  ;;  %v3313_v13 = vrot.slane %v3216_v21, 1  ;;  %v3791_v9 = vrot.slane %v3216_v21, 3  ;;  %v3593_v25 = vrot.slane %v3216_v21, 2  ;;  %v3989_v43 = vrot.slane %v3216_v21, 4 }
 0x568   : > { %v3189_v61 = vpop.f32.mrf.mxu3  ;;  %3623 = vmatpush.msrb.mxu2 %v5280_v17  ;;  %3676 = vmatpush.msrb.mxu3 %v5281_v39  ;;  %v5356_v17 = vld [vmem:[%s9315_s5 + $0x490] sm:$0xff]  ;;  %v5357_v39 = vld [vmem:[%s9315_s5 + $0x498] sm:$0xff] }
 0x569   : > { %v3190_v0 = vadd.f32 %v3189_v61, %v3100_v34  ;;  %v3314_v20 = vsel %vm514_vm2, %v3311_v51, %v3313_v13  ;;  %v8377_v12 = vsel %vm1494_vm3, %v3789_v16, %v3791_v9  ;;  %v8386_v40 = vsel %vm1109_vm4, %v3591_v28, %v3593_v25  ;;  %v5359_v61 = vld [vmem:[%s9315_s5 + $0x4a8] sm:$0xff] }
 0x56a   : > { %3371 = vmatmul.f32.gmra.mxu2 %v3314_v20  ;;  %3424 = vmatmul.f32.gmra.mxu3 %v3314_v20  ;;  %v8389_v29 = vsel %vm627_vm0, %v3987_v31, %v3989_v43 }
 0x56b   : > { %v3205_v51 = vmax.f32 %v3154_v30, %v3190_v0  ;;  %3624 = vmatpush.msrb.mxu2 %v5278_v10  ;;  %3677 = vmatpush.msrb.mxu3 %v5279_v57  ;;  %v5354_v0 = vld [vmem:[%s9315_s5 + $0x480] sm:$0xff]  ;;  %v5353_v57 = vld [vmem:[%s9315_s5 + $0x478] sm:$0xff] }
 0x56d   : > { %v3217_v16 = vmax.f32 %v3205_v51, 0.0  ;;  %3625 = vmatpush.msrb.mxu2 %v5276_v8  ;;  %3678 = vmatpush.msrb.mxu3 %v5277_v42  ;;  %v5350_v51 = vld [vmem:[%s9315_s5 + $0x460] sm:$0xff]  ;;  %v5348_v8 = vld [vmem:[%s9315_s5 + $0x450] sm:$0xff] }
 0x56f   : > { %3483 = vmatmul.f32.gmra.mxu0 %v3217_v16  ;;  %3536 = vmatmul.f32.gmra.mxu1 %v3217_v16  ;;  %v3315_v28 = vrot.slane %v3217_v16, 1  ;;  %v3793_v31 = vrot.slane %v3217_v16, 3  ;;  %v3595_v3 = vrot.slane %v3217_v16, 2  ;;  %v3991_v7 = vrot.slane %v3217_v16, 4  ;;  %v5351_v16 = vld [vmem:[%s9315_s5 + $0x468] sm:$0xff] }
 0x570   : > { %v3192_v2 = vpop.f32.mrf.mxu3  ;;  %3626 = vmatpush.msrb.mxu2 %v5274_v22  ;;  %3679 = vmatpush.msrb.mxu3 %v5275_v11  ;;  %v5341_v11 = vld [vmem:[%s9315_s5 + $0x418] sm:$0xff] }
 0x571   : > { %v3193_v35 = vadd.f32 %v3192_v2, %v3103_v18  ;;  %v3316_v56 = vsel %vm514_vm2, %v3313_v13, %v3315_v28  ;;  %v8407_v37 = vsel %vm1494_vm3, %v3791_v9, %v3793_v31  ;;  %v8410_v48 = vsel %vm1109_vm4, %v3593_v25, %v3595_v3 }
 0x572   : > { %3374 = vmatmul.f32.gmra.mxu2 %v3316_v56  ;;  %3427 = vmatmul.f32.gmra.mxu3 %v3316_v56  ;;  %v8413_v33 = vsel %vm627_vm0, %v3989_v43, %v3991_v7  ;;  %v5339_v56 = vld [vmem:[%s9315_s5 + $0x408] sm:$0xff] }
 0x573   : > { %v3206_v36 = vmax.f32 %v3157_v14, %v3193_v35  ;;  %v5343_v14 = vld [vmem:[%s9315_s5 + $0x428] sm:$0xff]  ;;  %v5338_v35 = vld [vmem:[%s9315_s5 + $0x400] sm:$0xff] }
 0x575   : > { %v3218_v34 = vmax.f32 %v3206_v36, 0.0 }
 0x577   : > { %3486 = vmatmul.f32.gmra.mxu0 %v3218_v34  ;;  %3539 = vmatmul.f32.gmra.mxu1 %v3218_v34  ;;  %v3317_v21 = vrot.slane %v3218_v34, 1  ;;  %v8415_v52 = vrot.slane %v3218_v34, 3  ;;  %v8417_v46 = vrot.slane %v3218_v34, 2  ;;  %v8419_v6 = vrot.slane %v3218_v34, 4 }
 0x579   : > { %v3318_v53 = vsel %vm514_vm2, %v3315_v28, %v3317_v21  ;;  %v8424_v13 = vsel %vm1494_vm3, %v3793_v31, %v8415_v52  ;;  %v8428_v9 = vsel %vm1109_vm4, %v3595_v3, %v8417_v46  ;;  %v8432_v25 = vsel %vm627_vm0, %v3991_v7, %v8419_v6  ;;  %v5347_v28 = vld [vmem:[%s9315_s5 + $0x448] sm:$0xff]  ;;  %v5344_v31 = vld [vmem:[%s9315_s5 + $0x430] sm:$0xff]  ;;  %v5345_v3 = vld [vmem:[%s9315_s5 + $0x438] sm:$0xff] }
 0x57a   : > { %3377 = vmatmul.f32.gmra.mxu2 %v3318_v53  ;;  %3430 = vmatmul.f32.gmra.mxu3 %v3318_v53  ;;  %v5342_v7 = vld [vmem:[%s9315_s5 + $0x420] sm:$0xff] }
 0x57f   : > { %3825 = vmatmul.f32.vlgmr.msrb.gmra.mxu0 %v8067_v44  ;;  %3878 = vmatmul.f32.vlgmr.msrb.gmra.mxu1 %v8067_v44  ;;  %v5368_v44 = vld [vmem:[%s9315_s5 + $0x4f0] sm:$0xff] }
 0x580   : > { %4007 = vmatpush.msra.mxu2 %v5368_v44 }
 0x582   : > { %3380 = vmatmul.f32.gmra.mxu2 %v3317_v21  ;;  %3433 = vmatmul.f32.gmra.mxu3 %v3317_v21 }
 0x587   : > { %3828 = vmatmul.f32.gmra.mxu0 %v8079_v19  ;;  %3881 = vmatmul.f32.gmra.mxu1 %v8079_v19 }
 0x58a   : > { %3627 = vmatmul.f32.vlgmr.msrb.gmra.mxu2 %v8070_v47  ;;  %3680 = vmatmul.f32.vlgmr.msrb.gmra.mxu3 %v8070_v47  ;;  %v5369_v47 = vld [vmem:[%s9315_s5 + $0x4f8] sm:$0xff] }
 0x58b   : > { %4060 = vmatpush.msra.mxu3 %v5369_v47 }
 0x58f   : > { %3831 = vmatmul.f32.gmra.mxu0 %v8091_v26  ;;  %3884 = vmatmul.f32.gmra.mxu1 %v8091_v26  ;;  %v5366_v26 = vld [vmem:[%s9315_s5 + $0x4e0] sm:$0xff] }
 0x590   : > { %4008 = vmatpush.msra.mxu2 %v5366_v26 }
 0x592   : > { %3630 = vmatmul.f32.gmra.mxu2 %v8082_v59  ;;  %3683 = vmatmul.f32.gmra.mxu3 %v8082_v59 }
 0x597   : > { %3834 = vmatmul.f32.gmra.mxu0 %v8109_v4  ;;  %3887 = vmatmul.f32.gmra.mxu1 %v8109_v4  ;;  %v5364_v4 = vld [vmem:[%s9315_s5 + $0x4d0] sm:$0xff] }
 0x598   : > { %4009 = vmatpush.msra.mxu2 %v5364_v4 }
 0x59a   : > { %3633 = vmatmul.f32.gmra.mxu2 %v8094_v15  ;;  %3686 = vmatmul.f32.gmra.mxu3 %v8094_v15  ;;  %v5367_v15 = vld [vmem:[%s9315_s5 + $0x4e8] sm:$0xff] }
 0x59b   : > { %4061 = vmatpush.msra.mxu3 %v5367_v15 }
 0x59c   : > { %v8600_v34 = vpop.f32.mrf.mxu0  ;;  %v8602_v21 = vpop.f32.mrf.mxu1 }
 0x59f   : > { %3837 = vmatmul.f32.gmra.mxu0 %v8153_v23  ;;  %3890 = vmatmul.f32.gmra.mxu1 %v8153_v23  ;;  %v5362_v23 = vld [vmem:[%s9315_s5 + $0x4c0] sm:$0xff] }
 0x5a0   : > { %4010 = vmatpush.msra.mxu2 %v5362_v23 }
 0x5a2   : > { %3636 = vmatmul.f32.gmra.mxu2 %v8118_v62  ;;  %3689 = vmatmul.f32.gmra.mxu3 %v8118_v62  ;;  %v5365_v62 = vld [vmem:[%s9315_s5 + $0x4d8] sm:$0xff] }
 0x5a3   : > { %4062 = vmatpush.msra.mxu3 %v5365_v62 }
 0x5a4   : > { %v8616_v47 = vpop.f32.mrf.mxu1 }
 0x5a7   : > { %3840 = vmatmul.f32.gmra.mxu0 %v8215_v41  ;;  %3893 = vmatmul.f32.gmra.mxu1 %v8215_v41  ;;  %v5360_v41 = vld [vmem:[%s9315_s5 + $0x4b0] sm:$0xff] }
 0x5a8   : > { %4011 = vmatpush.msra.mxu2 %v5360_v41 }
 0x5aa   : > { %3639 = vmatmul.f32.gmra.mxu2 %v8156_v58  ;;  %3692 = vmatmul.f32.gmra.mxu3 %v8156_v58  ;;  %v5363_v58 = vld [vmem:[%s9315_s5 + $0x4c8] sm:$0xff] }
 0x5ab   : > { %4063 = vmatpush.msra.mxu3 %v5363_v58 }
 0x5ac   : > { %v8626_v4 = vpop.f32.mrf.mxu1 }
 0x5ad   : > { %v8462_v19 = vpop.f32.mrf.mxu2  ;;  %v8464_v59 = vpop.f32.mrf.mxu3 }
 0x5af   : > { %3843 = vmatmul.f32.gmra.mxu0 %v8275_v32  ;;  %3896 = vmatmul.f32.gmra.mxu1 %v8275_v32  ;;  %v5361_v32 = vld [vmem:[%s9315_s5 + $0x4b8] sm:$0xff] }
 0x5b0   : > { %4064 = vmatpush.msra.mxu3 %v5361_v32 }
 0x5b2   : > { %3642 = vmatmul.f32.gmra.mxu2 %v8226_v49  ;;  %3695 = vmatmul.f32.gmra.mxu3 %v8226_v49  ;;  %v5358_v49 = vld [vmem:[%s9315_s5 + $0x4a0] sm:$0xff] }
 0x5b3   : > { %4012 = vmatpush.msra.mxu2 %v5358_v49  ;;  %4065 = vmatpush.msra.mxu3 %v5359_v61 }
 0x5b4   : > { %v8636_v58 = vpop.f32.mrf.mxu1 }
 0x5b5   : > { %v8494_v43 = vpop.f32.mrf.mxu2  ;;  %v8496_v30 = vpop.f32.mrf.mxu3  ;;  %4013 = vmatpush.msra.mxu2 %v5356_v17  ;;  %4066 = vmatpush.msra.mxu3 %v5357_v39 }
 0x5b7   : > { %3846 = vmatmul.f32.gmra.mxu0 %v8335_v54  ;;  %3899 = vmatmul.f32.gmra.mxu1 %v8335_v54  ;;  %v5355_v54 = vld [vmem:[%s9315_s5 + $0x488] sm:$0xff] }
 0x5b8   : > { %4014 = vmatpush.msra.mxu2 %v5354_v0  ;;  %4067 = vmatpush.msra.mxu3 %v5355_v54 }
 0x5ba   : > { %3645 = vmatmul.f32.gmra.mxu2 %v8286_v55  ;;  %3698 = vmatmul.f32.gmra.mxu3 %v8286_v55  ;;  %v5352_v55 = vld [vmem:[%s9315_s5 + $0x470] sm:$0xff] }
 0x5bb   : > { %4015 = vmatpush.msra.mxu2 %v5352_v55  ;;  %4068 = vmatpush.msra.mxu3 %v5353_v57 }
 0x5bc   : > { %v8648_v32 = vpop.f32.mrf.mxu1 }
 0x5bd   : > { %v8520_v20 = vpop.f32.mrf.mxu2  ;;  %v8522_v10 = vpop.f32.mrf.mxu3  ;;  %4016 = vmatpush.msra.mxu2 %v5350_v51  ;;  %4069 = vmatpush.msra.mxu3 %v5351_v16 }
 0x5bf   : > { %3849 = vmatmul.f32.gmra.mxu0 %v8377_v12  ;;  %3902 = vmatmul.f32.gmra.mxu1 %v8377_v12  ;;  %v5349_v12 = vld [vmem:[%s9315_s5 + $0x458] sm:$0xff] }
 0x5c0   : > { %4017 = vmatpush.msra.mxu2 %v5348_v8  ;;  %4070 = vmatpush.msra.mxu3 %v5349_v12 }
 0x5c2   : > { %3648 = vmatmul.f32.gmra.mxu2 %v8344_v50  ;;  %3701 = vmatmul.f32.gmra.mxu3 %v8344_v50  ;;  %v5346_v50 = vld [vmem:[%s9315_s5 + $0x440] sm:$0xff] }
 0x5c3   : > { %4018 = vmatpush.msra.mxu2 %v5346_v50  ;;  %4071 = vmatpush.msra.mxu3 %v5347_v28 }
 0x5c4   : > { %v8662_v0 = vpop.f32.mrf.mxu1 }
 0x5c5   : > { %v8546_v42 = vpop.f32.mrf.mxu2  ;;  %v8548_v18 = vpop.f32.mrf.mxu3  ;;  %4019 = vmatpush.msra.mxu2 %v5344_v31  ;;  %4072 = vmatpush.msra.mxu3 %v5345_v3  ;;  %v4198_v3 = vld [vmem:[%s9317_s7 + $0xf8] sm:$0xff] }
 0x5c7   : > { %3852 = vmatmul.f32.gmra.mxu0 %v8407_v37  ;;  %3905 = vmatmul.f32.gmra.mxu1 %v8407_v37 }
 0x5c8   : > { %4020 = vmatpush.msra.mxu2 %v5342_v7  ;;  %4073 = vmatpush.msra.mxu3 %v5343_v14  ;;  %v4195_v14 = vld [vmem:[%s9317_s7 + $0xe0] sm:$0xff] }
 0x5ca   : > { %3651 = vmatmul.f32.gmra.mxu2 %v8386_v40  ;;  %3704 = vmatmul.f32.gmra.mxu3 %v8386_v40  ;;  %v5340_v40 = vld [vmem:[%s9315_s5 + $0x410] sm:$0xff] }
 0x5cb   : > { %4021 = vmatpush.msra.mxu2 %v5340_v40  ;;  %4074 = vmatpush.msra.mxu3 %v5341_v11  ;;  %v4196_v40 = vld [vmem:[%s9317_s7 + $0xe8] sm:$0xff] }
 0x5cc   : > { %v8672_v57 = vpop.f32.mrf.mxu1 }
 0x5cd   : > { %v8572_v2 = vpop.f32.mrf.mxu2  ;;  %v8574_v22 = vpop.f32.mrf.mxu3  ;;  %4022 = vmatpush.msra.mxu2 %v5338_v35  ;;  %4075 = vmatpush.msra.mxu3 %v5339_v56  ;;  %v4194_v56 = vld [vmem:[%s9317_s7 + $0xd8] sm:$0xff] }
 0x5cf   : > { %3855 = vmatmul.f32.gmra.mxu0 %v8424_v13  ;;  %3908 = vmatmul.f32.gmra.mxu1 %v8424_v13 }
 0x5d0   : > { %4350 = vmatpush.msrb.mxu2 %v4198_v3  ;;  %v4192_v3 = vld [vmem:[%s9317_s7 + $0xc8] sm:$0xff] }
 0x5d2   : > { %3654 = vmatmul.f32.gmra.mxu2 %v8410_v48  ;;  %3707 = vmatmul.f32.gmra.mxu3 %v8410_v48 }
 0x5d3   : > { %4351 = vmatpush.msrb.mxu2 %v4196_v40  ;;  %v4190_v40 = vld [vmem:[%s9317_s7 + $0xb8] sm:$0xff] }
 0x5d4   : > { %v8682_v8 = vpop.f32.mrf.mxu1 }
 0x5d5   : > { %v8592_v37 = vpop.f32.mrf.mxu2  ;;  %v8594_v36 = vpop.f32.mrf.mxu3  ;;  %4352 = vmatpush.msrb.mxu2 %v4194_v56 }
 0x5d7   : > { %3858 = vmatmul.f32.gmra.mxu0 %v8415_v52  ;;  %3911 = vmatmul.f32.gmra.mxu1 %v8415_v52  ;;  %v8614_v52 = vpop.f32.mrf.mxu0 }
 0x5d8   : > { %4353 = vmatpush.msrb.mxu2 %v4192_v3 }
 0x5da   : > { %3657 = vmatmul.f32.gmra.mxu2 %v8428_v9  ;;  %3710 = vmatmul.f32.gmra.mxu3 %v8428_v9 }
 0x5db   : > { %4354 = vmatpush.msrb.mxu2 %v4190_v40  ;;  %v4183_v40 = vld [vmem:[%s9317_s7 + $0x80] sm:$0xff] }
 0x5dc   : > { %v8694_v50 = vpop.f32.mrf.mxu1 }
 0x5dd   : > { %v8604_v53 = vpop.f32.mrf.mxu2  ;;  %v8606_v48 = vpop.f32.mrf.mxu3  ;;  %9540 = vst [vmem:[#allocation50_spill] sm:$0xff] %v8694_v50 }
 0x5df   : > { %v8624_v15 = vpop.f32.mrf.mxu0 }
 0x5e2   : > { %3660 = vmatmul.f32.gmra.mxu2 %v8417_v46  ;;  %3713 = vmatmul.f32.gmra.mxu3 %v8417_v46 }
 0x5e4   : > { %v8720_v35 = vpop.f32.mrf.mxu1 }
 0x5e5   : > { %v8610_v13 = vpop.f32.mrf.mxu2  ;;  %v8612_v44 = vpop.f32.mrf.mxu3  ;;  %9542 = vst [vmem:[#allocation51_spill] sm:$0xff] %v8720_v35  ;;  %v4173_v35 = vld [vmem:[%s9317_s7 + $0x30] sm:$0xff] }
 0x5e7   : > { %v8634_v23 = vpop.f32.mrf.mxu0 }
 0x5ea   : > { %4023 = vmatmul.f32.vlgmr.msra.gmra.mxu2 %v8073_v27  ;;  %4076 = vmatmul.f32.vlgmr.msra.gmra.mxu3 %v8073_v27 }
 0x5ed   : > { %v8620_v9 = vpop.f32.mrf.mxu2  ;;  %v8622_v26 = vpop.f32.mrf.mxu3 }
 0x5ee   : > { %9532 = vst [vmem:[#allocation79_spill] sm:$0xff] %v8622_v26 }
 0x5f2   : > { %4026 = vmatmul.f32.gmra.mxu2 %v8085_v5  ;;  %4079 = vmatmul.f32.gmra.mxu3 %v8085_v5  ;;  %v8646_v5 = vpop.f32.mrf.mxu0 }
 0x5f5   : > { %v8630_v46 = vpop.f32.mrf.mxu2  ;;  %v8632_v62 = vpop.f32.mrf.mxu3 }
 0x5f6   : > { %9533 = vst [vmem:[#allocation15_spill] sm:$0xff] %v8630_v46 }
 0x5f7   : > { %9534 = vst [vmem:[#allocation48_spill] sm:$0xff] %v8632_v62  ;;  %v4174_v62 = vld [vmem:[%s9317_s7 + $0x38] sm:$0xff] }
 0x5fa   : > { %4029 = vmatmul.f32.gmra.mxu2 %v8097_v63  ;;  %4082 = vmatmul.f32.gmra.mxu3 %v8097_v63  ;;  %v8660_v39 = vpop.f32.mrf.mxu0 }
 0x5fd   : > { %v8640_v27 = vpop.f32.mrf.mxu2  ;;  %v8642_v41 = vpop.f32.mrf.mxu3 }
 0x5fe   : > { %9535 = vst [vmem:[#allocation16_spill] sm:$0xff] %v8640_v27  ;;  %v4206_v27 = vld [vmem:[%s9317_s7 + $0x138] sm:$0xff] }
 0x5ff   : > { %9536 = vst [vmem:[#allocation49_spill] sm:$0xff] %v8642_v41  ;;  %v4184_v41 = vld [vmem:[%s9317_s7 + $0x88] sm:$0xff]  ;;  %4415 = vmatpush.msrb.mxu3 %v4206_v27 }
 0x600   : > { %v4172_v27 = vld [vmem:[%s9317_s7 + $0x28] sm:$0xff] }
 0x602   : > { %4032 = vmatmul.f32.gmra.mxu2 %v8121_v1  ;;  %4085 = vmatmul.f32.gmra.mxu3 %v8121_v1  ;;  %v8670_v55 = vpop.f32.mrf.mxu0 }
 0x605   : > { %v8650_v49 = vpop.f32.mrf.mxu2  ;;  %v8652_v61 = vpop.f32.mrf.mxu3 }
 0x606   : > { %9537 = vst [vmem:[#allocation82_spill] sm:$0xff] %v8650_v49  ;;  %v4185_v49 = vld [vmem:[%s9317_s7 + $0x90] sm:$0xff] }
 0x607   : > { %9538 = vst [vmem:[#allocation83_spill] sm:$0xff] %v8652_v61  ;;  %v4188_v61 = vld [vmem:[%s9317_s7 + $0xa8] sm:$0xff] }
 0x608   : > { %4355 = vmatpush.msrb.mxu2 %v4188_v61  ;;  %v4181_v61 = vld [vmem:[%s9317_s7 + $0x70] sm:$0xff] }
 0x60a   : > { %4035 = vmatmul.f32.gmra.mxu2 %v8165_v60  ;;  %4088 = vmatmul.f32.gmra.mxu3 %v8165_v60  ;;  %v8680_v16 = vpop.f32.mrf.mxu0 }
 0x60d   : > { %v8656_v63 = vpop.f32.mrf.mxu2  ;;  %v8658_v17 = vpop.f32.mrf.mxu3 }
 0x612   : > { %4038 = vmatmul.f32.gmra.mxu2 %v8231_v24  ;;  %4091 = vmatmul.f32.gmra.mxu3 %v8231_v24 }
 0x615   : > { %v8666_v1 = vpop.f32.mrf.mxu2  ;;  %v8668_v54 = vpop.f32.mrf.mxu3 }
 0x61a   : > { %4041 = vmatmul.f32.gmra.mxu2 %v8291_v38  ;;  %4094 = vmatmul.f32.gmra.mxu3 %v8291_v38  ;;  %v8692_v38 = vpop.f32.mrf.mxu0 }
 0x61b   : > { %9539 = vst [vmem:[#allocation17_spill] sm:$0xff] %v8692_v38 }
 0x61d   : > { %v8676_v60 = vpop.f32.mrf.mxu2  ;;  %v8678_v51 = vpop.f32.mrf.mxu3 }
 0x622   : > { %4044 = vmatmul.f32.gmra.mxu2 %v8347_v45  ;;  %4097 = vmatmul.f32.gmra.mxu3 %v8347_v45  ;;  %v4197_v45 = vld [vmem:[%s9317_s7 + $0xf0] sm:$0xff]  ;;  %v8718_v11 = vpop.f32.mrf.mxu0 }
 0x623   : > { %4244 = vmatpush.msra.mxu0 %v4197_v45  ;;  %9541 = vst [vmem:[#allocation18_spill] sm:$0xff] %v8718_v11  ;;  %v4191_v45 = vld [vmem:[%s9317_s7 + $0xc0] sm:$0xff] }
 0x625   : > { %v8686_v24 = vpop.f32.mrf.mxu2  ;;  %v8688_v12 = vpop.f32.mrf.mxu3  ;;  %4245 = vmatpush.msra.mxu0 %v4195_v14  ;;  %v4189_v14 = vld [vmem:[%s9317_s7 + $0xb0] sm:$0xff] }
 0x62a   : > { %4047 = vmatmul.f32.gmra.mxu2 %v8389_v29  ;;  %4100 = vmatmul.f32.gmra.mxu3 %v8389_v29  ;;  %v8758_v3 = vpop.f32.mrf.mxu0 }
 0x62b   : > { %9543 = vst [vmem:[#allocation84_spill] sm:$0xff] %v8758_v3 }
 0x62d   : > { %v8696_v28 = vpop.f32.mrf.mxu2  ;;  %v8698_v31 = vpop.f32.mrf.mxu3 }
 0x632   : > { %4050 = vmatmul.f32.gmra.mxu2 %v8413_v33  ;;  %4103 = vmatmul.f32.gmra.mxu3 %v8413_v33  ;;  %v4193_v33 = vld [vmem:[%s9317_s7 + $0xd0] sm:$0xff] }
 0x633   : > { %4246 = vmatpush.msra.mxu0 %v4193_v33 }
 0x635   : > { %v8708_v29 = vpop.f32.mrf.mxu2  ;;  %v8710_v7 = vpop.f32.mrf.mxu3  ;;  %4247 = vmatpush.msra.mxu0 %v4191_v45  ;;  %v4186_v45 = vld [vmem:[%s9317_s7 + $0x98] sm:$0xff] }
 0x636   : > { %4356 = vmatpush.msrb.mxu2 %v4186_v45  ;;  %v4177_v45 = vld [vmem:[%s9317_s7 + $0x50] sm:$0xff] }
 0x637   : > { %4248 = vmatpush.msra.mxu0 %v4189_v14  ;;  %v8760_v14 = vpop.f32.mrf.mxu1 }
 0x638   : > { %9544 = vst [vmem:[#allocation85_spill] sm:$0xff] %v8760_v14  ;;  %4357 = vmatpush.msrb.mxu2 %v4184_v41  ;;  %v4178_v41 = vld [vmem:[%s9317_s7 + $0x58] sm:$0xff] }
 0x63a   : > { %4053 = vmatmul.f32.gmra.mxu2 %v8432_v25  ;;  %4106 = vmatmul.f32.gmra.mxu3 %v8432_v25  ;;  %v4187_v25 = vld [vmem:[%s9317_s7 + $0xa0] sm:$0xff] }
 0x63b   : > { %4249 = vmatpush.msra.mxu0 %v4187_v25  ;;  %v4182_v25 = vld [vmem:[%s9317_s7 + $0x78] sm:$0xff] }
 0x63c   : > { %4358 = vmatpush.msrb.mxu2 %v4182_v25  ;;  %v4176_v25 = vld [vmem:[%s9317_s7 + $0x48] sm:$0xff] }
 0x63d   : > { %v8742_v33 = vpop.f32.mrf.mxu2  ;;  %v8744_v56 = vpop.f32.mrf.mxu3  ;;  %4250 = vmatpush.msra.mxu0 %v4185_v49  ;;  %v4180_v49 = vld [vmem:[%s9317_s7 + $0x68] sm:$0xff] }
 0x63e   : > { %4359 = vmatpush.msrb.mxu2 %v4180_v49 }
 0x63f   : > { %4251 = vmatpush.msra.mxu0 %v4183_v40  ;;  %v4205_v40 = vld [vmem:[%s9317_s7 + $0x130] sm:$0xff]  ;;  %v8806_v49 = vpop.f32.mrf.mxu1 }
 0x640   : > { %4309 = vmatpush.msra.mxu1 %v4205_v40  ;;  %4360 = vmatpush.msrb.mxu2 %v4178_v41  ;;  %9546 = vst [vmem:[#allocation52_spill] sm:$0xff] %v8806_v49  ;;  %v4203_v41 = vld [vmem:[%s9317_s7 + $0x120] sm:$0xff]  ;;  %v4168_v49 = vld [vmem:[%s9317_s7 + $0x8] sm:$0xff] }
 0x641   : > { %4252 = vmatpush.msra.mxu0 %v4181_v61  ;;  %v4175_v61 = vld [vmem:[%s9317_s7 + $0x40] sm:$0xff] }
 0x642   : > { %4056 = vmatmul.f32.gmra.mxu2 %v8419_v6  ;;  %4109 = vmatmul.f32.gmra.mxu3 %v8419_v6  ;;  %v4179_v6 = vld [vmem:[%s9317_s7 + $0x60] sm:$0xff] }
 0x643   : > { %4253 = vmatpush.msra.mxu0 %v4179_v6  ;;  %v8804_v6 = vpop.f32.mrf.mxu0  ;;  %4361 = vmatpush.msrb.mxu2 %v4176_v25  ;;  %v4170_v25 = vld [vmem:[%s9317_s7 + $0x18] sm:$0xff] }
 0x644   : > { %9545 = vst [vmem:[#allocation19_spill] sm:$0xff] %v8804_v6  ;;  %4310 = vmatpush.msra.mxu1 %v4203_v41  ;;  %v4202_v41 = vld [vmem:[%s9317_s7 + $0x118] sm:$0xff] }
 0x645   : > { %v8776_v14 = vpop.f32.mrf.mxu2  ;;  %v8778_v3 = vpop.f32.mrf.mxu3  ;;  %4254 = vmatpush.msra.mxu0 %v4177_v45  ;;  %4362 = vmatpush.msrb.mxu2 %v4174_v62  ;;  %v4171_v45 = vld [vmem:[%s9317_s7 + $0x20] sm:$0xff]  ;;  %v4169_v62 = vld [vmem:[%s9317_s7 + $0x10] sm:$0xff] }
 0x647   : > { %4255 = vmatpush.msra.mxu0 %v4175_v61  ;;  %v4204_v61 = vld [vmem:[%s9317_s7 + $0x128] sm:$0xff]  ;;  %4363 = vmatpush.msrb.mxu2 %v4172_v27  ;;  %v4199_v27 = vld [vmem:[%s9317_s7 + $0x100] sm:$0xff]  ;;  %v3879_v6 = vpop.f32.mrf.mxu1 }
 0x648   : > { %4416 = vmatpush.msrb.mxu3 %v4204_v61  ;;  %v4200_v61 = vld [vmem:[%s9317_s7 + $0x108] sm:$0xff] }
 0x649   : > { %4256 = vmatpush.msra.mxu0 %v4173_v35  ;;  %v4201_v35 = vld [vmem:[%s9317_s7 + $0x110] sm:$0xff]  ;;  %4364 = vmatpush.msrb.mxu2 %v4170_v25 }
 0x64a   : > { %4311 = vmatpush.msra.mxu1 %v4201_v35  ;;  %4417 = vmatpush.msrb.mxu3 %v4202_v41  ;;  %v3508_v41 = vadd.f32 %v8602_v21, %v8464_v59  ;;  %v3458_v59 = vadd.f32 %v8614_v52, %v8494_v43  ;;  %v3511_v21 = vadd.f32 %v8616_v47, %v8496_v30 }
 0x64b   : > { %4257 = vmatpush.msra.mxu0 %v4171_v45  ;;  %v4167_v45 = vld [vmem:[%s9317_s7] sm:$0xff]  ;;  %4365 = vmatpush.msrb.mxu2 %v4168_v49  ;;  %v3826_v35 = vpop.f32.mrf.mxu0  ;;  %v3455_v49 = vadd.f32 %v8600_v34, %v8462_v19 }
 0x64c   : > { %4312 = vmatpush.msra.mxu1 %v4199_v27  ;;  %4418 = vmatpush.msrb.mxu3 %v4200_v61 }
 0x64d   : > { %v8814_v40 = vpop.f32.mrf.mxu2  ;;  %v8816_v11 = vpop.f32.mrf.mxu3  ;;  %4258 = vmatpush.msra.mxu0 %v4169_v62  ;;  %v3717_v61 = vadd.f32 %v8656_v63, %v3455_v49  ;;  %v3719_v49 = vadd.f32 %v8666_v1, %v3458_v59  ;;  %v3461_v1 = vadd.f32 %v8624_v15, %v8520_v20 }
 0x64e   : > { %9547 = vst [vmem:[#allocation20_spill] sm:$0xff] %v8814_v40 }
 0x64f   : > { %9548 = vst [vmem:[#allocation53_spill] sm:$0xff] %v8816_v11  ;;  %4259 = vmatpush.msra.mxu0 %v4167_v45  ;;  %v3882_v50 = vpop.f32.mrf.mxu1 }
 0x653   : > { %v3829_v40 = vpop.f32.mrf.mxu0 }
 0x654   : > { %v3917_v43 = vadd.f32 %v3829_v40, %v3719_v49 }
 0x655   : > { %v8854_v46 = vpop.f32.mrf.mxu2  ;;  %v8856_v11 = vpop.f32.mrf.mxu3 }
 0x656   : > { %9549 = vst [vmem:[#allocation86_spill] sm:$0xff] %v8854_v46 }
 0x657   : > { %9550 = vst [vmem:[#allocation21_spill] sm:$0xff] %v8856_v11  ;;  %v3885_v27 = vpop.f32.mrf.mxu1  ;;  %v3915_v11 = vadd.f32 %v3826_v35, %v3717_v61  ;;  %v3720_v35 = vadd.f32 %v8668_v54, %v3511_v21  ;;  %v3514_v54 = vadd.f32 %v8626_v4, %v8522_v10  ;;  %v3721_v61 = vadd.f32 %v8676_v60, %v3461_v1 }
 0x658   : > { %v3464_v60 = vadd.f32 %v8634_v23, %v8546_v42 }
 0x659   : > { %v3918_v30 = vadd.f32 %v3882_v50, %v3720_v35 }
 0x65b   : > { %v3832_v45 = vpop.f32.mrf.mxu0 }
 0x65c   : > { %v3919_v50 = vadd.f32 %v3832_v45, %v3721_v61 }
 0x65d   : > { %v8858_v62 = vpop.f32.mrf.mxu2  ;;  %v8860_v25 = vpop.f32.mrf.mxu3 }
 0x65e   : > { %9551 = vst [vmem:[#allocation54_spill] sm:$0xff] %v8858_v62  ;;  %v3718_v62 = vadd.f32 %v8658_v17, %v3508_v41 }
 0x65f   : > { %9552 = vst [vmem:[#allocation22_spill] sm:$0xff] %v8860_v25  ;;  %v4137_v25 = vld [vmem:[%s9316_s6] sm:$0x3] }
 0x660   : > { %v8877_v46 = vperm.slane %v4137_v25, 1 }
 0x665   : > { %v8862_v26 = vpop.f32.mrf.mxu2  ;;  %v8864_v38 = vpop.f32.mrf.mxu3 }
 0x666   : > { %9553 = vst [vmem:[#allocation55_spill] sm:$0xff] %v8862_v26  ;;  %v8875_v26 = vperm.slane %v4137_v25, 0  ;;  %v3888_v25 = vpop.f32.mrf.mxu1 }
 0x667   : > { %9554 = vst [vmem:[#allocation87_spill] sm:$0xff] %v8864_v38  ;;  %v3916_v38 = vadd.f32 %v3879_v6, %v3718_v62  ;;  %v3835_v62 = vpop.f32.mrf.mxu0 }
 0x66d   : > { %v4024_v19 = vpop.f32.mrf.mxu2  ;;  %v4077_v34 = vpop.f32.mrf.mxu3 }
 0x66e   : > { %v4113_v63 = vadd.f32 %v4024_v19, %v3915_v11  ;;  %v4114_v17 = vadd.f32 %v4077_v34, %v3916_v38  ;;  %v3722_v19 = vadd.f32 %v8678_v51, %v3514_v54  ;;  %v3891_v15 = vpop.f32.mrf.mxu1  ;;  %v3517_v51 = vadd.f32 %v8636_v58, %v8548_v18 }
 0x66f   : > { %v3838_v20 = vpop.f32.mrf.mxu0  ;;  %v3467_v58 = vadd.f32 %v8646_v5, %v8572_v2 }
 0x670   : > { %v4143_v41 = vadd.f32 %v8875_v26, %v4113_v63  ;;  %v4144_v6 = vadd.f32 %v8877_v46, %v4114_v17  ;;  %v3920_v10 = vadd.f32 %v3885_v27, %v3722_v19  ;;  %v3723_v17 = vadd.f32 %v8686_v24, %v3464_v60 }
 0x671   : > { %v3724_v49 = vadd.f32 %v8688_v12, %v3517_v51  ;;  %v3520_v24 = vadd.f32 %v8648_v32, %v8574_v22 }
 0x672   : > { %4260 = vmatmul.f32.vlgmr.msra.gmra.mxu0 %v4143_v41  ;;  %5370 = vmatmul.msk.f32.vlgmr.msra.gmra.mxu1 %vm4207_vm7, %v4144_v6  ;;  %v3921_v42 = vadd.f32 %v3835_v62, %v3723_v17 }
 0x673   : > { %4366 = vmatmul.f32.vlgmr.msrb.gmra.mxu2 %v4143_v41  ;;  %5382 = vmatmul.msk.f32.vlgmr.msrb.gmra.mxu3 %vm4207_vm7, %v4144_v6  ;;  %v3922_v23 = vadd.f32 %v3888_v25, %v3724_v49  ;;  %v3470_v25 = vadd.f32 %v8660_v39, %v8592_v37 }
 0x675   : > { %v4027_v52 = vpop.f32.mrf.mxu2  ;;  %v4080_v47 = vpop.f32.mrf.mxu3 }
 0x676   : > { %v4115_v38 = vadd.f32 %v4027_v52, %v3917_v43  ;;  %v4116_v11 = vadd.f32 %v4080_v47, %v3918_v30  ;;  %v3894_v27 = vpop.f32.mrf.mxu1  ;;  %v3725_v30 = vadd.f32 %v8696_v28, %v3467_v58  ;;  %v3726_v52 = vadd.f32 %v8698_v31, %v3520_v24 }
 0x677   : > { %v3841_v12 = vpop.f32.mrf.mxu0  ;;  %v3523_v28 = vadd.f32 %v8662_v0, %v8594_v36 }
 0x678   : > { %v4145_v34 = vadd.f32 %v8875_v26, %v4115_v38  ;;  %v4146_v59 = vadd.f32 %v8877_v46, %v4116_v11  ;;  %v3923_v2 = vadd.f32 %v3838_v20, %v3725_v30  ;;  %v3924_v22 = vadd.f32 %v3891_v15, %v3726_v52 }
 0x679   : > { %v3727_v11 = vadd.f32 %v8708_v29, %v3470_v25  ;;  %v3728_v61 = vadd.f32 %v8710_v7, %v3523_v28  ;;  %v3526_v29 = vadd.f32 %v8672_v57, %v8606_v48  ;;  %v9562_v25 = vld [vmem:[#allocation48_spill] sm:$0xff]  ;;  %v9563_v28 = vld [vmem:[#allocation51_spill] sm:$0xff] }
 0x67a   : > { %4263 = vmatmul.f32.gmra.mxu0 %v4145_v34  ;;  %5371 = vmatmul.msk.f32.gmra.mxu1 %vm4207_vm7, %v4146_v59 }
 0x67b   : > { %4369 = vmatmul.f32.gmra.mxu2 %v4145_v34  ;;  %5383 = vmatmul.msk.f32.gmra.mxu3 %vm4207_vm7, %v4146_v59  ;;  %v3925_v37 = vadd.f32 %v3841_v12, %v3727_v11  ;;  %v3926_v36 = vadd.f32 %v3894_v27, %v3728_v61  ;;  %v3473_v59 = vadd.f32 %v8670_v55, %v8604_v53  ;;  %v9558_v12 = vld [vmem:[#allocation20_spill] sm:$0xff]  ;;  %v9564_v61 = vld [vmem:[#allocation86_spill] sm:$0xff] }
 0x67d   : > { %v4030_v4 = vpop.f32.mrf.mxu2  ;;  %v4083_v40 = vpop.f32.mrf.mxu3  ;;  %v3729_v15 = vadd.f32 %v8742_v33, %v3473_v59  ;;  %v3476_v33 = vadd.f32 %v8680_v16, %v8610_v13 }
 0x67e   : > { %v4117_v21 = vadd.f32 %v4030_v4, %v3919_v50  ;;  %v4118_v63 = vadd.f32 %v4083_v40, %v3920_v10  ;;  %v3897_v38 = vpop.f32.mrf.mxu1  ;;  %v3730_v50 = vadd.f32 %v8744_v56, %v3526_v29  ;;  %v3529_v56 = vadd.f32 %v8682_v8, %v8612_v44 }
 0x67f   : > { %v3844_v54 = vpop.f32.mrf.mxu0 }
 0x680   : > { %v4147_v35 = vadd.f32 %v8875_v26, %v4117_v21  ;;  %v4148_v41 = vadd.f32 %v8877_v46, %v4118_v63  ;;  %v3927_v53 = vadd.f32 %v3844_v54, %v3729_v15  ;;  %v3928_v48 = vadd.f32 %v3897_v38, %v3730_v50  ;;  %v9567_v15 = vld [vmem:[#allocation84_spill] sm:$0xff] }
 0x681   : > { %v3731_v63 = vadd.f32 %v8776_v14, %v3476_v33  ;;  %v3732_v17 = vadd.f32 %v8778_v3, %v3529_v56  ;;  %v9555_v14 = vld [vmem:[#allocation17_spill] sm:$0xff]  ;;  %v9556_v3 = vld [vmem:[#allocation79_spill] sm:$0xff] }
 0x682   : > { %4266 = vmatmul.f32.gmra.mxu0 %v4147_v35  ;;  %5372 = vmatmul.msk.f32.gmra.mxu1 %vm4207_vm7, %v4148_v41 }
 0x683   : > { %4372 = vmatmul.f32.gmra.mxu2 %v4147_v35  ;;  %5384 = vmatmul.msk.f32.gmra.mxu3 %vm4207_vm7, %v4148_v41 }
 0x685   : > { %v4033_v45 = vpop.f32.mrf.mxu2  ;;  %v4086_v18 = vpop.f32.mrf.mxu3 }
 0x686   : > { %v4119_v6 = vadd.f32 %v4033_v45, %v3921_v42  ;;  %v4120_v43 = vadd.f32 %v4086_v18, %v3922_v23  ;;  %v3900_v60 = vpop.f32.mrf.mxu1  ;;  %v3479_v23 = vadd.f32 %v9555_v14, %v8620_v9  ;;  %v9557_v45 = vld [vmem:[#allocation50_spill] sm:$0xff] }
 0x687   : > { %v3847_v40 = vpop.f32.mrf.mxu0  ;;  %v3930_v44 = vadd.f32 %v3900_v60, %v3732_v17  ;;  %v3532_v18 = vadd.f32 %v9557_v45, %v9556_v3  ;;  %v9576_v45 = vld [vmem:[#allocation55_spill] sm:$0xff] }
 0x688   : > { %v4149_v47 = vadd.f32 %v8875_v26, %v4119_v6  ;;  %v4150_v62 = vadd.f32 %v8877_v46, %v4120_v43  ;;  %v3929_v41 = vadd.f32 %v3847_v40, %v3731_v63  ;;  %v3733_v27 = vadd.f32 %v9558_v12, %v3479_v23  ;;  %v9559_v6 = vld [vmem:[#allocation53_spill] sm:$0xff] }
 0x689   : > { %v3734_v43 = vadd.f32 %v9559_v6, %v3532_v18 }
 0x68a   : > { %4269 = vmatmul.f32.gmra.mxu0 %v4149_v47  ;;  %5373 = vmatmul.msk.f32.gmra.mxu1 %vm4207_vm7, %v4150_v62 }
 0x68b   : > { %4375 = vmatmul.f32.gmra.mxu2 %v4149_v47  ;;  %5385 = vmatmul.msk.f32.gmra.mxu3 %vm4207_vm7, %v4150_v62 }
 0x68d   : > { %v4036_v5 = vpop.f32.mrf.mxu2  ;;  %v4089_v32 = vpop.f32.mrf.mxu3 }
 0x68e   : > { %v4121_v31 = vadd.f32 %v4036_v5, %v3923_v2  ;;  %v4122_v1 = vadd.f32 %v4089_v32, %v3924_v22  ;;  %v3903_v16 = vpop.f32.mrf.mxu1  ;;  %v9560_v22 = vld [vmem:[#allocation15_spill] sm:$0xff]  ;;  %v9561_v5 = vld [vmem:[#allocation18_spill] sm:$0xff] }
 0x68f   : > { %v3850_v13 = vpop.f32.mrf.mxu0  ;;  %v3932_v47 = vadd.f32 %v3903_v16, %v3734_v43  ;;  %v3482_v32 = vadd.f32 %v9561_v5, %v9560_v22  ;;  %v9572_v16 = vld [vmem:[#allocation82_spill] sm:$0xff] }
 0x690   : > { %v4151_v19 = vadd.f32 %v8875_v26, %v4121_v31  ;;  %v4152_v34 = vadd.f32 %v8877_v46, %v4122_v1  ;;  %v3931_v9 = vadd.f32 %v3850_v13, %v3733_v27  ;;  %v3535_v31 = vadd.f32 %v9563_v28, %v9562_v25 }
 0x692   : > { %4272 = vmatmul.f32.gmra.mxu0 %v4151_v19  ;;  %5374 = vmatmul.msk.f32.gmra.mxu1 %vm4207_vm7, %v4152_v34 }
 0x693   : > { %4378 = vmatmul.f32.gmra.mxu2 %v4151_v19  ;;  %5386 = vmatmul.msk.f32.gmra.mxu3 %vm4207_vm7, %v4152_v34  ;;  %v3735_v19 = vadd.f32 %v9564_v61, %v3482_v32  ;;  %v9565_v34 = vld [vmem:[#allocation21_spill] sm:$0xff] }
 0x695   : > { %v4039_v39 = vpop.f32.mrf.mxu2  ;;  %v4092_v0 = vpop.f32.mrf.mxu3 }
 0x696   : > { %v4123_v7 = vadd.f32 %v4039_v39, %v3925_v37  ;;  %v4124_v20 = vadd.f32 %v4092_v0, %v3926_v36  ;;  %v3906_v11 = vpop.f32.mrf.mxu1  ;;  %v3736_v37 = vadd.f32 %v9565_v34, %v3535_v31 }
 0x697   : > { %v3853_v38 = vpop.f32.mrf.mxu0 }
 0x698   : > { %v4153_v10 = vadd.f32 %v8875_v26, %v4123_v7  ;;  %v4154_v4 = vadd.f32 %v8877_v46, %v4124_v20  ;;  %v3933_v0 = vadd.f32 %v3853_v38, %v3735_v19  ;;  %v3934_v59 = vadd.f32 %v3906_v11, %v3736_v37  ;;  %v9566_v20 = vld [vmem:[#allocation16_spill] sm:$0xff] }
 0x699   : > { %v3485_v50 = vadd.f32 %v9567_v15, %v9566_v20 }
 0x69a   : > { %4275 = vmatmul.f32.gmra.mxu0 %v4153_v10  ;;  %5375 = vmatmul.msk.f32.gmra.mxu1 %vm4207_vm7, %v4154_v4 }
 0x69b   : > { %4381 = vmatmul.f32.gmra.mxu2 %v4153_v10  ;;  %5387 = vmatmul.msk.f32.gmra.mxu3 %vm4207_vm7, %v4154_v4  ;;  %v9568_v10 = vld [vmem:[#allocation49_spill] sm:$0xff] }
 0x69c   : > { %v9569_v4 = vld [vmem:[#allocation85_spill] sm:$0xff] }
 0x69d   : > { %v4042_v55 = vpop.f32.mrf.mxu2  ;;  %v4095_v57 = vpop.f32.mrf.mxu3  ;;  %v3538_v40 = vadd.f32 %v9569_v4, %v9568_v10 }
 0x69e   : > { %v4125_v51 = vadd.f32 %v4042_v55, %v3927_v53  ;;  %v4126_v21 = vadd.f32 %v4095_v57, %v3928_v48  ;;  %v9570_v48 = vld [vmem:[#allocation54_spill] sm:$0xff]  ;;  %v3909_v63 = vpop.f32.mrf.mxu1 }
 0x69f   : > { %v3737_v55 = vadd.f32 %v9570_v48, %v3485_v50  ;;  %v9571_v57 = vld [vmem:[#allocation22_spill] sm:$0xff] }
 0x6a0   : > { %v4155_v49 = vadd.f32 %v8875_v26, %v4125_v51  ;;  %v4156_v35 = vadd.f32 %v8877_v46, %v4126_v21  ;;  %v3738_v33 = vadd.f32 %v9571_v57, %v3538_v40  ;;  %v3856_v21 = vpop.f32.mrf.mxu0 }
 0x6a1   : > { %v3935_v17 = vadd.f32 %v3856_v21, %v3737_v55 }
 0x6a2   : > { %4278 = vmatmul.f32.gmra.mxu0 %v4155_v49  ;;  %5376 = vmatmul.msk.f32.gmra.mxu1 %vm4207_vm7, %v4156_v35 }
 0x6a3   : > { %4384 = vmatmul.f32.gmra.mxu2 %v4155_v49  ;;  %5388 = vmatmul.msk.f32.gmra.mxu3 %vm4207_vm7, %v4156_v35  ;;  %v3936_v49 = vadd.f32 %v3909_v63, %v3738_v33 }
 0x6a5   : > { %v4045_v8 = vpop.f32.mrf.mxu2  ;;  %v4098_v42 = vpop.f32.mrf.mxu3 }
 0x6a6   : > { %v4127_v58 = vadd.f32 %v4045_v8, %v3929_v41  ;;  %v4128_v24 = vadd.f32 %v4098_v42, %v3930_v44  ;;  %v9573_v41 = vld [vmem:[#allocation19_spill] sm:$0xff]  ;;  %v9575_v42 = vld [vmem:[#allocation52_spill] sm:$0xff]  ;;  %v3912_v43 = vpop.f32.mrf.mxu1 }
 0x6a7   : > { %v3488_v44 = vadd.f32 %v9573_v41, %v9572_v16  ;;  %v9574_v8 = vld [vmem:[#allocation83_spill] sm:$0xff] }
 0x6a8   : > { %v4157_v30 = vadd.f32 %v8875_v26, %v4127_v58  ;;  %v4158_v52 = vadd.f32 %v8877_v46, %v4128_v24  ;;  %v3541_v14 = vadd.f32 %v9575_v42, %v9574_v8  ;;  %v9577_v58 = vld [vmem:[#allocation87_spill] sm:$0xff]  ;;  %v3859_v6 = vpop.f32.mrf.mxu0 }
 0x6a9   : > { %v3739_v18 = vadd.f32 %v9576_v45, %v3488_v44 }
 0x6aa   : > { %4281 = vmatmul.f32.gmra.mxu0 %v4157_v30  ;;  %5377 = vmatmul.msk.f32.gmra.mxu1 %vm4207_vm7, %v4158_v52  ;;  %v3740_v24 = vadd.f32 %v9577_v58, %v3541_v14 }
 0x6ab   : > { %4387 = vmatmul.f32.gmra.mxu2 %v4157_v30  ;;  %5389 = vmatmul.msk.f32.gmra.mxu3 %vm4207_vm7, %v4158_v52  ;;  %v3937_v30 = vadd.f32 %v3859_v6, %v3739_v18 }
 0x6ac   : > { %v3938_v52 = vadd.f32 %v3912_v43, %v3740_v24 }
 0x6ad   : > { %v4048_v62 = vpop.f32.mrf.mxu2  ;;  %v4101_v2 = vpop.f32.mrf.mxu3 }
 0x6ae   : > { %v4129_v1 = vadd.f32 %v4048_v62, %v3931_v9  ;;  %v4130_v54 = vadd.f32 %v4101_v2, %v3932_v47 }
 0x6b0   : > { %v4159_v36 = vadd.f32 %v8875_v26, %v4129_v1  ;;  %v4160_v39 = vadd.f32 %v8877_v46, %v4130_v54 }
 0x6b2   : > { %4284 = vmatmul.f32.gmra.mxu0 %v4159_v36  ;;  %5378 = vmatmul.msk.f32.gmra.mxu1 %vm4207_vm7, %v4160_v39 }
 0x6b3   : > { %4390 = vmatmul.f32.gmra.mxu2 %v4159_v36  ;;  %5390 = vmatmul.msk.f32.gmra.mxu3 %vm4207_vm7, %v4160_v39 }
 0x6b5   : > { %v4051_v29 = vpop.f32.mrf.mxu2  ;;  %v4104_v7 = vpop.f32.mrf.mxu3 }
 0x6b6   : > { %v4131_v60 = vadd.f32 %v4051_v29, %v3933_v0  ;;  %v4132_v53 = vadd.f32 %v4104_v7, %v3934_v59 }
 0x6b8   : > { %v4161_v56 = vadd.f32 %v8875_v26, %v4131_v60  ;;  %v4162_v51 = vadd.f32 %v8877_v46, %v4132_v53 }
 0x6ba   : > { %4287 = vmatmul.f32.gmra.mxu0 %v4161_v56  ;;  %5379 = vmatmul.msk.f32.gmra.mxu1 %vm4207_vm7, %v4162_v51 }
 0x6bb   : > { %4393 = vmatmul.f32.gmra.mxu2 %v4161_v56  ;;  %5391 = vmatmul.msk.f32.gmra.mxu3 %vm4207_vm7, %v4162_v51 }
 0x6bd   : > { %v4054_v35 = vpop.f32.mrf.mxu2  ;;  %v4107_v13 = vpop.f32.mrf.mxu3 }
 0x6be   : > { %v4133_v23 = vadd.f32 %v4054_v35, %v3935_v17  ;;  %v4134_v3 = vadd.f32 %v4107_v13, %v3936_v49 }
 0x6c0   : > { %v4163_v12 = vadd.f32 %v8875_v26, %v4133_v23  ;;  %v4164_v27 = vadd.f32 %v8877_v46, %v4134_v3 }
 0x6c2   : > { %4290 = vmatmul.f32.gmra.mxu0 %v4163_v12  ;;  %5380 = vmatmul.msk.f32.gmra.mxu1 %vm4207_vm7, %v4164_v27 }
 0x6c3   : > { %4396 = vmatmul.f32.gmra.mxu2 %v4163_v12  ;;  %5392 = vmatmul.msk.f32.gmra.mxu3 %vm4207_vm7, %v4164_v27 }
 0x6c5   : > { %v4057_v9 = vpop.f32.mrf.mxu2  ;;  %v4110_v47 = vpop.f32.mrf.mxu3 }
 0x6c6   : > { %v4135_v62 = vadd.f32 %v4057_v9, %v3937_v30  ;;  %v4136_v2 = vadd.f32 %v4110_v47, %v3938_v52 }
 0x6c8   : > { %v4165_v22 = vadd.f32 %v8875_v26, %v4135_v62  ;;  %v4166_v5 = vadd.f32 %v8877_v46, %v4136_v2 }
 0x6ca   : > { %4293 = vmatmul.f32.gmra.mxu0 %v4165_v22  ;;  %5381 = vmatmul.msk.f32.gmra.mxu1 %vm4207_vm7, %v4166_v5 }
 0x6cb   : > { %4399 = vmatmul.f32.gmra.mxu2 %v4165_v22  ;;  %5393 = vmatmul.msk.f32.gmra.mxu3 %vm4207_vm7, %v4166_v5 }
 0x6ef   : > { %v4261_v32 = vpop.f32.mrf.mxu0  ;;  %v4314_v25 = vpop.f32.mrf.mxu1 }
 0x6f0   : > { %v8993_v28 = vadd.f32 %v4314_v25, %v4261_v32 }
 0x6f6   : > { %v4367_v31 = vpop.f32.mrf.mxu2  ;;  %v4420_v1 = vpop.f32.mrf.mxu3 }
 0x6f7   : > { %v8995_v54 = vadd.f32 %v4420_v1, %v4367_v31  ;;  %v4264_v38 = vpop.f32.mrf.mxu0  ;;  %v4317_v11 = vpop.f32.mrf.mxu1 }
 0x6f8   : > { %v8997_v61 = vadd.f32 %v4317_v11, %v4264_v38 }
 0x6f9   : > { %v4456_v26 = vmax.f32 %v8993_v28, %v8995_v54  ;;  %v4568_v28 = vld [vmem:[%s9319_s9 + $0x78] sm:$0xff]  ;;  %v4567_v54 = vld [vmem:[%s9319_s9 + $0x70] sm:$0xff] }
 0x6fa   : > { %4569 = vmatpush.msrb.mxu1 %v4568_v28 }
 0x6fc   : > { %4570 = vmatpush.msrb.mxu1 %v4567_v54  ;;  %v5446_v54 = vld [vmem:[%s9319_s9 + $0x1d8] sm:$0xff] }
 0x6fe   : > { %v4370_v46 = vpop.f32.mrf.mxu2  ;;  %v4423_v19 = vpop.f32.mrf.mxu3 }
 0x6ff   : > { %v9001_v34 = vadd.f32 %v4423_v19, %v4370_v46  ;;  %v4267_v37 = vpop.f32.mrf.mxu0  ;;  %v4320_v36 = vpop.f32.mrf.mxu1 }
 0x700   : > { %v9003_v39 = vadd.f32 %v4320_v36, %v4267_v37 }
 0x701   : > { %v4457_v0 = vmax.f32 %v8997_v61, %v9001_v34  ;;  %v4470_v61 = vld [vmem:[%s9318_s8 + $0x10] sm:$0xff]  ;;  %v4471_v34 = vld [vmem:[%s9318_s8 + $0x18] sm:$0xff] }
 0x706   : > { %v4373_v59 = vpop.f32.mrf.mxu2  ;;  %v4426_v29 = vpop.f32.mrf.mxu3 }
 0x707   : > { %v9007_v7 = vadd.f32 %v4426_v29, %v4373_v59  ;;  %v4270_v20 = vpop.f32.mrf.mxu0  ;;  %v4323_v15 = vpop.f32.mrf.mxu1 }
 0x708   : > { %v9009_v50 = vadd.f32 %v4323_v15, %v4270_v20 }
 0x709   : > { %v4458_v10 = vmax.f32 %v9003_v39, %v9007_v7  ;;  %v4565_v39 = vld [vmem:[%s9319_s9 + $0x60] sm:$0xff]  ;;  %v4564_v7 = vld [vmem:[%s9319_s9 + $0x58] sm:$0xff] }
 0x70e   : > { %v4376_v4 = vpop.f32.mrf.mxu2  ;;  %v4429_v40 = vpop.f32.mrf.mxu3 }
 0x70f   : > { %v9013_v60 = vadd.f32 %v4429_v40, %v4376_v4  ;;  %v4273_v53 = vpop.f32.mrf.mxu0  ;;  %v4326_v48 = vpop.f32.mrf.mxu1 }
 0x710   : > { %v4327_v55 = vadd.f32 %v4326_v48, %v4273_v53 }
 0x711   : > { %v4459_v57 = vmax.f32 %v9009_v50, %v9013_v60 }
 0x716   : > { %v4379_v33 = vpop.f32.mrf.mxu2  ;;  %v4432_v56 = vpop.f32.mrf.mxu3 }
 0x717   : > { %v4433_v51 = vadd.f32 %v4432_v56, %v4379_v33  ;;  %v4276_v21 = vpop.f32.mrf.mxu0  ;;  %v4329_v63 = vpop.f32.mrf.mxu1  ;;  %v4562_v33 = vld [vmem:[%s9319_s9 + $0x48] sm:$0xff]  ;;  %v4561_v56 = vld [vmem:[%s9319_s9 + $0x40] sm:$0xff] }
 0x718   : > { %v4330_v60 = vadd.f32 %v4329_v63, %v4276_v21  ;;  %v4560_v21 = vld [vmem:[%s9319_s9 + $0x38] sm:$0xff]  ;;  %v4559_v63 = vld [vmem:[%s9319_s9 + $0x30] sm:$0xff] }
 0x719   : > { %v4460_v17 = vmax.f32 %v4327_v55, %v4433_v51  ;;  %v4468_v55 = vld [vmem:[%s9318_s8] sm:$0xff]  ;;  %v4473_v51 = vld [vmem:[%s9318_s8 + $0x28] sm:$0xff] }
 0x71e   : > { %v4382_v49 = vpop.f32.mrf.mxu2  ;;  %v4435_v35 = vpop.f32.mrf.mxu3 }
 0x71f   : > { %v4279_v13 = vpop.f32.mrf.mxu0  ;;  %v4332_v16 = vpop.f32.mrf.mxu1  ;;  %v4436_v50 = vadd.f32 %v4435_v35, %v4382_v49  ;;  %v4557_v49 = vld [vmem:[%s9319_s9 + $0x20] sm:$0xff]  ;;  %v4474_v35 = vld [vmem:[%s9318_s8 + $0x30] sm:$0xff] }
 0x720   : > { %v4333_v4 = vadd.f32 %v4332_v16, %v4279_v13  ;;  %v4556_v13 = vld [vmem:[%s9319_s9 + $0x18] sm:$0xff] }
 0x721   : > { %v4461_v48 = vmax.f32 %v4330_v60, %v4436_v50  ;;  %v4475_v16 = vld [vmem:[%s9318_s8 + $0x38] sm:$0xff]  ;;  %v5419_v50 = vld [vmem:[%s9319_s9 + $0x100] sm:$0xff] }
 0x726   : > { %v4385_v41 = vpop.f32.mrf.mxu2  ;;  %v4438_v44 = vpop.f32.mrf.mxu3 }
 0x727   : > { %v4282_v8 = vpop.f32.mrf.mxu0  ;;  %v4335_v42 = vpop.f32.mrf.mxu1  ;;  %v4439_v29 = vadd.f32 %v4438_v44, %v4385_v41  ;;  %v4555_v41 = vld [vmem:[%s9319_s9 + $0x10] sm:$0xff]  ;;  %v4554_v44 = vld [vmem:[%s9319_s9 + $0x8] sm:$0xff] }
 0x728   : > { %v4336_v20 = vadd.f32 %v4335_v42, %v4282_v8  ;;  %v4553_v8 = vld [vmem:[%s9319_s9] sm:$0xff]  ;;  %v5418_v42 = vld [vmem:[%s9319_s9 + $0xf8] sm:$0xff] }
 0x729   : > { %v4462_v53 = vmax.f32 %v4333_v4, %v4439_v29 }
 0x72e   : > { %v4388_v14 = vpop.f32.mrf.mxu2  ;;  %v4441_v23 = vpop.f32.mrf.mxu3 }
 0x72f   : > { %v4285_v3 = vpop.f32.mrf.mxu0  ;;  %v4338_v45 = vpop.f32.mrf.mxu1  ;;  %v4442_v37 = vadd.f32 %v4441_v23, %v4388_v14  ;;  %v5417_v14 = vld [vmem:[%s9319_s9 + $0xf0] sm:$0xff]  ;;  %v5416_v23 = vld [vmem:[%s9319_s9 + $0xe8] sm:$0xff] }
 0x730   : > { %v4339_v36 = vadd.f32 %v4338_v45, %v4285_v3  ;;  %v5415_v3 = vld [vmem:[%s9319_s9 + $0xe0] sm:$0xff]  ;;  %v5414_v45 = vld [vmem:[%s9319_s9 + $0xd8] sm:$0xff] }
 0x731   : > { %v4463_v40 = vmax.f32 %v4336_v20, %v4442_v37  ;;  %v5424_v37 = vld [vmem:[%s9319_s9 + $0x128] sm:$0xff]  ;;  %v5421_v20 = vld [vmem:[%s9319_s9 + $0x110] sm:$0xff] }
 0x736   : > { %v4391_v18 = vpop.f32.mrf.mxu2  ;;  %v4444_v58 = vpop.f32.mrf.mxu3 }
 0x737   : > { %v4288_v24 = vpop.f32.mrf.mxu0  ;;  %v4341_v12 = vpop.f32.mrf.mxu1  ;;  %v4445_v11 = vadd.f32 %v4444_v58, %v4391_v18  ;;  %v5413_v18 = vld [vmem:[%s9319_s9 + $0xd0] sm:$0xff]  ;;  %v5412_v58 = vld [vmem:[%s9319_s9 + $0xc8] sm:$0xff] }
 0x738   : > { %v4342_v46 = vadd.f32 %v4341_v12, %v4288_v24  ;;  %v5411_v24 = vld [vmem:[%s9319_s9 + $0xc0] sm:$0xff]  ;;  %v5410_v12 = vld [vmem:[%s9319_s9 + $0xb8] sm:$0xff] }
 0x739   : > { %v4464_v15 = vmax.f32 %v4339_v36, %v4445_v11  ;;  %v5426_v11 = vld [vmem:[%s9319_s9 + $0x138] sm:$0xff]  ;;  %v5423_v36 = vld [vmem:[%s9319_s9 + $0x120] sm:$0xff] }
 0x73e   : > { %v4394_v27 = vpop.f32.mrf.mxu2  ;;  %v4447_v6 = vpop.f32.mrf.mxu3 }
 0x73f   : > { %v4291_v43 = vpop.f32.mrf.mxu0  ;;  %v4344_v30 = vpop.f32.mrf.mxu1  ;;  %v4448_v31 = vadd.f32 %v4447_v6, %v4394_v27  ;;  %v5434_v27 = vld [vmem:[%s9319_s9 + $0x178] sm:$0xff]  ;;  %v5409_v6 = vld [vmem:[%s9319_s9 + $0xb0] sm:$0xff] }
 0x740   : > { %v4345_v1 = vadd.f32 %v4344_v30, %v4291_v43  ;;  %v5433_v43 = vld [vmem:[%s9319_s9 + $0x170] sm:$0xff]  ;;  %v5408_v30 = vld [vmem:[%s9319_s9 + $0xa8] sm:$0xff] }
 0x741   : > { %v4465_v59 = vmax.f32 %v4342_v46, %v4448_v31  ;;  %v5428_v31 = vld [vmem:[%s9319_s9 + $0x148] sm:$0xff] }
 0x746   : > { %v4397_v52 = vpop.f32.mrf.mxu2  ;;  %v4450_v9 = vpop.f32.mrf.mxu3 }
 0x747   : > { %v4294_v47 = vpop.f32.mrf.mxu0  ;;  %v4347_v62 = vpop.f32.mrf.mxu1  ;;  %v4451_v5 = vadd.f32 %v4450_v9, %v4397_v52  ;;  %v5407_v52 = vld [vmem:[%s9319_s9 + $0xa0] sm:$0xff]  ;;  %v5432_v9 = vld [vmem:[%s9319_s9 + $0x168] sm:$0xff] }
 0x748   : > { %v4348_v32 = vadd.f32 %v4347_v62, %v4294_v47  ;;  %v5406_v47 = vld [vmem:[%s9319_s9 + $0x98] sm:$0xff]  ;;  %v5431_v62 = vld [vmem:[%s9319_s9 + $0x160] sm:$0xff] }
 0x749   : > { %v4466_v19 = vmax.f32 %v4345_v1, %v4451_v5  ;;  %v5403_v1 = vld [vmem:[%s9319_s9 + $0x80] sm:$0xff] }
 0x74e   : > { %v4400_v2 = vpop.f32.mrf.mxu2  ;;  %v4453_v22 = vpop.f32.mrf.mxu3 }
 0x74f   : > { %v4454_v25 = vadd.f32 %v4453_v22, %v4400_v2  ;;  %v5430_v2 = vld [vmem:[%s9319_s9 + $0x158] sm:$0xff]  ;;  %v5405_v22 = vld [vmem:[%s9319_s9 + $0x90] sm:$0xff] }
 0x751   : > { %v4467_v38 = vmax.f32 %v4348_v32, %v4454_v25  ;;  %v5429_v32 = vld [vmem:[%s9319_s9 + $0x150] sm:$0xff]  ;;  %v5404_v25 = vld [vmem:[%s9319_s9 + $0x88] sm:$0xff] }
 0x753   : > { %5394 = vmatpush.msk.msrb.mxu0 %vm627_vm0, %v4467_v38  ;;  %v5427_v38 = vld [vmem:[%s9319_s9 + $0x140] sm:$0xff] }
 0x755   : > { %4508 = vmatpush.msrb.mxu0 %v4466_v19  ;;  %v5425_v19 = vld [vmem:[%s9319_s9 + $0x130] sm:$0xff] }
 0x757   : > { %4509 = vmatpush.msrb.mxu0 %v4465_v59  ;;  %v5422_v59 = vld [vmem:[%s9319_s9 + $0x118] sm:$0xff] }
 0x759   : > { %4510 = vmatpush.msrb.mxu0 %v4464_v15  ;;  %v5420_v15 = vld [vmem:[%s9319_s9 + $0x108] sm:$0xff] }
 0x75b   : > { %4511 = vmatpush.msrb.mxu0 %v4463_v40 }
 0x75d   : > { %4512 = vmatpush.msrb.mxu0 %v4462_v53 }
 0x75f   : > { %4513 = vmatpush.msrb.mxu0 %v4461_v48  ;;  %v5450_v48 = vld [vmem:[%s9319_s9 + $0x1f8] sm:$0xff] }
 0x761   : > { %4514 = vmatpush.msrb.mxu0 %v4460_v17  ;;  %v4558_v17 = vld [vmem:[%s9319_s9 + $0x28] sm:$0xff] }
 0x763   : > { %4515 = vmatpush.msrb.mxu0 %v4459_v57  ;;  %v4469_v57 = vld [vmem:[%s9318_s8 + $0x8] sm:$0xff] }
 0x765   : > { %4516 = vmatpush.msrb.mxu0 %v4458_v10  ;;  %v4563_v10 = vld [vmem:[%s9319_s9 + $0x50] sm:$0xff] }
 0x767   : > { %4517 = vmatpush.msrb.mxu0 %v4457_v0  ;;  %v4472_v0 = vld [vmem:[%s9318_s8 + $0x20] sm:$0xff] }
 0x769   : > { %4518 = vmatpush.msrb.mxu0 %v4456_v26  ;;  %v4566_v26 = vld [vmem:[%s9319_s9 + $0x68] sm:$0xff] }
 0x76a   : > { %5395 = vmatmul.msk.f32.vlgmr.msrb.gmra.mxu0 %vm2941_vm6, %v4468_v55  ;;  %4571 = vmatpush.msrb.mxu1 %v4566_v26  ;;  %v5449_v55 = vld [vmem:[%s9319_s9 + $0x1f0] sm:$0xff] }
 0x76b   : > { %4648 = vmatpush.msra.mxu0 %v5434_v27 }
 0x76c   : > { %4572 = vmatpush.msrb.mxu1 %v4565_v39  ;;  %v5445_v39 = vld [vmem:[%s9319_s9 + $0x1d0] sm:$0xff] }
 0x76d   : > { %4649 = vmatpush.msra.mxu0 %v5433_v43 }
 0x76e   : > { %4573 = vmatpush.msrb.mxu1 %v4564_v7 }
 0x76f   : > { %4650 = vmatpush.msra.mxu0 %v5432_v9 }
 0x770   : > { %4574 = vmatpush.msrb.mxu1 %v4563_v10  ;;  %v5443_v10 = vld [vmem:[%s9319_s9 + $0x1c0] sm:$0xff] }
 0x771   : > { %4651 = vmatpush.msra.mxu0 %v5431_v62 }
 0x772   : > { %5396 = vmatmul.msk.f32.gmra.mxu0 %vm2941_vm6, %v4469_v57  ;;  %4575 = vmatpush.msrb.mxu1 %v4562_v33  ;;  %v5448_v57 = vld [vmem:[%s9319_s9 + $0x1e8] sm:$0xff] }
 0x773   : > { %4652 = vmatpush.msra.mxu0 %v5430_v2  ;;  %v5497_v2 = vld [vmem:[%s9322_s12] ss:$0 sm:$0xff] }
 0x774   : > { %4576 = vmatpush.msrb.mxu1 %v4561_v56  ;;  %v5442_v56 = vld [vmem:[%s9319_s9 + $0x1b8] sm:$0xff] }
 0x775   : > { %4653 = vmatpush.msra.mxu0 %v5429_v32 }
 0x776   : > { %4577 = vmatpush.msrb.mxu1 %v4560_v21  ;;  %v5441_v21 = vld [vmem:[%s9319_s9 + $0x1b0] sm:$0xff] }
 0x777   : > { %4654 = vmatpush.msra.mxu0 %v5428_v31 }
 0x778   : > { %4578 = vmatpush.msrb.mxu1 %v4559_v63  ;;  %v5440_v63 = vld [vmem:[%s9319_s9 + $0x1a8] sm:$0xff] }
 0x779   : > { %4655 = vmatpush.msra.mxu0 %v5427_v38 }
 0x77a   : > { %5397 = vmatmul.msk.f32.gmra.mxu0 %vm2941_vm6, %v4470_v61  ;;  %4579 = vmatpush.msrb.mxu1 %v4558_v17  ;;  %v5439_v17 = vld [vmem:[%s9319_s9 + $0x1a0] sm:$0xff] }
 0x77b   : > { %4656 = vmatpush.msra.mxu0 %v5426_v11 }
 0x77c   : > { %4580 = vmatpush.msrb.mxu1 %v4557_v49  ;;  %v5438_v49 = vld [vmem:[%s9319_s9 + $0x198] sm:$0xff] }
 0x77d   : > { %4657 = vmatpush.msra.mxu0 %v5425_v19 }
 0x77e   : > { %4581 = vmatpush.msrb.mxu1 %v4556_v13  ;;  %v5437_v13 = vld [vmem:[%s9319_s9 + $0x190] sm:$0xff] }
 0x77f   : > { %4658 = vmatpush.msra.mxu0 %v5424_v37 }
 0x780   : > { %4582 = vmatpush.msrb.mxu1 %v4555_v41  ;;  %v5436_v41 = vld [vmem:[%s9319_s9 + $0x188] sm:$0xff] }
 0x781   : > { %4659 = vmatpush.msra.mxu0 %v5423_v36 }
 0x782   : > { %5398 = vmatmul.msk.f32.gmra.mxu0 %vm2941_vm6, %v4471_v34  ;;  %4583 = vmatpush.msrb.mxu1 %v4554_v44  ;;  %v5447_v34 = vld [vmem:[%s9319_s9 + $0x1e0] sm:$0xff] }
 0x783   : > { %4660 = vmatpush.msra.mxu0 %v5422_v59  ;;  %v5435_v44 = vld [vmem:[%s9319_s9 + $0x180] sm:$0xff] }
 0x784   : > { %4584 = vmatpush.msrb.mxu1 %v4553_v8 }
 0x785   : > { %4661 = vmatpush.msra.mxu0 %v5421_v20 }
 0x786   : > { %4610 = vmatpush.msra.mxu1 %v5418_v42  ;;  %v4714_v42 = vld [vmem:[%s9321_s11 + $0x30] sm:$0x3] }
 0x787   : > { %4662 = vmatpush.msra.mxu0 %v5420_v15  ;;  %5451 = vmatpush.msk.msra.mxu2 %vm4723_vm8, %v4714_v42 }
 0x788   : > { %4611 = vmatpush.msra.mxu1 %v5417_v14  ;;  %v4713_v14 = vld [vmem:[%s9321_s11 + $0x28] sm:$0xff] }
 0x789   : > { %4663 = vmatpush.msra.mxu0 %v5419_v50  ;;  %4737 = vmatpush.msra.mxu2 %v4713_v14 }
 0x78a   : > { %5399 = vmatmul.msk.f32.gmra.mxu0 %vm2941_vm6, %v4472_v0  ;;  %4612 = vmatpush.msra.mxu1 %v5416_v23  ;;  %v5444_v0 = vld [vmem:[%s9319_s9 + $0x1c8] sm:$0xff]  ;;  %v4712_v23 = vld [vmem:[%s9321_s11 + $0x20] sm:$0xff] }
 0x78b   : > { %4738 = vmatpush.msra.mxu2 %v4712_v23 }
 0x78c   : > { %4613 = vmatpush.msra.mxu1 %v5415_v3  ;;  %v4711_v3 = vld [vmem:[%s9321_s11 + $0x18] sm:$0xff] }
 0x78d   : > { %4739 = vmatpush.msra.mxu2 %v4711_v3 }
 0x78e   : > { %4614 = vmatpush.msra.mxu1 %v5414_v45  ;;  %v4710_v45 = vld [vmem:[%s9321_s11 + $0x10] sm:$0xff] }
 0x78f   : > { %4740 = vmatpush.msra.mxu2 %v4710_v45 }
 0x790   : > { %4615 = vmatpush.msra.mxu1 %v5413_v18  ;;  %v4709_v18 = vld [vmem:[%s9321_s11 + $0x8] sm:$0xff] }
 0x791   : > { %4741 = vmatpush.msra.mxu2 %v4709_v18 }
 0x792   : > { %5400 = vmatmul.msk.f32.gmra.mxu0 %vm2941_vm6, %v4473_v51  ;;  %4616 = vmatpush.msra.mxu1 %v5412_v58  ;;  %v4708_v58 = vld [vmem:[%s9321_s11] sm:$0xff] }
 0x793   : > { %4742 = vmatpush.msra.mxu2 %v4708_v58 }
 0x794   : > { %4617 = vmatpush.msra.mxu1 %v5411_v24 }
 0x796   : > { %4618 = vmatpush.msra.mxu1 %v5410_v12  ;;  %v5496_v12 = vld [vmem:[%s9320_s10] ss:$0 sm:$0xff] }
 0x798   : > { %4619 = vmatpush.msra.mxu1 %v5409_v6 }
 0x79a   : > { %5401 = vmatmul.msk.f32.gmra.mxu0 %vm2941_vm6, %v4474_v35  ;;  %4620 = vmatpush.msra.mxu1 %v5408_v30 }
 0x79c   : > { %4621 = vmatpush.msra.mxu1 %v5407_v52 }
 0x79e   : > { %4622 = vmatpush.msra.mxu1 %v5406_v47 }
 0x7a0   : > { %4623 = vmatpush.msra.mxu1 %v5405_v22 }
 0x7a2   : > { %5402 = vmatmul.msk.f32.gmra.mxu0 %vm2941_vm6, %v4475_v16  ;;  %4624 = vmatpush.msra.mxu1 %v5404_v25 }
 0x7a4   : > { %4625 = vmatpush.msra.mxu1 %v5403_v1 }
 0x7e7   : > { %v4520_v5 = vpop.f32.mrf.mxu0 }
 0x7ef   : > { %v4523_v46 = vpop.f32.mrf.mxu0 }
 0x7f7   : > { %v4526_v29 = vpop.f32.mrf.mxu0 }
 0x7ff   : > { %v4529_v4 = vpop.f32.mrf.mxu0 }
 0x807   : > { %v4532_v40 = vpop.f32.mrf.mxu0 }
 0x808   : > { %v4544_v60 = vmax.f32 %v4520_v5, %v4532_v40 }
 0x80a   : > { %v4548_v53 = vmax.f32 %v4544_v60, 0.0 }
 0x80c   : > { %4585 = vmatmul.f32.vlgmr.msrb.gmra.mxu1 %v4548_v53 }
 0x80d   : > { %4686 = vmatpush.msrb.mxu1 %v5450_v48 }
 0x80f   : > { %4687 = vmatpush.msrb.mxu1 %v5449_v55  ;;  %v4535_v61 = vpop.f32.mrf.mxu0 }
 0x810   : > { %v4545_v28 = vmax.f32 %v4523_v46, %v4535_v61 }
 0x811   : > { %4688 = vmatpush.msrb.mxu1 %v5448_v57 }
 0x812   : > { %v4549_v26 = vmax.f32 %v4545_v28, 0.0 }
 0x813   : > { %4689 = vmatpush.msrb.mxu1 %v5447_v34 }
 0x814   : > { %4626 = vmatmul.f32.vlgmr.msra.gmra.mxu1 %v4549_v26 }
 0x815   : > { %4690 = vmatpush.msrb.mxu1 %v5446_v54 }
 0x817   : > { %4691 = vmatpush.msrb.mxu1 %v5445_v39  ;;  %v4538_v7 = vpop.f32.mrf.mxu0 }
 0x818   : > { %v4546_v33 = vmax.f32 %v4526_v29, %v4538_v7 }
 0x819   : > { %4692 = vmatpush.msrb.mxu1 %v5444_v0 }
 0x81a   : > { %v4550_v51 = vmax.f32 %v4546_v33, 0.0 }
 0x81b   : > { %4693 = vmatpush.msrb.mxu1 %v5443_v10 }
 0x81c   : > { %4664 = vmatmul.f32.vlgmr.msra.gmra.mxu0 %v4550_v51 }
 0x81d   : > { %4694 = vmatpush.msrb.mxu1 %v5442_v56 }
 0x81f   : > { %4695 = vmatpush.msrb.mxu1 %v5441_v21  ;;  %v4541_v35 = vpop.f32.mrf.mxu0 }
 0x820   : > { %v4547_v16 = vmax.f32 %v4529_v4, %v4541_v35 }
 0x821   : > { %4696 = vmatpush.msrb.mxu1 %v5440_v63 }
 0x822   : > { %v4551_v8 = vmax.f32 %v4547_v16, 0.0 }
 0x823   : > { %4697 = vmatpush.msrb.mxu1 %v5439_v17 }
 0x825   : > { %4698 = vmatpush.msrb.mxu1 %v5438_v49 }
 0x827   : > { %4699 = vmatpush.msrb.mxu1 %v5437_v13 }
 0x829   : > { %4700 = vmatpush.msrb.mxu1 %v5436_v41 }
 0x82b   : > { %4701 = vmatpush.msrb.mxu1 %v5435_v44 }
 0x82c   : > { %4702 = vmatmul.f32.vlgmr.msrb.gmra.mxu1 %v4551_v8 }
 0x889   : > { %v4586_v24 = vpop.f32.mrf.mxu1 }
 0x88a   : > { %v4592_v6 = vadd.f32 %v5496_v12, %v4586_v24 }
 0x891   : > { %v4627_v27 = vpop.f32.mrf.mxu1 }
 0x892   : > { %v4630_v30 = vadd.f32 %v4627_v27, %v4592_v6 }
 0x899   : > { %v4665_v43 = vpop.f32.mrf.mxu0 }
 0x89a   : > { %v4668_v52 = vadd.f32 %v4665_v43, %v4630_v30 }
 0x8a9   : > { %v4703_v9 = vpop.f32.mrf.mxu1 }
 0x8aa   : > { %v4706_v47 = vadd.f32 %v4703_v9, %v4668_v52 }
 0x8ac   : > { %v4707_v62 = vmax.f32 %v4706_v47, 0.0 }
 0x8ae   : > { %5452 = vmatmul.msk.f32.vlgmr.msra.gmra.mxu2 %vm4719_vm9, %v4707_v62 }
 0x931   : > { %v4744_v22 = vpop.f32.mrf.mxu2 }
 0x932   : > { %v4745_v5 = vadd.f32 %v5497_v2, %v4744_v22 }
 0x934   : > { %4747 = vmax.xlane.f32.xlu0 %v4745_v5 }
 0x9a7   : > { %v4748_v32 = vpop.xlane.xlu0 %4747 }
 0x9a8   : > { %v4749_v25 = vsub.f32 %v4745_v5, %v4748_v32 }
 0x9aa   : > { %v4750_v31 = vmul.f32 1.442695, %v4749_v25 }
 0x9ac   : > { %5498 = vpow2.f32 %v4750_v31 }
 0x9b2   : > { %v5499_v1 = vpop.eup %5498 }
 0x9b3   : > { %4752 = vadd.xlane.f32.xlu0 %v5499_v1 }
 0xa26   : > { %v4753_v38 = vpop.xlane.xlu0 %4752 }
 0xa27   : > { %5500 = vlog2.f32 %v4753_v38 }
 0xa2d   : > { %v5501_v11 = vpop.eup %5500 }
 0xa2e   : > { %v4755_v46 = vmul.f32 0.6931472, %v5501_v11 }
 0xa30   : > { %v4756_v19 = vsub.f32 %v4749_v25, %v4755_v46 }
 0xa32   : > { %4757 = vst [vmem:[%s434_s14] sm:$0xff] %v4756_v19 }
 0xa33   : > { %5557 = shalt.err (!%p5554_p3)
}
 0xa34   : > { %5457 = dma.vmem_to_hbm [thread:$0]  (%p5702_p5), %s4772_s21, 128, %s4774_s23, %s4759_s24  }
 0xa35 PF: > { %p5463_p4 = scmp.ge.s32.totalorder %s5592_s28, 2  ;;  %s4785_s15 = sand.u32 1, %s5580_s25  }
 0xa36   : > { %s4786_s17 = scalar_lea.sflag [#allocation3], %s4785_s15 }
 0xa37   : > { %p5460_p7 = pnand %p5463_p4, %p5706_p6 }
 0xa39   : > { %p5461_p8 = pneg %p5460_p7 }
 0xa3b   : > { %5575 = dma.done.wait (%p5461_p8), %s4786_s17, 128  }
 0xa3c   : > { %5577 = vsyncadd (%p5461_p8), %s4786_s17, 4294967168  ;;  %s9578_s28 = sld [smem:[#allocation6_spill]]  ;;  %s9581_s25 = smov %s5584_s26 }
 0xa3d   : > { %s9579_s0 = sld [smem:[#allocation5_spill]] }
 0xa3e   : > { %s9580_s27 = sld [smem:[#allocation7_spill]] }
 0xa42   : > { %p23_p9 = scmp.ge.s32.totalorder %s9578_s28, 4  }
 0xa43   : > { %s9582_s26 = smov %s9579_s0 }
 0xa44   :  { %25 = sbr.rel (!%p23_p9) target bundleno = 5 (0x5), region = 118 }
 0xa49   :  { %4792 = vsyncpa [#allocation3], 1 }
 0xa4a   :  { %4794 = vsyncpa [#allocation3 + $0x1], 1 }

</bundles_post_ra>
